<compile_context>
chip_gen: v6e
topology: v6e:2x2x1
jax: 0.10.0
libtpu: 0.0.40
codegen_flags: <defaults>
</compile_context>

<pallas_src>
import functools

import jax
import jax.numpy as jnp
from jax.experimental import pallas as pl
from jax.experimental.pallas import tpu as pltpu

N_ENC = 2          # len(encoders_x)
LN_EPS = 1e-5      # nn.LayerNorm default eps


def _gelu(x):
    c = jnp.sqrt(2.0 / jnp.pi).astype(x.dtype)
    return 0.5 * x * (1.0 + jnp.tanh(c * (x + 0.044715 * x * x * x)))


# ----------------------------------------------------------------------------
# Kernel: one batch tile per grid step; all weights VMEM-resident.
# ----------------------------------------------------------------------------
def jepa_kernel(x_ref, w1c_ref, b1c_ref, w2_ref, b2_ref,
                wa_ref, ba_ref, va_ref,
                gamma_ref, beta_ref,
                wp1_ref, bp1_ref, wp2_ref, bp2_ref,
                out_ref, *, matmul_dtype):
    md = matmul_dtype
    D = out_ref.shape[-1]
    tb = x_ref.shape[0]

    x = x_ref[...].astype(md)                                    # (TB, Din)

    # ---- both encoders' first Linear fused into ONE wide MXU call ----------
    h = jnp.dot(x, w1c_ref[...],
                preferred_element_type=jnp.float32) + b1c_ref[...]   # (TB, 2D)
    h = _gelu(h)

    # ---- second Linear of each encoder (distinct weights) ------------------
    e0 = jnp.dot(h[:, :D].astype(md), w2_ref[0],
                 preferred_element_type=jnp.float32) + b2_ref[0]     # (TB, D)
    e1 = jnp.dot(h[:, D:].astype(md), w2_ref[1],
                 preferred_element_type=jnp.float32) + b2_ref[1]     # (TB, D)

    # ---- hsa_x: row-stack both embeddings -> one (2*TB, D)@(D, Da) matmul ---
    e_rows = jnp.concatenate([e0, e1], axis=0).astype(md)            # (2TB, D)
    u = jnp.tanh(jnp.dot(e_rows, wa_ref[...],
                         preferred_element_type=jnp.float32) + ba_ref[...])
    # score: VPU multiply + lane reduce instead of an N=1 MXU matmul
    s = jnp.sum(u * va_ref[...], axis=-1, keepdims=True)             # (2TB, 1)
    s0 = s[:tb]
    s1 = s[tb:]

    # ---- 2-way softmax specialization: sigmoid(s0 - s1) == softmax()[0] ----
    w0 = jax.nn.sigmoid(s0 - s1)
    x_embed = w0 * e0 + (1.0 - w0) * e1                              # (TB, D)

    # ---- nn.LayerNorm(embed_dim), f32 ---------------------------------------
    mu = jnp.mean(x_embed, axis=-1, keepdims=True)
    xc = x_embed - mu
    var = jnp.mean(xc * xc, axis=-1, keepdims=True)
    x_norm = xc * jax.lax.rsqrt(var + LN_EPS) * gamma_ref[...] + beta_ref[...]

    # ---- predictor (unsqueeze(1)/squeeze(1) is a no-op for a token-wise MLP)
    hp = jnp.dot(x_norm.astype(md), wp1_ref[...],
                 preferred_element_type=jnp.float32) + bp1_ref[...]
    hp = _gelu(hp)
    pred = jnp.dot(hp.astype(md), wp2_ref[...],
                   preferred_element_type=jnp.float32) + bp2_ref[...]

    out_ref[...] = pred.astype(out_ref.dtype)


# ----------------------------------------------------------------------------
# Wrapper
# ----------------------------------------------------------------------------
def _batch_tiling(b):
    """Pad batch to a multiple of 8 and pick TB so grid has >=2 parallel steps
    (dual-TC v7x) whenever the batch allows it; TB is a multiple of 8."""
    b8 = ((b + 7) // 8) * 8
    if b8 <= 8:
        return b8, b8
    tb = min(512, ((b8 // 2 + 7) // 8) * 8)
    b_pad = ((b8 + tb - 1) // tb) * tb
    return b_pad, tb


def _resident_spec(shape):
    n = len(shape)
    return pl.BlockSpec(shape, lambda i, _n=n: (0,) * _n)


def jepa_forward(x, p, *, matmul_dtype=jnp.float32):
    B, Din = x.shape
    D = p["gamma"].shape[-1]

    b_pad, TB = _batch_tiling(B)
    if b_pad != B:
        x = jnp.pad(x, ((0, b_pad - B), (0, 0)))
    grid = (b_pad // TB,)

    # ---- one-time parameter prep (outside the kernel) -----------------------
    w1c = jnp.concatenate([p["w1"][0], p["w1"][1]], axis=1)     # (Din, 2D)
    b1c = jnp.concatenate([p["b1"][0], p["b1"][1]], axis=1)     # (1, 2D)
    va_row = p["va"].reshape(1, -1)                             # (1, Da)

    w2, wa, wp1, wp2 = p["w2"], p["wa"], p["wp1"], p["wp2"]
    if jnp.dtype(matmul_dtype) != jnp.dtype(jnp.float32):
        # bf16 MXU operands (v6e/v7x); halves resident weight VMEM too.
        cast = lambda a: a.astype(matmul_dtype)
        w1c, w2, wa, wp1, wp2 = map(cast, (w1c, w2, wa, wp1, wp2))
    x = x.astype(matmul_dtype) if jnp.dtype(matmul_dtype) != jnp.dtype(
        jnp.float32) else x

    weights = (w1c, b1c, w2, p["b2"], wa, p["ba"], va_row,
               p["gamma"], p["beta"], wp1, p["bp1"], wp2, p["bp2"])

    # explicit VMEM budget: double-buffered weights + I/O tiles + headroom
    resident_bytes = sum(int(a.size) * a.dtype.itemsize for a in weights)
    io_bytes = TB * Din * x.dtype.itemsize + TB * D * 4
    vmem_limit = int(min(100 << 20,
                         max(2 * (resident_bytes + io_bytes) + (8 << 20),
                             16 << 20)))
    # Note: for very large D on v7x (64 MiB VMEM), switch constant-index
    # weight specs to pipeline_mode=pl.Buffered(1) or tile the K/N dims.

    in_specs = [pl.BlockSpec((TB, Din), lambda i: (i, 0))]       # x: batch-tiled
    in_specs += [_resident_spec(a.shape) for a in weights]
    out_spec = pl.BlockSpec((TB, D), lambda i: (i, 0))           # lane-dense

    out = pl.pallas_call(
        functools.partial(jepa_kernel, matmul_dtype=matmul_dtype),
        out_shape=jax.ShapeDtypeStruct((b_pad, D), jnp.float32),
        grid=grid,
        in_specs=in_specs,
        out_specs=out_spec,
        compiler_params=pltpu.CompilerParams(
            dimension_semantics=("parallel",),
            vmem_limit_bytes=vmem_limit),
    )(x, *weights)

    return out[:B]


# ----------------------------------------------------------------------------
# Pure-JAX reference mirroring the PyTorch forward semantics
# ----------------------------------------------------------------------------
def jepa_reference(x, p):
    encs, scores = [], []
    for i in range(N_ENC):
        h = _gelu(x @ p["w1"][i] + p["b1"][i])
        e = h @ p["w2"][i] + p["b2"][i]
        encs.append(e)
        u = jnp.tanh(e @ p["wa"] + p["ba"])
        scores.append(u @ p["va"])
    c = jnp.stack(encs, axis=1)                       # torch.stack(dim=1)
    s = jnp.concatenate(scores, axis=1)
    w = jax.nn.softmax(s, axis=1)
    x_embed = jnp.einsum("bn,bnd->bd", w, c)          # hsa_x pooling
    mu = x_embed.mean(-1, keepdims=True)
    var = ((x_embed - mu) ** 2).mean(-1, keepdims=True)
    xn = (x_embed - mu) / jnp.sqrt(var + LN_EPS) * p["gamma"] + p["beta"]
    h = _gelu(xn @ p["wp1"] + p["bp1"])
    return h @ p["wp2"] + p["bp2"]


def init_params(key, din, d, da, dp):
    ks = jax.random.split(key, 8)
    s = lambda k, shape, scale: (scale * jax.random.normal(k, shape)).astype(jnp.float32)
    return {
        "w1": s(ks[0], (N_ENC, din, d), 0.05),
        "b1": jnp.zeros((N_ENC, 1, d), jnp.float32),
        "w2": s(ks[1], (N_ENC, d, d), 0.05),
        "b2": jnp.zeros((N_ENC, 1, d), jnp.float32),
        "wa": s(ks[2], (d, da), 0.05),
        "ba": jnp.zeros((1, da), jnp.float32),
        "va": s(ks[3], (da, 1), 0.05),
        "gamma": jnp.ones((1, d), jnp.float32),
        "beta": jnp.zeros((1, d), jnp.float32),
        "wp1": s(ks[4], (d, dp), 0.05),
        "bp1": jnp.zeros((1, dp), jnp.float32),
        "wp2": s(ks[5], (dp, d), 0.05),
        "bp2": jnp.zeros((1, d), jnp.float32),
    }


if __name__ == "__main__":
    # MXU/lane-aligned but still small: B=256 -> TB=128, grid=(2,) parallel.
    B, Din, D, Da, Dp = 256, 128, 128, 128, 256

    key = jax.random.PRNGKey(0)
    kx, kp = jax.random.split(key)
    x = jax.random.normal(kx, (B, Din), dtype=jnp.float32)
    params = init_params(kp, Din, D, Da, Dp)

    ref = jax.block_until_ready(jepa_reference(x, params))

    # f32 path (default): tight parity with the reference
    out = jax.block_until_ready(jepa_forward(x, params))
    assert out.shape == (B, D)
    assert jnp.allclose(out, ref, atol=1e-3, rtol=1e-3), "f32 kernel mismatch"

    # bf16 MXU-operand path (v6e/v7x feedback); f32 accumulation & elementwise
    out_bf16 = jax.block_until_ready(
        jepa_forward(x, params, matmul_dtype=jnp.bfloat16))
    assert float(jnp.max(jnp.abs(out_bf16 - ref))) < 0.1, "bf16 kernel diverged"

    print("KERNEL_OK")
</pallas_src>

<mosaic_0001>
module attributes {stable_mosaic.version = 11 : i64} {
  func.func @jepa_kernel(%arg0: i32, %arg1: memref<128x128xf32, #tpu.memory_space<vmem>>, %arg2: memref<128x256xf32, #tpu.memory_space<vmem>>, %arg3: memref<1x256xf32, #tpu.memory_space<vmem>>, %arg4: memref<2x128x128xf32, #tpu.memory_space<vmem>>, %arg5: memref<2x1x128xf32, #tpu.memory_space<vmem>>, %arg6: memref<128x128xf32, #tpu.memory_space<vmem>>, %arg7: memref<1x128xf32, #tpu.memory_space<vmem>>, %arg8: memref<1x128xf32, #tpu.memory_space<vmem>>, %arg9: memref<1x128xf32, #tpu.memory_space<vmem>>, %arg10: memref<1x128xf32, #tpu.memory_space<vmem>>, %arg11: memref<128x256xf32, #tpu.memory_space<vmem>>, %arg12: memref<1x256xf32, #tpu.memory_space<vmem>>, %arg13: memref<256x128xf32, #tpu.memory_space<vmem>>, %arg14: memref<1x128xf32, #tpu.memory_space<vmem>>, %arg15: memref<128x128xf32, #tpu.memory_space<vmem>>) attributes {dimension_semantics = [#tpu.dimension_semantics<parallel>], iteration_bounds = array<i64: 2>, scalar_prefetch = 0 : i64, scratch_operands = 0 : i64, tpu.core_type = #tpu.core_type<tc>, window_params = [{transform_indices = @transform_0, window_bounds = array<i64: 128, 128>}, {pipeline_mode = #tpu.pipeline_mode<synchronous>, transform_indices = @transform_1, window_bounds = array<i64: 128, 256>}, {pipeline_mode = #tpu.pipeline_mode<synchronous>, transform_indices = @transform_2, window_bounds = array<i64: 1, 256>}, {pipeline_mode = #tpu.pipeline_mode<synchronous>, transform_indices = @transform_3, window_bounds = array<i64: 2, 128, 128>}, {pipeline_mode = #tpu.pipeline_mode<synchronous>, transform_indices = @transform_4, window_bounds = array<i64: 2, 1, 128>}, {pipeline_mode = #tpu.pipeline_mode<synchronous>, transform_indices = @transform_5, window_bounds = array<i64: 128, 128>}, {pipeline_mode = #tpu.pipeline_mode<synchronous>, transform_indices = @transform_6, window_bounds = array<i64: 1, 128>}, {pipeline_mode = #tpu.pipeline_mode<synchronous>, transform_indices = @transform_7, window_bounds = array<i64: 1, 128>}, {pipeline_mode = #tpu.pipeline_mode<synchronous>, transform_indices = @transform_8, window_bounds = array<i64: 1, 128>}, {pipeline_mode = #tpu.pipeline_mode<synchronous>, transform_indices = @transform_9, window_bounds = array<i64: 1, 128>}, {pipeline_mode = #tpu.pipeline_mode<synchronous>, transform_indices = @transform_10, window_bounds = array<i64: 128, 256>}, {pipeline_mode = #tpu.pipeline_mode<synchronous>, transform_indices = @transform_11, window_bounds = array<i64: 1, 256>}, {pipeline_mode = #tpu.pipeline_mode<synchronous>, transform_indices = @transform_12, window_bounds = array<i64: 256, 128>}, {pipeline_mode = #tpu.pipeline_mode<synchronous>, transform_indices = @transform_13, window_bounds = array<i64: 1, 128>}, {transform_indices = @transform_14, window_bounds = array<i64: 128, 128>}]} {
    %c0 = arith.constant 0 : index
    %c0_0 = arith.constant 0 : index
    %0 = vector.load %arg1[%c0, %c0_0] : memref<128x128xf32, #tpu.memory_space<vmem>>, vector<128x128xf32>
    %c0_1 = arith.constant 0 : index
    %c0_2 = arith.constant 0 : index
    %1 = vector.load %arg2[%c0_1, %c0_2] : memref<128x256xf32, #tpu.memory_space<vmem>>, vector<128x256xf32>
    %cst = arith.constant dense<0.000000e+00> : vector<128x256xf32>
    %2 = tpu.matmul %0, %1, %cst {dimension_numbers = #tpu.dot_dimension_numbers<[1], [0], [0], [1], [0, 0, 1, 1], [], []>} : vector<128x128xf32>, vector<128x256xf32>, vector<128x256xf32> -> vector<128x256xf32>
    %c0_3 = arith.constant 0 : index
    %c0_4 = arith.constant 0 : index
    %3 = vector.load %arg3[%c0_3, %c0_4] : memref<1x256xf32, #tpu.memory_space<vmem>>, vector<1x256xf32>
    %4 = vector.broadcast %3 : vector<1x256xf32> to vector<128x256xf32>
    %5 = arith.addf %2, %4 : vector<128x256xf32>
    %cst_5 = arith.constant 0.636619746 : f32
    %6 = math.sqrt %cst_5 : f32
    %cst_6 = arith.constant 5.000000e-01 : f32
    %7 = vector.broadcast %cst_6 : f32 to vector<128x256xf32>
    %8 = arith.mulf %7, %5 : vector<128x256xf32>
    %cst_7 = arith.constant 4.471500e-02 : f32
    %9 = vector.broadcast %cst_7 : f32 to vector<128x256xf32>
    %10 = arith.mulf %9, %5 : vector<128x256xf32>
    %11 = arith.mulf %10, %5 : vector<128x256xf32>
    %12 = arith.mulf %11, %5 : vector<128x256xf32>
    %13 = arith.addf %5, %12 : vector<128x256xf32>
    %14 = vector.broadcast %6 : f32 to vector<128x256xf32>
    %15 = arith.mulf %14, %13 : vector<128x256xf32>
    %16 = math.tanh %15 : vector<128x256xf32>
    %cst_8 = arith.constant 1.000000e+00 : f32
    %17 = vector.broadcast %cst_8 : f32 to vector<128x256xf32>
    %18 = arith.addf %17, %16 : vector<128x256xf32>
    %19 = arith.mulf %8, %18 : vector<128x256xf32>
    %20 = vector.extract_strided_slice %19 {offsets = [0, 0], sizes = [128, 128], strides = [1, 1]} : vector<128x256xf32> to vector<128x128xf32>
    %c0_9 = arith.constant 0 : index
    %c0_10 = arith.constant 0 : index
    %c0_11 = arith.constant 0 : index
    %21 = vector.load %arg4[%c0_9, %c0_10, %c0_11] : memref<2x128x128xf32, #tpu.memory_space<vmem>>, vector<1x128x128xf32>
    %22 = vector.shape_cast %21 : vector<1x128x128xf32> to vector<128x128xf32>
    %cst_12 = arith.constant dense<0.000000e+00> : vector<128x128xf32>
    %23 = tpu.matmul %20, %22, %cst_12 {dimension_numbers = #tpu.dot_dimension_numbers<[1], [0], [0], [1], [0, 0, 1, 1], [], []>} : vector<128x128xf32>, vector<128x128xf32>, vector<128x128xf32> -> vector<128x128xf32>
    %c0_13 = arith.constant 0 : index
    %c0_14 = arith.constant 0 : index
    %c0_15 = arith.constant 0 : index
    %24 = vector.load %arg5[%c0_13, %c0_14, %c0_15] : memref<2x1x128xf32, #tpu.memory_space<vmem>>, vector<1x1x128xf32>
    %25 = vector.shape_cast %24 : vector<1x1x128xf32> to vector<1x128xf32>
    %26 = vector.broadcast %25 : vector<1x128xf32> to vector<128x128xf32>
    %27 = arith.addf %23, %26 : vector<128x128xf32>
    %28 = vector.extract_strided_slice %19 {offsets = [0, 128], sizes = [128, 128], strides = [1, 1]} : vector<128x256xf32> to vector<128x128xf32>
    %c1 = arith.constant 1 : index
    %c0_16 = arith.constant 0 : index
    %c0_17 = arith.constant 0 : index
    %29 = vector.load %arg4[%c1, %c0_16, %c0_17] : memref<2x128x128xf32, #tpu.memory_space<vmem>>, vector<1x128x128xf32>
    %30 = vector.shape_cast %29 : vector<1x128x128xf32> to vector<128x128xf32>
    %cst_18 = arith.constant dense<0.000000e+00> : vector<128x128xf32>
    %31 = tpu.matmul %28, %30, %cst_18 {dimension_numbers = #tpu.dot_dimension_numbers<[1], [0], [0], [1], [0, 0, 1, 1], [], []>} : vector<128x128xf32>, vector<128x128xf32>, vector<128x128xf32> -> vector<128x128xf32>
    %c1_19 = arith.constant 1 : index
    %c0_20 = arith.constant 0 : index
    %c0_21 = arith.constant 0 : index
    %32 = vector.load %arg5[%c1_19, %c0_20, %c0_21] : memref<2x1x128xf32, #tpu.memory_space<vmem>>, vector<1x1x128xf32>
    %33 = vector.shape_cast %32 : vector<1x1x128xf32> to vector<1x128xf32>
    %34 = vector.broadcast %33 : vector<1x128xf32> to vector<128x128xf32>
    %35 = arith.addf %31, %34 : vector<128x128xf32>
    %36 = tpu.concatenate %27, %35 in 0 : vector<128x128xf32>, vector<128x128xf32> -> vector<256x128xf32>
    %c0_22 = arith.constant 0 : index
    %c0_23 = arith.constant 0 : index
    %37 = vector.load %arg6[%c0_22, %c0_23] : memref<128x128xf32, #tpu.memory_space<vmem>>, vector<128x128xf32>
    %cst_24 = arith.constant dense<0.000000e+00> : vector<256x128xf32>
    %38 = tpu.matmul %36, %37, %cst_24 {dimension_numbers = #tpu.dot_dimension_numbers<[1], [0], [0], [1], [0, 0, 1, 1], [], []>} : vector<256x128xf32>, vector<128x128xf32>, vector<256x128xf32> -> vector<256x128xf32>
    %c0_25 = arith.constant 0 : index
    %c0_26 = arith.constant 0 : index
    %39 = vector.load %arg7[%c0_25, %c0_26] : memref<1x128xf32, #tpu.memory_space<vmem>>, vector<1x128xf32>
    %40 = vector.broadcast %39 : vector<1x128xf32> to vector<256x128xf32>
    %41 = arith.addf %38, %40 : vector<256x128xf32>
    %42 = math.tanh %41 : vector<256x128xf32>
    %c0_27 = arith.constant 0 : index
    %c0_28 = arith.constant 0 : index
    %43 = vector.load %arg8[%c0_27, %c0_28] : memref<1x128xf32, #tpu.memory_space<vmem>>, vector<1x128xf32>
    %44 = vector.broadcast %43 : vector<1x128xf32> to vector<256x128xf32>
    %45 = arith.mulf %42, %44 : vector<256x128xf32>
    %cst_29 = arith.constant dense<0.000000e+00> : vector<256xf32>
    %46 = vector.multi_reduction <add>, %45, %cst_29 [1] : vector<256x128xf32> to vector<256xf32>
    %47 = vector.shape_cast %46 : vector<256xf32> to vector<256x1xf32>
    %48 = vector.extract_strided_slice %47 {offsets = [0, 0], sizes = [128, 1], strides = [1, 1]} : vector<256x1xf32> to vector<128x1xf32>
    %49 = vector.extract_strided_slice %47 {offsets = [128, 0], sizes = [128, 1], strides = [1, 1]} : vector<256x1xf32> to vector<128x1xf32>
    %50 = arith.subf %48, %49 : vector<128x1xf32>
    %51 = arith.negf %50 : vector<128x1xf32>
    %52 = math.exp %51 : vector<128x1xf32>
    %cst_30 = arith.constant 1.000000e+00 : f32
    %53 = vector.broadcast %cst_30 : f32 to vector<128x1xf32>
    %54 = arith.addf %53, %52 : vector<128x1xf32>
    %55 = arith.divf %53, %54 : vector<128x1xf32>
    %56 = vector.broadcast %55 : vector<128x1xf32> to vector<128x128xf32>
    %57 = arith.mulf %56, %27 : vector<128x128xf32>
    %cst_31 = arith.constant 1.000000e+00 : f32
    %58 = vector.broadcast %cst_31 : f32 to vector<128x1xf32>
    %59 = arith.subf %58, %55 : vector<128x1xf32>
    %60 = vector.broadcast %59 : vector<128x1xf32> to vector<128x128xf32>
    %61 = arith.mulf %60, %35 : vector<128x128xf32>
    %62 = arith.addf %57, %61 : vector<128x128xf32>
    %cst_32 = arith.constant dense<0.000000e+00> : vector<128xf32>
    %63 = vector.multi_reduction <add>, %62, %cst_32 [1] : vector<128x128xf32> to vector<128xf32>
    %64 = vector.shape_cast %63 : vector<128xf32> to vector<128x1xf32>
    %cst_33 = arith.constant 1.280000e+02 : f32
    %65 = vector.broadcast %cst_33 : f32 to vector<128x1xf32>
    %66 = arith.divf %64, %65 : vector<128x1xf32>
    %67 = vector.broadcast %66 : vector<128x1xf32> to vector<128x128xf32>
    %68 = arith.subf %62, %67 : vector<128x128xf32>
    %69 = arith.mulf %68, %68 : vector<128x128xf32>
    %cst_34 = arith.constant dense<0.000000e+00> : vector<128xf32>
    %70 = vector.multi_reduction <add>, %69, %cst_34 [1] : vector<128x128xf32> to vector<128xf32>
    %71 = vector.shape_cast %70 : vector<128xf32> to vector<128x1xf32>
    %cst_35 = arith.constant 1.280000e+02 : f32
    %72 = vector.broadcast %cst_35 : f32 to vector<128x1xf32>
    %73 = arith.divf %71, %72 : vector<128x1xf32>
    %cst_36 = arith.constant 9.99999974E-6 : f32
    %74 = vector.broadcast %cst_36 : f32 to vector<128x1xf32>
    %75 = arith.addf %73, %74 : vector<128x1xf32>
    %76 = math.rsqrt %75 : vector<128x1xf32>
    %77 = vector.broadcast %76 : vector<128x1xf32> to vector<128x128xf32>
    %78 = arith.mulf %68, %77 : vector<128x128xf32>
    %c0_37 = arith.constant 0 : index
    %c0_38 = arith.constant 0 : index
    %79 = vector.load %arg9[%c0_37, %c0_38] : memref<1x128xf32, #tpu.memory_space<vmem>>, vector<1x128xf32>
    %80 = vector.broadcast %79 : vector<1x128xf32> to vector<128x128xf32>
    %81 = arith.mulf %78, %80 : vector<128x128xf32>
    %c0_39 = arith.constant 0 : index
    %c0_40 = arith.constant 0 : index
    %82 = vector.load %arg10[%c0_39, %c0_40] : memref<1x128xf32, #tpu.memory_space<vmem>>, vector<1x128xf32>
    %83 = vector.broadcast %82 : vector<1x128xf32> to vector<128x128xf32>
    %84 = arith.addf %81, %83 : vector<128x128xf32>
    %c0_41 = arith.constant 0 : index
    %c0_42 = arith.constant 0 : index
    %85 = vector.load %arg11[%c0_41, %c0_42] : memref<128x256xf32, #tpu.memory_space<vmem>>, vector<128x256xf32>
    %cst_43 = arith.constant dense<0.000000e+00> : vector<128x256xf32>
    %86 = tpu.matmul %84, %85, %cst_43 {dimension_numbers = #tpu.dot_dimension_numbers<[1], [0], [0], [1], [0, 0, 1, 1], [], []>} : vector<128x128xf32>, vector<128x256xf32>, vector<128x256xf32> -> vector<128x256xf32>
    %c0_44 = arith.constant 0 : index
    %c0_45 = arith.constant 0 : index
    %87 = vector.load %arg12[%c0_44, %c0_45] : memref<1x256xf32, #tpu.memory_space<vmem>>, vector<1x256xf32>
    %88 = vector.broadcast %87 : vector<1x256xf32> to vector<128x256xf32>
    %89 = arith.addf %86, %88 : vector<128x256xf32>
    %cst_46 = arith.constant 0.636619746 : f32
    %90 = math.sqrt %cst_46 : f32
    %cst_47 = arith.constant 5.000000e-01 : f32
    %91 = vector.broadcast %cst_47 : f32 to vector<128x256xf32>
    %92 = arith.mulf %91, %89 : vector<128x256xf32>
    %cst_48 = arith.constant 4.471500e-02 : f32
    %93 = vector.broadcast %cst_48 : f32 to vector<128x256xf32>
    %94 = arith.mulf %93, %89 : vector<128x256xf32>
    %95 = arith.mulf %94, %89 : vector<128x256xf32>
    %96 = arith.mulf %95, %89 : vector<128x256xf32>
    %97 = arith.addf %89, %96 : vector<128x256xf32>
    %98 = vector.broadcast %90 : f32 to vector<128x256xf32>
    %99 = arith.mulf %98, %97 : vector<128x256xf32>
    %100 = math.tanh %99 : vector<128x256xf32>
    %cst_49 = arith.constant 1.000000e+00 : f32
    %101 = vector.broadcast %cst_49 : f32 to vector<128x256xf32>
    %102 = arith.addf %101, %100 : vector<128x256xf32>
    %103 = arith.mulf %92, %102 : vector<128x256xf32>
    %c0_50 = arith.constant 0 : index
    %c0_51 = arith.constant 0 : index
    %104 = vector.load %arg13[%c0_50, %c0_51] : memref<256x128xf32, #tpu.memory_space<vmem>>, vector<256x128xf32>
    %cst_52 = arith.constant dense<0.000000e+00> : vector<128x128xf32>
    %105 = tpu.matmul %103, %104, %cst_52 {dimension_numbers = #tpu.dot_dimension_numbers<[1], [0], [0], [1], [0, 0, 1, 1], [], []>} : vector<128x256xf32>, vector<256x128xf32>, vector<128x128xf32> -> vector<128x128xf32>
    %c0_53 = arith.constant 0 : index
    %c0_54 = arith.constant 0 : index
    %106 = vector.load %arg14[%c0_53, %c0_54] : memref<1x128xf32, #tpu.memory_space<vmem>>, vector<1x128xf32>
    %107 = vector.broadcast %106 : vector<1x128xf32> to vector<128x128xf32>
    %108 = arith.addf %105, %107 : vector<128x128xf32>
    %c0_55 = arith.constant 0 : index
    %c0_56 = arith.constant 0 : index
    %109 = vector.load %arg15[%c0_55, %c0_56] : memref<128x128xf32, #tpu.memory_space<vmem>>, vector<128x128xf32>
    tpu.vector_store %arg15[%c0_55, %c0_56], %108 {strides = array<i32>} : memref<128x128xf32, #tpu.memory_space<vmem>>, vector<128x128xf32>,
    return
  }
  func.func @transform_0(%arg0: i32) -> (i32, i32) {
    %c0_i32 = arith.constant 0 : i32
    %c0_i32_0 = arith.constant 0 : i32
    return %arg0, %c0_i32 : i32, i32
  }
  func.func @transform_1(%arg0: i32) -> (i32, i32) {
    %c0_i32 = arith.constant 0 : i32
    %c0_i32_0 = arith.constant 0 : i32
    %c0_i32_1 = arith.constant 0 : i32
    return %c0_i32, %c0_i32_0 : i32, i32
  }
  func.func @transform_2(%arg0: i32) -> (i32, i32) {
    %c0_i32 = arith.constant 0 : i32
    %c0_i32_0 = arith.constant 0 : i32
    %c0_i32_1 = arith.constant 0 : i32
    return %c0_i32, %c0_i32_0 : i32, i32
  }
  func.func @transform_3(%arg0: i32) -> (i32, i32, i32) {
    %c0_i32 = arith.constant 0 : i32
    %c0_i32_0 = arith.constant 0 : i32
    %c0_i32_1 = arith.constant 0 : i32
    %c0_i32_2 = arith.constant 0 : i32
    return %c0_i32, %c0_i32_0, %c0_i32_1 : i32, i32, i32
  }
  func.func @transform_4(%arg0: i32) -> (i32, i32, i32) {
    %c0_i32 = arith.constant 0 : i32
    %c0_i32_0 = arith.constant 0 : i32
    %c0_i32_1 = arith.constant 0 : i32
    %c0_i32_2 = arith.constant 0 : i32
    return %c0_i32, %c0_i32_0, %c0_i32_1 : i32, i32, i32
  }
  func.func @transform_5(%arg0: i32) -> (i32, i32) {
    %c0_i32 = arith.constant 0 : i32
    %c0_i32_0 = arith.constant 0 : i32
    %c0_i32_1 = arith.constant 0 : i32
    return %c0_i32, %c0_i32_0 : i32, i32
  }
  func.func @transform_6(%arg0: i32) -> (i32, i32) {
    %c0_i32 = arith.constant 0 : i32
    %c0_i32_0 = arith.constant 0 : i32
    %c0_i32_1 = arith.constant 0 : i32
    return %c0_i32, %c0_i32_0 : i32, i32
  }
  func.func @transform_7(%arg0: i32) -> (i32, i32) {
    %c0_i32 = arith.constant 0 : i32
    %c0_i32_0 = arith.constant 0 : i32
    %c0_i32_1 = arith.constant 0 : i32
    return %c0_i32, %c0_i32_0 : i32, i32
  }
  func.func @transform_8(%arg0: i32) -> (i32, i32) {
    %c0_i32 = arith.constant 0 : i32
    %c0_i32_0 = arith.constant 0 : i32
    %c0_i32_1 = arith.constant 0 : i32
    return %c0_i32, %c0_i32_0 : i32, i32
  }
  func.func @transform_9(%arg0: i32) -> (i32, i32) {
    %c0_i32 = arith.constant 0 : i32
    %c0_i32_0 = arith.constant 0 : i32
    %c0_i32_1 = arith.constant 0 : i32
    return %c0_i32, %c0_i32_0 : i32, i32
  }
  func.func @transform_10(%arg0: i32) -> (i32, i32) {
    %c0_i32 = arith.constant 0 : i32
    %c0_i32_0 = arith.constant 0 : i32
    %c0_i32_1 = arith.constant 0 : i32
    return %c0_i32, %c0_i32_0 : i32, i32
  }
  func.func @transform_11(%arg0: i32) -> (i32, i32) {
    %c0_i32 = arith.constant 0 : i32
    %c0_i32_0 = arith.constant 0 : i32
    %c0_i32_1 = arith.constant 0 : i32
    return %c0_i32, %c0_i32_0 : i32, i32
  }
  func.func @transform_12(%arg0: i32) -> (i32, i32) {
    %c0_i32 = arith.constant 0 : i32
    %c0_i32_0 = arith.constant 0 : i32
    %c0_i32_1 = arith.constant 0 : i32
    return %c0_i32, %c0_i32_0 : i32, i32
  }
  func.func @transform_13(%arg0: i32) -> (i32, i32) {
    %c0_i32 = arith.constant 0 : i32
    %c0_i32_0 = arith.constant 0 : i32
    %c0_i32_1 = arith.constant 0 : i32
    return %c0_i32, %c0_i32_0 : i32, i32
  }
  func.func @transform_14(%arg0: i32) -> (i32, i32) {
    %c0_i32 = arith.constant 0 : i32
    %c0_i32_0 = arith.constant 0 : i32
    return %arg0, %c0_i32 : i32, i32
  }
}

</mosaic_0001>

<bundles_post_ra>
// kernel: tpu_custom_call.1
= control target key start
LH: loop header
LB: loop body
LE: loop exit
PB: predicated region body
PF: predicated region fallthrough
CT: control target
= control target key end

     0   :  { %s5573_s0 = inlined_call_operand.hbm [shape: f32[256,128], index: 0, kind: input, shape index: {}]   ;;  %s5574_s1 = inlined_call_operand.hbm [shape: f32[128,256], index: 1, kind: input, shape index: {}]   ;;  %s5575_s2 = inlined_call_operand.vmem [shape: f32[1,256], index: 2, kind: input, shape index: {}]   ;;  %s5576_s3 = inlined_call_operand.hbm [shape: f32[2,128,128], index: 3, kind: input, shape index: {}]   ;;  %s5577_s4 = inlined_call_operand.vmem [shape: f32[2,1,128], index: 4, kind: input, shape index: {}]   ;;  %s5578_s5 = inlined_call_operand.hbm [shape: f32[128,128], index: 5, kind: input, shape index: {}]   ;;  %s5579_s6 = inlined_call_operand.vmem [shape: f32[1,128], index: 6, kind: input, shape index: {}]   ;;  %s5580_s7 = inlined_call_operand.vmem [shape: f32[1,128], index: 7, kind: input, shape index: {}]   ;;  %s5581_s8 = inlined_call_operand.vmem [shape: f32[1,128], index: 8, kind: input, shape index: {}]   ;;  %s5582_s9 = inlined_call_operand.vmem [shape: f32[1,128], index: 9, kind: input, shape index: {}]   ;;  %s5583_s10 = inlined_call_operand.hbm [shape: f32[128,256], index: 10, kind: input, shape index: {}]   ;;  %s5584_s11 = inlined_call_operand.vmem [shape: f32[1,256], index: 11, kind: input, shape index: {}]   ;;  %s5585_s12 = inlined_call_operand.hbm [shape: f32[256,128], index: 12, kind: input, shape index: {}]   ;;  %s5586_s13 = inlined_call_operand.vmem [shape: f32[1,128], index: 13, kind: input, shape index: {}]   ;;  %s5587_s14 = inlined_call_operand.hbm [shape: f32[256,128], index: 14, kind: output, shape index: {}]  }
   0x1   :  { %5604 = sst [smem:[#allocation22_spill]] %s5574_s1 }
   0x2   :  { %5605 = sst [smem:[#allocation23_spill]] %s5576_s3 }
   0x3   :  { %5606 = sst [smem:[#allocation24_spill]] %s5578_s5 }
   0x4   :  { %5607 = sst [smem:[#allocation25_spill]] %s5583_s10 }
   0x5   :  { %5608 = sst [smem:[#allocation26_spill]] %s5585_s12 }
   0x6   :  { %5609 = sst [smem:[#allocation27_spill]] %s5586_s13 }
   0x7   :  { %5610 = sst [smem:[#allocation28_spill]] %s5587_s14 }
   0x8   :  { %19 = vsyncpa [#allocation3], 0 }
   0x9   :  { %21 = vsyncpa [#allocation3 + $0x1], 0 }
   0xa   :  { %22 = vsyncpa [#allocation6], 0 }
   0xb   :  { %23 = vsyncpa [#allocation9], 0 }
   0xc   :  { %24 = vsyncpa [#allocation12], 0 }
   0xd   :  { %25 = vsyncpa [#allocation4], 0 }
   0xe   :  { %27 = vsyncpa [#allocation4 + $0x1], 0  ;;  %s4201_s29 = smov 0   ;;  %s4203_s30 = smov 0  }
   0xf   :  { %s4205_s15 = smov 0   ;;  %s4207_s16 = smov 0  }
  0x10 LB: > { %s4112_s17 = smov [#allocation5]   ;;  %s4222_s19 = sadd.s32 4294967295, %s4110_s16   ;;  %s4110_s16 = sphi %s4207_s16, %s5652_s16   ;;  %s4106_s15 = sphi %s4205_s15, %s5651_s15   ;;  %s4102_s30 = sphi %s4203_s30, %s5650_s30   ;;  %s4098_s29 = sphi %s4201_s29, %s5649_s29  }
  0x11   : > { %s375_s18 = sshll.u32 %s4112_s17, 4  ;;  %p3019_p0 = scmp.ge.s32.totalorder %s4110_s16, 1  ;;  %s376_s18 = int_to_ptr.vmem [resolvable:$true] %s375_s18 }
  0x12   : > { %p5593_p1 = scmp.eq.s32.totalorder %s4222_s19, 0  ;;  %p363_p2 = scmp.lt.s32.totalorder %s4110_s16, 3 }
  0x13   : > { %s4113_s22 = smov [#allocation8]   ;;  %s4114_s24 = smov [#allocation7]  }
  0x14   : > { %p4227_p3 = pnand %p3019_p0, %p363_p2  ;;  %s407_s23 = sshll.u32 %s4113_s22, 4  ;;  %s4240_s23 = int_to_ptr.vmem [resolvable:$true] %s407_s23 }
  0x15   : > { %s4242_s25 = sshll.u32 %s4114_s24, 4  ;;  %s3887_s27 = scalar_lea.vmem %s376_s18, 4096  ;;  %s392_s25 = int_to_ptr.vmem [resolvable:$true] %s4242_s25 }
  0x16   : > { %s5611_s20 = scalar_select %p4227_p3, 1, 0 }
  0x17   : > { %p3508_p5 = pneg %p4227_p3  ;;  %p3888_p8 = scmp.ne.s32.totalorder %s376_s18, %s3887_s27 }
  0x18   : > { %p3895_p11 = scmp.lt.s32.totalorder %s376_s18, %s376_s18  ;;  %p3896_p12 = scmp.lt.s32.totalorder %s3887_s27, %s3887_s27 }
  0x19   : > { %p4236_p6 = pnand %p3508_p5, %p5593_p1 }
  0x1a   : > { %p3897_p13 = por %p3896_p12, %p3895_p11 }
  0x1b   : > { %p4246_p7 = pneg %p4236_p6 }
  0x1d   : > { %p3890_p9 = pnand %p3888_p8, %p4246_p7 }
  0x1f   : > { %p3891_p10 = pneg %p3890_p9 }
  0x21   : > { %p3898_p0 = pnand %p3897_p13, %p3891_p10 }
  0x23   : > { %3901 = shalt.err (!%p3898_p0)
}
  0x24   : > { %s5589_s28 = smov 256   ;;  %s5590_s17 = smov 16  }
  0x25   : > { %s5614_s1 = sld [smem:[#allocation22_spill]]  ;;  %s3913_s14 = scalar_lea.vmem %s4240_s23, 2048 }
  0x26   : > { %p3914_p2 = scmp.ne.s32.totalorder %s4240_s23, %s3913_s14  ;;  %p3921_p9 = scmp.lt.s32.totalorder %s4240_s23, %s4240_s23 }
  0x27   : > { %p3922_p10 = scmp.lt.s32.totalorder %s3913_s14, %s3913_s14 }
  0x28   : > { %p3916_p5 = pnand %p3914_p2, %p4246_p7 }
  0x29   : > { %p3923_p11 = por %p3922_p10, %p3921_p9 }
  0x2a   : > { %p3917_p8 = pneg %p3916_p5 }
  0x2b   : > { %3511 = dma.hbm_to_vmem [thread:$0]  (!%p4236_p6), %s5614_s1, 4096, %s376_s18, [#allocation6], %s5589_s28, %s5589_s28, %s5590_s17  }
  0x2c   : > { %p3924_p12 = pnand %p3923_p11, %p3917_p8 }
  0x2e   : > { %3927 = shalt.err (!%p3924_p12)
}
  0x2f   : > { %s5591_s27 = smov 128   ;;  %s5592_s13 = smov 8  }
  0x30   : > { %s5615_s5 = sld [smem:[#allocation24_spill]]  ;;  %s3939_s24 = scalar_lea.vmem %s392_s25, 4096 }
  0x31   : > { %p3940_p13 = scmp.ne.s32.totalorder %s392_s25, %s3939_s24  ;;  %p3947_p5 = scmp.lt.s32.totalorder %s392_s25, %s392_s25 }
  0x32   : > { %p3948_p8 = scmp.lt.s32.totalorder %s3939_s24, %s3939_s24 }
  0x33   : > { %p3942_p0 = pnand %p3940_p13, %p4246_p7 }
  0x34   : > { %p3949_p9 = por %p3948_p8, %p3947_p5 }
  0x35   : > { %p3943_p2 = pneg %p3942_p0 }
  0x36   : > { %3517 = dma.hbm_to_vmem [thread:$0]  (!%p4236_p6), %s5615_s5, 2048, %s4240_s23, [#allocation9], %s5591_s27, %s5591_s27, %s5592_s13  }
  0x37   : > { %p3950_p10 = pnand %p3949_p9, %p3943_p2 }
  0x39   : > { %3953 = shalt.err (!%p3950_p10)
}
  0x3a   : > { %s5616_s3 = sld [smem:[#allocation23_spill]]  ;;  %s4119_s23 = smov [#allocation10]  }
  0x3b   : > { %s432_s18 = sshll.u32 %s4119_s23, 4  ;;  %s4120_s22 = smov [#allocation11]   ;;  %s433_s18 = int_to_ptr.vmem [resolvable:$true] %s432_s18 }
  0x3c   : > { %s448_s17 = sshll.u32 %s4120_s22, 4  ;;  %s3965_s1 = scalar_lea.vmem %s433_s18, 4096  ;;  %s449_s17 = int_to_ptr.vmem [resolvable:$true] %s448_s17 }
  0x3d   : > { %p3966_p11 = scmp.ne.s32.totalorder %s433_s18, %s3965_s1  ;;  %p3973_p0 = scmp.lt.s32.totalorder %s433_s18, %s433_s18 }
  0x3e   : > { %p3974_p2 = scmp.lt.s32.totalorder %s3965_s1, %s3965_s1 }
  0x3f   : > { %p3968_p12 = pnand %p3966_p11, %p4246_p7 }
  0x40   : > { %3514 = dma.hbm_to_vmem [thread:$0]  (!%p4236_p6), %s5616_s3, 4096, %s392_s25, [#allocation6], %s5591_s27, %s5591_s27, %s5592_s13  }
  0x41   : > { %p3969_p13 = pneg %p3968_p12  ;;  %p3975_p5 = por %p3974_p2, %p3973_p0 }
  0x43   : > { %p3976_p8 = pnand %p3975_p5, %p3969_p13 }
  0x45   : > { %3979 = shalt.err (!%p3976_p8)
}
  0x46   : > { %s5617_s28 = smov 16   ;;  %s5618_s24 = smov 256  }
  0x47   : > { %s5619_s10 = sld [smem:[#allocation25_spill]]  ;;  %s3991_s23 = scalar_lea.vmem %s449_s17, 4096 }
  0x48   : > { %p3992_p9 = scmp.ne.s32.totalorder %s449_s17, %s3991_s23  ;;  %p3999_p12 = scmp.lt.s32.totalorder %s449_s17, %s449_s17 }
  0x49   : > { %p4000_p0 = scmp.lt.s32.totalorder %s3991_s23, %s3991_s23 }
  0x4a   : > { %p3994_p10 = pnand %p3992_p9, %p4246_p7 }
  0x4b   : > { %p4001_p13 = por %p4000_p0, %p3999_p12 }
  0x4c   : > { %p3995_p11 = pneg %p3994_p10 }
  0x4d   : > { %3520 = dma.hbm_to_vmem [thread:$0]  (!%p4236_p6), %s5619_s10, 4096, %s433_s18, [#allocation9], %s5618_s24, %s5618_s24, %s5617_s28  }
  0x4e   : > { %p4002_p2 = pnand %p4001_p13, %p3995_p11 }
  0x50   : > { %4005 = shalt.err (!%p4002_p2)
}
  0x51   : > { %s5620_s12 = sld [smem:[#allocation26_spill]]  ;;  %s3018_s21 = sadd.s32 4294967294, %s4110_s16  }
  0x52   : > { %s4308_s26 = sadd.s32 1, %s4110_s16   ;;  %s40_s18 = sadd.s32 1, %s4106_s15 }
  0x53   : > { %s37_s28 = ssub.s32 %s4110_s16, %s4308_s26  ;;  %p47_p7 = scmp.ne.s32.totalorder %s4106_s15, %s4102_s30 }
  0x54   : > { %p38_p5 = scmp.eq.s32.totalorder %s37_s28, 0  ;;  %p48_p8 = scmp.eq.s32.totalorder %s4110_s16, 0 }
  0x55   : > { %p53_p9 = scmp.ne.s32.totalorder %s4102_s30, %s4098_s29  ;;  %p350_p10 = scmp.eq.s32.totalorder %s4222_s19, 1 }
  0x56   : > { %s4320_s24 = scalar_select %p38_p5, %s4106_s15, %s40_s18  }
  0x57   : > { %3523 = dma.hbm_to_vmem [thread:$0]  (!%p4236_p6), %s5620_s12, 4096, %s449_s17, [#allocation12], %s5591_s27, %s5591_s27, %s5592_s13  }
  0x58   : > { %5621 = sst [smem:[#allocation19_spill]] %s4320_s24  ;;  %p49_p11 = por %p48_p8, %p47_p7 }
  0x59   : > { %p4324_p12 = por %p5593_p1, %p53_p9  ;;  %p4328_p6 = por %p350_p10, %p47_p7 }
  0x5a   : > { %p356_p0 = scmp.eq.s32.totalorder %s3018_s21, 1  ;;  %p3537_p13 = scmp.lt.s32.totalorder %s4110_s16, 2 }
  0x5b   : > { %s5622_s25 = scalar_select %p4324_p12, 1, 0 }
  0x5c   : > { %s5623_s17 = scalar_select %p4328_p6, 1, 0 }
  0x5d   : > { %s465_s14 = sand.u32 1, %s4106_s15   ;;  %p4334_p2 = por %p356_p0, %p53_p9 }
  0x5e   : > { %s3026_s1 = sshll.u32 %s465_s14, 7  ;;  %s3066_s22 = sshll.u32 %s4110_s16, 11 }
  0x5f   : > { %s5624_s23 = scalar_select %p4334_p2, 1, 0 }
  0x60   : > { %s4342_s27 = scalar_lea.hbm %s5573_s0, %s3066_s22  ;;  %s469_s13 = scalar_lea.vmem [#allocation2], %s3026_s1 }
  0x61   : > { %s476_s3 = sshll.u32 %s469_s13, 4  ;;  %p4344_p7 = pnand %p3537_p13, %p49_p11  ;;  %s4348_s3 = int_to_ptr.vmem [resolvable:$true] %s476_s3 }
  0x62   : > { %s4350_s5 = scalar_lea.sflag [#allocation3], %s465_s14  ;;  %s4006_s10 = scalar_lea.hbm %s4342_s27, 2048 }
  0x63   : > { %p4007_p5 = scmp.ne.s32.totalorder %s4342_s27, %s4006_s10  ;;  %p4008_p8 = pneg %p4344_p7 }
  0x64   : > { %s4011_s1 = scalar_lea.hbm %s5573_s0, 4096  ;;  %p4012_p11 = scmp.lt.s32.totalorder %s4342_s27, %s5573_s0 }
  0x65   : > { %p4009_p9 = pnand %p4008_p8, %p4007_p5  ;;  %p4013_p0 = scmp.lt.s32.totalorder %s4011_s1, %s4006_s10 }
  0x67   : > { %p4010_p10 = pneg %p4009_p9  ;;  %p4014_p13 = por %p4013_p0, %p4012_p11 }
  0x69   : > { %p4015_p4 = pnand %p4014_p13, %p4010_p10 }
  0x6b   : > { %4018 = shalt.err (!%p4015_p4)
}
  0x6c   : > { %s4019_s14 = scalar_lea.vmem %s4348_s3, 2048  ;;  %s4121_s12 = smov [#allocation2]  }
  0x6d   : > { %p4020_p1 = scmp.ne.s32.totalorder %s4348_s3, %s4019_s14  ;;  %s4024_s24 = sshll.u32 %s4121_s12, 4  ;;  %s4025_s24 = int_to_ptr.vmem [resolvable:$false] %s4024_s24 }
  0x6e   : > { %s4026_s22 = scalar_lea.vmem %s4025_s24, 4096  ;;  %p4027_p9 = scmp.lt.s32.totalorder %s4348_s3, %s4025_s24 }
  0x6f   : > { %p4022_p2 = pnand %p4020_p1, %p4008_p8  ;;  %p4028_p6 = scmp.lt.s32.totalorder %s4026_s22, %s4019_s14 }
  0x71   : > { %p4023_p5 = pneg %p4022_p2  ;;  %p4029_p12 = por %p4028_p6, %p4027_p9 }
  0x73   : > { %p4030_p3 = pnand %p4029_p12, %p4023_p5 }
  0x75   : > { %4033 = shalt.err (!%p4030_p3)
}
  0x76   : > { %s5626_s10 = smov 8   ;;  %s5627_s18 = smov 128  }
  0x77   : > { %3527 = dma.hbm_to_vmem [thread:$0]  (!%p4344_p7), %s4342_s27, 2048, %s4348_s3, %s4350_s5, %s5627_s18, %s5627_s18, %s5626_s10  }
  0x78   : > { %p5628_p1 = scmp.ne.s32.totalorder %s5611_s20, 0 }
  0x7a   : > { %488 = sbr.rel (%p5628_p1) target bundleno = 1852 (0x73c), region = 76 }
  0x7f   : > { %s4377_s12 = sand.u32 1, %s4102_s30   ;;  %p5629_p3 = scmp.ne.s32.totalorder %s5622_s25, 0 }
  0x80   : > { %s3030_s24 = sshll.u32 %s4377_s12, 7  ;;  %s491_s1 = scalar_lea.sflag [#allocation3], %s4377_s12 }
  0x81   : > { %s4383_s21 = scalar_lea.vmem [#allocation2], %s3030_s24 }
  0x82   : > { %4077 = dma.done.wait (%p5629_p3), %s491_s1, 2048  }
  0x83   : > { %4079 = vsyncadd (%p5629_p3), %s491_s1, 4294965248  ;;  %p5630_p4 = scmp.eq.s32.totalorder %s4222_s19, 0 }
  0x85   : > { %4081 = dma.done.wait (%p5630_p4), [#allocation6], 8192   ;;  %p5631_p12 = pmov %p5630_p4 }
  0x86   : > { %p5632_p6 = pmov %p5630_p4 }
  0x87   : > { %4083 = vsyncadd (%p5631_p12), [#allocation6], 4294959104 }
  0x88   : > { %4085 = dma.done.wait (%p5632_p6), [#allocation9], 6144   ;;  %p5633_p2 = pmov %p5630_p4 }
  0x8a   : > { %4087 = vsyncadd (%p5633_p2), [#allocation9], 4294961152  ;;  %p5634_p7 = pmov %p5633_p2 }
  0x8b   : > { %p5635_p8 = pmov %p5633_p2 }
  0x8c   : > { %4089 = dma.done.wait (%p5634_p7), [#allocation12], 4096  }
  0x8d   : > { %4091 = vsyncadd (%p5635_p8), [#allocation12], 4294963200  ;;  %v5599_v0 = vmov 0.0   ;;  %v608_v1 = vld [vmem:[#allocation5 + $0xf8] sm:$0xff]  ;;  %v607_v2 = vld [vmem:[#allocation5 + $0xf0] sm:$0xff]  ;;  %s5643_s13 = sld [smem:[#allocation27_spill]] }
  0x8e   : > { %685 = vmatprep.mubr.f32.mxu0 %v5599_v0  ;;  %733 = vmatprep.mubr.f32.mxu1 %v5599_v0  ;;  %v606_v3 = vld [vmem:[#allocation5 + $0xe8] sm:$0xff]  ;;  %v605_v4 = vld [vmem:[#allocation5 + $0xe0] sm:$0xff]  ;;  %v604_v5 = vld [vmem:[#allocation5 + $0xd8] sm:$0xff]  ;;  %s5490_s28 = scalar_lea.vmem [#allocation13], %s3030_s24  ;;  %s3067_s24 = sshll.u32 %s4222_s19, 11 }
  0x8f   : > { %621 = vmatprep.subr.mxu0 %v608_v1  ;;  %3452 = vmatprep.subr.mxu1 %v608_v1  ;;  %v603_v6 = vld [vmem:[#allocation5 + $0xd0] sm:$0xff]  ;;  %v602_v7 = vld [vmem:[#allocation5 + $0xc8] sm:$0xff]  ;;  %v601_v8 = vld [vmem:[#allocation5 + $0xc0] sm:$0xff]  ;;  %s2897_s14 = sshll.u32 %s5490_s28, 4  ;;  %s5644_s18 = sld [smem:[#allocation28_spill]]  ;;  %s5528_s14 = int_to_ptr.vmem [resolvable:$true] %s2897_s14 }
  0x90   : > { %622 = vmatpush1.msra.mxu0 %v607_v2  ;;  %3468 = vmatpush1.msra.mxu1 %v607_v2  ;;  %v600_v9 = vld [vmem:[#allocation5 + $0xb8] sm:$0xff]  ;;  %v599_v10 = vld [vmem:[#allocation5 + $0xb0] sm:$0xff]  ;;  %v598_v11 = vld [vmem:[#allocation5 + $0xa8] sm:$0xff]  ;;  %s4034_s3 = scalar_lea.vmem %s5528_s14, 2048  ;;  %p5645_p11 = scmp.ne.s32.totalorder %s5623_s17, 0 }
  0x91   : > { %623 = vmatprep.subr.mxu0 %v606_v3  ;;  %3453 = vmatprep.subr.mxu1 %v606_v3  ;;  %v597_v12 = vld [vmem:[#allocation5 + $0xa0] sm:$0xff]  ;;  %v596_v13 = vld [vmem:[#allocation5 + $0x98] sm:$0xff]  ;;  %v595_v14 = vld [vmem:[#allocation5 + $0x90] sm:$0xff]  ;;  %p4035_p10 = scmp.ne.s32.totalorder %s5528_s14, %s4034_s3  ;;  %s4123_s19 = smov [#allocation13]  }
  0x92   : > { %624 = vmatpush1.msra.mxu0 %v605_v4  ;;  %3469 = vmatpush1.msra.mxu1 %v605_v4  ;;  %v594_v15 = vld [vmem:[#allocation5 + $0x88] sm:$0xff]  ;;  %v593_v16 = vld [vmem:[#allocation5 + $0x80] sm:$0xff]  ;;  %v592_v17 = vld [vmem:[#allocation5 + $0x78] sm:$0xff]  ;;  %s4038_s5 = sshll.u32 %s4123_s19, 4  ;;  %s4039_s5 = int_to_ptr.vmem [resolvable:$false] %s4038_s5 }
  0x93   : > { %625 = vmatprep.subr.mxu0 %v604_v5  ;;  %3454 = vmatprep.subr.mxu1 %v604_v5  ;;  %v591_v18 = vld [vmem:[#allocation5 + $0x70] sm:$0xff]  ;;  %v590_v19 = vld [vmem:[#allocation5 + $0x68] sm:$0xff]  ;;  %v589_v20 = vld [vmem:[#allocation5 + $0x60] sm:$0xff]  ;;  %v611_v5 = vlaneseq  ;;  %p4036_p0 = pnand %p4035_p10, %p5645_p11  ;;  %s4040_s20 = scalar_lea.vmem %s4039_s5, 4096 }
  0x94   : > { %626 = vmatpush1.msra.mxu0 %v603_v6  ;;  %3470 = vmatpush1.msra.mxu1 %v603_v6  ;;  %v588_v21 = vld [vmem:[#allocation5 + $0x58] sm:$0xff]  ;;  %v587_v22 = vld [vmem:[#allocation5 + $0x50] sm:$0xff]  ;;  %v586_v23 = vld [vmem:[#allocation5 + $0x48] sm:$0xff]  ;;  %p4041_p5 = scmp.lt.s32.totalorder %s5528_s14, %s4039_s5  ;;  %p4042_p9 = scmp.lt.s32.totalorder %s4040_s20, %s4034_s3 }
  0x95   : > { %627 = vmatprep.subr.mxu0 %v602_v7  ;;  %3455 = vmatprep.subr.mxu1 %v602_v7  ;;  %v585_v24 = vld [vmem:[#allocation5 + $0x40] sm:$0xff]  ;;  %v584_v25 = vld [vmem:[#allocation5 + $0x38] sm:$0xff]  ;;  %v583_v26 = vld [vmem:[#allocation5 + $0x30] sm:$0xff]  ;;  %s5526_s1 = scalar_lea.hbm %s5644_s18, %s3067_s24  ;;  %p4037_p13 = pneg %p4036_p0 }
  0x96   : > { %628 = vmatpush1.msra.mxu0 %v601_v8  ;;  %3471 = vmatpush1.msra.mxu1 %v601_v8  ;;  %v582_v27 = vld [vmem:[#allocation5 + $0x28] sm:$0xff]  ;;  %v581_v28 = vld [vmem:[#allocation5 + $0x20] sm:$0xff]  ;;  %v580_v29 = vld [vmem:[#allocation5 + $0x18] sm:$0xff]  ;;  %v4436_v8 = vshrl.u32 %v611_v5, 7  ;;  %p4043_p1 = por %p4042_p9, %p4041_p5 }
  0x97   : > { %629 = vmatprep.subr.mxu0 %v600_v9  ;;  %3456 = vmatprep.subr.mxu1 %v600_v9  ;;  %v579_v30 = vld [vmem:[#allocation5 + $0x10] sm:$0xff]  ;;  %v578_v31 = vld [vmem:[#allocation5 + $0x8] sm:$0xff]  ;;  %v577_v32 = vld [vmem:[#allocation5] sm:$0xff] }
  0x98   : > { %630 = vmatpush1.msra.mxu0 %v599_v10  ;;  %3472 = vmatpush1.msra.mxu1 %v599_v10  ;;  %v561_v33 = vld [vmem:[%s4383_s21] sm:$0xff]  ;;  %v562_v35 = vld [vmem:[%s4383_s21 + $0x8] sm:$0xff]  ;;  %v563_v37 = vld [vmem:[%s4383_s21 + $0x10] sm:$0xff]  ;;  %5636 = vst [vmem:[#allocation20_spill] sm:$0xff] %v4436_v8  ;;  %p4044_p3 = pnand %p4043_p1, %p4037_p13 }
  0x99   : > { %631 = vmatprep.subr.mxu0 %v598_v11  ;;  %3457 = vmatprep.subr.mxu1 %v598_v11  ;;  %v569_v34 = vld [vmem:[%s4383_s21 + $0x40] sm:$0xff]  ;;  %v570_v36 = vld [vmem:[%s4383_s21 + $0x48] sm:$0xff]  ;;  %v571_v38 = vld [vmem:[%s4383_s21 + $0x50] sm:$0xff]  ;;  %v5598_v11 = vsub.s32 0, %v4436_v8 }
  0x9a   : > { %632 = vmatpush1.msra.mxu0 %v597_v12  ;;  %3473 = vmatpush1.msra.mxu1 %v597_v12  ;;  %v564_v39 = vld [vmem:[%s4383_s21 + $0x18] sm:$0xff]  ;;  %v565_v41 = vld [vmem:[%s4383_s21 + $0x20] sm:$0xff]  ;;  %v566_v43 = vld [vmem:[%s4383_s21 + $0x28] sm:$0xff] }
  0x9b   : > { %633 = vmatprep.subr.mxu0 %v596_v13  ;;  %3458 = vmatprep.subr.mxu1 %v596_v13  ;;  %v572_v40 = vld [vmem:[%s4383_s21 + $0x58] sm:$0xff]  ;;  %v573_v42 = vld [vmem:[%s4383_s21 + $0x60] sm:$0xff]  ;;  %v574_v44 = vld [vmem:[%s4383_s21 + $0x68] sm:$0xff] }
  0x9c   : > { %634 = vmatpush1.msra.mxu0 %v595_v14  ;;  %3474 = vmatpush1.msra.mxu1 %v595_v14  ;;  %v567_v45 = vld [vmem:[%s4383_s21 + $0x30] sm:$0xff]  ;;  %v568_v47 = vld [vmem:[%s4383_s21 + $0x38] sm:$0xff]  ;;  %v1083_v51 = vld [vmem:[#allocation7 + $0x68] sm:$0xff] }
  0x9d   : > { %635 = vmatprep.subr.mxu0 %v594_v15  ;;  %3459 = vmatprep.subr.mxu1 %v594_v15  ;;  %v575_v46 = vld [vmem:[%s4383_s21 + $0x70] sm:$0xff]  ;;  %v576_v48 = vld [vmem:[%s4383_s21 + $0x78] sm:$0xff]  ;;  %v1082_v52 = vld [vmem:[#allocation7 + $0x60] sm:$0xff]  ;;  %s2884_s21 = scalar_lea.sflag [#allocation4], %s4377_s12 }
  0x9e   : > { %636 = vmatpush1.msra.mxu0 %v593_v16  ;;  %3475 = vmatpush1.msra.mxu1 %v593_v16  ;;  %v1085_v49 = vld [vmem:[#allocation7 + $0x78] sm:$0xff]  ;;  %v1084_v50 = vld [vmem:[#allocation7 + $0x70] sm:$0xff]  ;;  %v1079_v55 = vld [vmem:[#allocation7 + $0x48] sm:$0xff] }
  0x9f   : > { %637 = vmatprep.subr.mxu0 %v592_v17  ;;  %3460 = vmatprep.subr.mxu1 %v592_v17  ;;  %v1081_v53 = vld [vmem:[#allocation7 + $0x58] sm:$0xff]  ;;  %v1080_v54 = vld [vmem:[#allocation7 + $0x50] sm:$0xff]  ;;  %v1078_v56 = vld [vmem:[#allocation7 + $0x40] sm:$0xff] }
  0xa0   : > { %638 = vmatpush1.msra.mxu0 %v591_v18  ;;  %3476 = vmatpush1.msra.mxu1 %v591_v18  ;;  %v1077_v57 = vld [vmem:[#allocation7 + $0x38] sm:$0xff]  ;;  %v1076_v58 = vld [vmem:[#allocation7 + $0x30] sm:$0xff]  ;;  %v1075_v59 = vld [vmem:[#allocation7 + $0x28] sm:$0xff] }
  0xa1   : > { %639 = vmatprep.subr.mxu0 %v590_v19  ;;  %3461 = vmatprep.subr.mxu1 %v590_v19  ;;  %v1074_v60 = vld [vmem:[#allocation7 + $0x20] sm:$0xff]  ;;  %v1073_v61 = vld [vmem:[#allocation7 + $0x18] sm:$0xff]  ;;  %v1072_v62 = vld [vmem:[#allocation7 + $0x10] sm:$0xff] }
  0xa2   : > { %640 = vmatpush1.msra.mxu0 %v589_v20  ;;  %3477 = vmatpush1.msra.mxu1 %v589_v20  ;;  %v1071_v63 = vld [vmem:[#allocation7 + $0x8] sm:$0xff]  ;;  %v1070_v1 = vld [vmem:[#allocation7] sm:$0xff]  ;;  %v4433_v2 = vld [vmem:[#allocation7 + $0xf8] sm:$0xff] }
  0xa3   : > { %641 = vmatprep.subr.mxu0 %v588_v21  ;;  %3462 = vmatprep.subr.mxu1 %v588_v21  ;;  %v1423_v3 = vld [vmem:[#allocation8 + $0x78] sm:$0xff]  ;;  %v1422_v4 = vld [vmem:[#allocation8 + $0x70] sm:$0xff]  ;;  %v1421_v6 = vld [vmem:[#allocation8 + $0x68] sm:$0xff]  ;;  %v5597_v21 = vsub.s32 1, %v4436_v8 }
  0xa4   : > { %642 = vmatpush1.msra.mxu0 %v587_v22  ;;  %3478 = vmatpush1.msra.mxu1 %v587_v22  ;;  %v1420_v7 = vld [vmem:[#allocation8 + $0x60] sm:$0xff]  ;;  %v1419_v9 = vld [vmem:[#allocation8 + $0x58] sm:$0xff]  ;;  %v1418_v10 = vld [vmem:[#allocation8 + $0x50] sm:$0xff] }
  0xa5   : > { %643 = vmatprep.subr.mxu0 %v586_v23  ;;  %3463 = vmatprep.subr.mxu1 %v586_v23  ;;  %v1417_v12 = vld [vmem:[#allocation8 + $0x48] sm:$0xff]  ;;  %v609_v13 = vld [vmem:[%s5575_s2] sm:$0x3]  ;;  %v1415_v16 = vld [vmem:[#allocation8 + $0x38] sm:$0xff] }
  0xa6   : > { %644 = vmatpush1.msra.mxu0 %v585_v24  ;;  %3479 = vmatpush1.msra.mxu1 %v585_v24  ;;  %v1416_v14 = vld [vmem:[#allocation8 + $0x40] sm:$0xff]  ;;  %v4444_v15 = vrot.slane %v609_v13, %v5598_v11  ;;  %v1414_v17 = vld [vmem:[#allocation8 + $0x30] sm:$0xff]  ;;  %v1413_v22 = vld [vmem:[#allocation8 + $0x28] sm:$0xff] }
  0xa7   : > { %645 = vmatprep.subr.mxu0 %v584_v25  ;;  %3464 = vmatprep.subr.mxu1 %v584_v25 }
  0xa8   : > { %646 = vmatpush1.msra.mxu0 %v583_v26  ;;  %3480 = vmatpush1.msra.mxu1 %v583_v26  ;;  %v1412_v26 = vld [vmem:[#allocation8 + $0x20] sm:$0xff] }
  0xa9   : > { %647 = vmatprep.subr.mxu0 %v582_v27  ;;  %3465 = vmatprep.subr.mxu1 %v582_v27 }
  0xaa   : > { %648 = vmatpush1.msra.mxu0 %v581_v28  ;;  %3481 = vmatpush1.msra.mxu1 %v581_v28 }
  0xab   : > { %649 = vmatprep.subr.mxu0 %v580_v29  ;;  %3466 = vmatprep.subr.mxu1 %v580_v29 }
  0xac   : > { %650 = vmatpush1.msra.mxu0 %v579_v30  ;;  %3482 = vmatpush1.msra.mxu1 %v579_v30  ;;  %v4450_v30 = vrot.slane %v609_v13, %v5597_v21 }
  0xad   : > { %651 = vmatprep.subr.mxu0 %v578_v31  ;;  %3467 = vmatprep.subr.mxu1 %v578_v31  ;;  %v1411_v31 = vld [vmem:[#allocation8 + $0x18] sm:$0xff] }
  0xae   : > { %652 = vmatpush1.msra.mxu0 %v577_v32  ;;  %3483 = vmatpush1.msra.mxu1 %v577_v32 }
  0xaf   : > { %686 = vmatmul.mubr.f32.vlgmr.msra.gmra.mxu0 %v561_v33  ;;  %734 = vmatmul.mubr.f32.vlgmr.msra.gmra.mxu1 %v569_v34 }
  0xb0   : > { %691 = vmatprep.mubr.f32.mxu0 %v5599_v0  ;;  %739 = vmatprep.mubr.f32.mxu1 %v5599_v0 }
  0xb1   : > { %3260 = vmatprep.subr.mxu1 %v1085_v49  ;;  %3372 = vmatprep.subr.mxu0 %v1423_v3 }
  0xb2   : > { %3261 = vmatpush3.msra.mxu1 %v1085_v49  ;;  %3373 = vmatpush3.msra.mxu0 %v1423_v3 }
  0xb3   : > { %692 = vmatmul.mubr.f32.gmra.mxu0 %v562_v35  ;;  %740 = vmatmul.mubr.f32.gmra.mxu1 %v570_v36 }
  0xb4   : > { %697 = vmatprep.mubr.f32.mxu0 %v5599_v0  ;;  %745 = vmatprep.mubr.f32.mxu1 %v5599_v0 }
  0xb5   : > { %3262 = vmatprep.subr.mxu1 %v1084_v50  ;;  %3374 = vmatprep.subr.mxu0 %v1422_v4 }
  0xb6   : > { %3263 = vmatpush3.msra.mxu1 %v1084_v50  ;;  %3375 = vmatpush3.msra.mxu0 %v1422_v4 }
  0xb7   : > { %698 = vmatmul.mubr.f32.gmra.mxu0 %v563_v37  ;;  %746 = vmatmul.mubr.f32.gmra.mxu1 %v571_v38 }
  0xb8   : > { %703 = vmatprep.mubr.f32.mxu0 %v5599_v0  ;;  %751 = vmatprep.mubr.f32.mxu1 %v5599_v0 }
  0xb9   : > { %3264 = vmatprep.subr.mxu1 %v1083_v51  ;;  %3376 = vmatprep.subr.mxu0 %v1421_v6 }
  0xba   : > { %3265 = vmatpush3.msra.mxu1 %v1083_v51  ;;  %3377 = vmatpush3.msra.mxu0 %v1421_v6 }
  0xbb   : > { %704 = vmatmul.mubr.f32.gmra.mxu0 %v564_v39  ;;  %752 = vmatmul.mubr.f32.gmra.mxu1 %v572_v40 }
  0xbc   : > { %709 = vmatprep.mubr.f32.mxu0 %v5599_v0  ;;  %757 = vmatprep.mubr.f32.mxu1 %v5599_v0 }
  0xbd   : > { %3266 = vmatprep.subr.mxu1 %v1082_v52  ;;  %3378 = vmatprep.subr.mxu0 %v1420_v7 }
  0xbe   : > { %3267 = vmatpush3.msra.mxu1 %v1082_v52  ;;  %3379 = vmatpush3.msra.mxu0 %v1420_v7 }
  0xbf   : > { %710 = vmatmul.mubr.f32.gmra.mxu0 %v565_v41  ;;  %758 = vmatmul.mubr.f32.gmra.mxu1 %v573_v42 }
  0xc0   : > { %715 = vmatprep.mubr.f32.mxu0 %v5599_v0  ;;  %763 = vmatprep.mubr.f32.mxu1 %v5599_v0 }
  0xc1   : > { %3268 = vmatprep.subr.mxu1 %v1081_v53  ;;  %3380 = vmatprep.subr.mxu0 %v1419_v9 }
  0xc2   : > { %3269 = vmatpush3.msra.mxu1 %v1081_v53  ;;  %3381 = vmatpush3.msra.mxu0 %v1419_v9 }
  0xc3   : > { %716 = vmatmul.mubr.f32.gmra.mxu0 %v566_v43  ;;  %764 = vmatmul.mubr.f32.gmra.mxu1 %v574_v44 }
  0xc4   : > { %721 = vmatprep.mubr.f32.mxu0 %v5599_v0  ;;  %769 = vmatprep.mubr.f32.mxu1 %v5599_v0 }
  0xc5   : > { %3270 = vmatprep.subr.mxu1 %v1080_v54  ;;  %3382 = vmatprep.subr.mxu0 %v1418_v10 }
  0xc6   : > { %3271 = vmatpush3.msra.mxu1 %v1080_v54  ;;  %3383 = vmatpush3.msra.mxu0 %v1418_v10 }
  0xc7   : > { %722 = vmatmul.mubr.f32.gmra.mxu0 %v567_v45  ;;  %770 = vmatmul.mubr.f32.gmra.mxu1 %v575_v46 }
  0xc8   : > { %727 = vmatprep.mubr.f32.mxu0 %v5599_v0  ;;  %775 = vmatprep.mubr.f32.mxu1 %v5599_v0 }
  0xc9   : > { %3272 = vmatprep.subr.mxu1 %v1079_v55  ;;  %3384 = vmatprep.subr.mxu0 %v1417_v12 }
  0xca   : > { %3273 = vmatpush3.msra.mxu1 %v1079_v55  ;;  %3385 = vmatpush3.msra.mxu0 %v1417_v12 }
  0xcb   : > { %728 = vmatmul.mubr.f32.gmra.mxu0 %v568_v47  ;;  %776 = vmatmul.mubr.f32.gmra.mxu1 %v576_v48 }
  0xcc   : > { %3274 = vmatprep.subr.mxu1 %v1078_v56  ;;  %3386 = vmatprep.subr.mxu0 %v1416_v14 }
  0xcd   : > { %3275 = vmatpush3.msra.mxu1 %v1078_v56  ;;  %3387 = vmatpush3.msra.mxu0 %v1416_v14 }
  0xce   : > { %3276 = vmatprep.subr.mxu1 %v1077_v57  ;;  %3388 = vmatprep.subr.mxu0 %v1415_v16 }
  0xcf   : > { %3277 = vmatpush3.msra.mxu1 %v1077_v57  ;;  %3389 = vmatpush3.msra.mxu0 %v1415_v16 }
  0xd0   : > { %3278 = vmatprep.subr.mxu1 %v1076_v58  ;;  %3390 = vmatprep.subr.mxu0 %v1414_v17 }
  0xd1   : > { %3279 = vmatpush3.msra.mxu1 %v1076_v58  ;;  %3391 = vmatpush3.msra.mxu0 %v1414_v17 }
  0xd2   : > { %3280 = vmatprep.subr.mxu1 %v1075_v59  ;;  %3392 = vmatprep.subr.mxu0 %v1413_v22 }
  0xd3   : > { %3281 = vmatpush3.msra.mxu1 %v1075_v59  ;;  %3393 = vmatpush3.msra.mxu0 %v1413_v22 }
  0xd4   : > { %3282 = vmatprep.subr.mxu1 %v1074_v60  ;;  %3394 = vmatprep.subr.mxu0 %v1412_v26 }
  0xd5   : > { %3283 = vmatpush3.msra.mxu1 %v1074_v60  ;;  %3395 = vmatpush3.msra.mxu0 %v1412_v26 }
  0xd6   : > { %3284 = vmatprep.subr.mxu1 %v1073_v61  ;;  %3396 = vmatprep.subr.mxu0 %v1411_v31 }
  0xd7   : > { %3285 = vmatpush3.msra.mxu1 %v1073_v61  ;;  %3397 = vmatpush3.msra.mxu0 %v1411_v31 }
  0xd8   : > { %3286 = vmatprep.subr.mxu1 %v1072_v62 }
  0xd9   : > { %3287 = vmatpush3.msra.mxu1 %v1072_v62 }
  0xda   : > { %3288 = vmatprep.subr.mxu1 %v1071_v63 }
  0xdb   : > { %3289 = vmatpush3.msra.mxu1 %v1071_v63 }
  0xdc   : > { %3290 = vmatprep.subr.mxu1 %v1070_v1 }
  0xdd   : > { %3291 = vmatpush3.msra.mxu1 %v1070_v1 }
  0xde   : > { %3316 = vmatprep.subr.mxu1 %v4433_v2 }
 0x16f   : > { %v687_v18 = vpop.f32.mrf.mxu0  ;;  %v735_v19 = vpop.f32.mrf.mxu1 }
 0x170   : > { %v688_v20 = vadd.f32 %v687_v18, %v4444_v15  ;;  %v4461_v45 = vadd.f32 %v735_v19, %v4444_v15 }
 0x171   : > { %v689_v23 = vpop.f32.mrf.mxu0  ;;  %v737_v24 = vpop.f32.mrf.mxu1 }
 0x172   : > { %v814_v25 = vmul.f32 0.044715, %v688_v20  ;;  %v4464_v50 = vadd.f32 %v689_v23, %v4450_v30  ;;  %v4467_v51 = vadd.f32 %v737_v24, %v4450_v30  ;;  %v830_v59 = vmul.f32 0.044715, %v4461_v45 }
 0x173   : > { %v693_v27 = vpop.f32.mrf.mxu0  ;;  %v741_v28 = vpop.f32.mrf.mxu1  ;;  %v4478_v60 = vmul.f32 0.5, %v688_v20  ;;  %v4502_v19 = vmul.f32 0.5, %v4461_v45 }
 0x174   : > { %v846_v29 = vmul.f32 %v814_v25, %v688_v20  ;;  %v694_v32 = vadd.f32 %v693_v27, %v4444_v15  ;;  %v4470_v52 = vadd.f32 %v741_v28, %v4444_v15  ;;  %v815_v5 = vmul.f32 0.044715, %v4464_v50 }
 0x175   : > { %v695_v33 = vpop.f32.mrf.mxu0  ;;  %v743_v34 = vpop.f32.mrf.mxu1  ;;  %v831_v6 = vmul.f32 0.044715, %v4467_v51  ;;  %v4493_v16 = vmul.f32 %v830_v59, %v4461_v45 }
 0x176   : > { %v4454_v35 = vadd.f32 %v695_v33, %v4450_v30  ;;  %v816_v36 = vmul.f32 0.044715, %v694_v32  ;;  %v878_v39 = vmul.f32 %v846_v29, %v688_v20  ;;  %v4481_v62 = vadd.f32 %v743_v34, %v4450_v30 }
 0x177   : > { %v699_v37 = vpop.f32.mrf.mxu0  ;;  %v747_v38 = vpop.f32.mrf.mxu1  ;;  %v832_v7 = vmul.f32 0.044715, %v4470_v52  ;;  %v4510_v26 = vmul.f32 %v815_v5, %v4464_v50  ;;  %v4513_v27 = vmul.f32 %v831_v6, %v4467_v51  ;;  %v4515_v28 = vmul.f32 0.5, %v694_v32 }
 0x178   : > { %5637 = vst [vmem:[#allocation21_spill] sm:$0xff] %v4454_v35  ;;  %v848_v40 = vmul.f32 %v816_v36, %v694_v32  ;;  %v817_v41 = vmul.f32 0.044715, %v4454_v35  ;;  %v4458_v42 = vadd.f32 %v699_v37, %v4444_v15  ;;  %v910_v49 = vadd.f32 %v878_v39, %v688_v20 }
 0x179   : > { %v701_v43 = vpop.f32.mrf.mxu0  ;;  %v749_v44 = vpop.f32.mrf.mxu1  ;;  %v4484_v63 = vadd.f32 %v747_v38, %v4444_v15  ;;  %v833_v20 = vmul.f32 0.044715, %v4481_v62  ;;  %v4521_v31 = vmul.f32 %v832_v7, %v4470_v52 }
 0x17a   : > { %v880_v46 = vmul.f32 %v848_v40, %v694_v32  ;;  %v849_v54 = vmul.f32 %v817_v41, %v4454_v35  ;;  %v818_v55 = vmul.f32 0.044715, %v4458_v42  ;;  %v942_v4 = vmul.f32 0.7978845, %v910_v49 }
 0x17b   : > { %v705_v47 = vpop.f32.mrf.mxu0  ;;  %v753_v48 = vpop.f32.mrf.mxu1  ;;  %v4496_v17 = vadd.f32 %v701_v43, %v4450_v30  ;;  %v834_v22 = vmul.f32 0.044715, %v4484_v63  ;;  %v4507_v23 = vadd.f32 %v749_v44, %v4450_v30  ;;  %v4535_v43 = vmul.f32 %v833_v20, %v4481_v62 }
 0x17c   : > { %v912_v53 = vadd.f32 %v880_v46, %v694_v32  ;;  %v4475_v56 = vadd.f32 %v705_v47, %v4444_v15  ;;  %v881_v9 = vmul.f32 %v849_v54, %v4454_v35  ;;  %v850_v10 = vmul.f32 %v818_v55, %v4458_v42 }
 0x17d   : > { %v707_v57 = vpop.f32.mrf.mxu0  ;;  %v755_v58 = vpop.f32.mrf.mxu1  ;;  %v4499_v18 = vadd.f32 %v753_v48, %v4444_v15  ;;  %v819_v39 = vmul.f32 0.044715, %v4496_v17  ;;  %v4538_v44 = vmul.f32 %v834_v22, %v4484_v63  ;;  %v4541_v46 = vmul.f32 0.044715, %v4507_v23 }
 0x17e   : > { %v944_v61 = vmul.f32 0.7978845, %v912_v53  ;;  %v820_v12 = vmul.f32 0.044715, %v4475_v56  ;;  %v913_v33 = vadd.f32 %v881_v9, %v4454_v35  ;;  %v882_v38 = vmul.f32 %v850_v10, %v4458_v42 }
 0x17f   : > { %v711_v1 = vpop.f32.mrf.mxu0  ;;  %v759_v3 = vpop.f32.mrf.mxu1  ;;  %v836_v40 = vmul.f32 0.044715, %v4499_v18  ;;  %v4529_v32 = vadd.f32 %v707_v57, %v4450_v30  ;;  %v4545_v49 = vadd.f32 %v755_v58, %v4450_v30  ;;  %v4559_v58 = vmul.f32 %v819_v39, %v4496_v17 }
 0x180   : > { %3588 = vtanh.f32 %v944_v61  ;;  %v4518_v29 = vadd.f32 %v711_v1, %v4444_v15  ;;  %v852_v34 = vmul.f32 %v820_v12, %v4475_v56  ;;  %v914_v48 = vadd.f32 %v882_v38, %v4458_v42 }
 0x181   : > { %v713_v13 = vpop.f32.mrf.mxu0  ;;  %v761_v14 = vpop.f32.mrf.mxu1  ;;  %3590 = vtanh.f32 %v942_v4  ;;  %v4549_v54 = vadd.f32 %v759_v3, %v4444_v15  ;;  %v945_v59 = vmul.f32 0.7978845, %v913_v33  ;;  %v4562_v6 = vmul.f32 %v836_v40, %v4499_v18 }
 0x182   : > { %v822_v53 = vmul.f32 0.044715, %v4518_v29  ;;  %v4555_v61 = vadd.f32 %v713_v13, %v4450_v30  ;;  %v946_v4 = vmul.f32 0.7978845, %v914_v48  ;;  %v884_v5 = vmul.f32 %v852_v34, %v4475_v56 }
 0x183   : > { %v717_v24 = vpop.f32.mrf.mxu0  ;;  %v765_v25 = vpop.f32.mrf.mxu1  ;;  %v821_v3 = vmul.f32 0.044715, %v4529_v32  ;;  %v4572_v20 = vmul.f32 0.044715, %v4545_v49  ;;  %v4589_v48 = vadd.f32 %v761_v14, %v4450_v30  ;;  %v786_v11 = vmul.f32 0.5, %v4458_v42 }
 0x184   : > { %v4532_v41 = vadd.f32 %v717_v24, %v4444_v15  ;;  %v4567_v9 = vadd.f32 %v765_v25, %v4444_v15  ;;  %3592 = vtanh.f32 %v946_v4  ;;  %v916_v13 = vadd.f32 %v884_v5, %v4475_v56 }
 0x185   : > { %v719_v36 = vpop.f32.mrf.mxu0  ;;  %v767_v37 = vpop.f32.mrf.mxu1  ;;  %v854_v22 = vmul.f32 %v822_v53, %v4518_v29  ;;  %v838_v24 = vmul.f32 0.044715, %v4549_v54  ;;  %3594 = vtanh.f32 %v945_v59  ;;  %v823_v25 = vmul.f32 0.044715, %v4555_v61 }
 0x186   : > { %v824_v7 = vmul.f32 0.044715, %v4532_v41  ;;  %v948_v39 = vmul.f32 0.7978845, %v916_v13  ;;  %v840_v5 = vmul.f32 0.044715, %v4567_v9  ;;  %v4603_v0 = vadd.f32 %v719_v36, %v4450_v30 }
 0x187   : > { %v723_v47 = vpop.f32.mrf.mxu0  ;;  %v771_v57 = vpop.f32.mrf.mxu1  ;;  %v870_v13 = vmul.f32 %v838_v24, %v4549_v54  ;;  %v886_v14 = vmul.f32 %v854_v22, %v4518_v29 }
 0x188   : > { %v4552_v55 = vadd.f32 %v723_v47, %v4444_v15  ;;  %v4583_v38 = vadd.f32 %v771_v57, %v4444_v15  ;;  %v4586_v47 = vmul.f32 %v821_v3, %v4529_v32  ;;  %v856_v53 = vmul.f32 %v824_v7, %v4532_v41 }
 0x189   : > { %v725_v1 = vpop.f32.mrf.mxu0  ;;  %v4576_v33 = vpop.f32.mrf.mxu1  ;;  %3596 = vtanh.f32 %v948_v39  ;;  %v4600_v7 = vmul.f32 %v823_v25, %v4555_v61  ;;  %v4607_v39 = vadd.f32 %v767_v37, %v4450_v30  ;;  %v872_v22 = vmul.f32 %v840_v5, %v4567_v9 }
 0x18a   : > { %v826_v10 = vmul.f32 0.044715, %v4552_v55  ;;  %v888_v42 = vmul.f32 %v856_v53, %v4532_v41  ;;  %v4624_v53 = vadd.f32 %v725_v1, %v4450_v30  ;;  %v1252_v1 = vld [vmem:[#allocation7 + $0xe8] sm:$0xff] }
 0x18b   : > { %v729_v12 = vpop.f32.mrf.mxu0  ;;  %v777_v3 = vpop.f32.mrf.mxu1 }
 0x18c   : > { %v4579_v34 = vadd.f32 %v729_v12, %v4444_v15  ;;  %v858_v59 = vmul.f32 %v826_v10, %v4552_v55  ;;  %v842_v10 = vmul.f32 0.044715, %v4583_v38  ;;  %v4614_v25 = vadd.f32 %v777_v3, %v4444_v15  ;;  %v1253_v15 = vld [vmem:[#allocation7 + $0xf0] sm:$0xff] }
 0x18d   : > { %v3589_v40 = vpop.eup %3588 }
 0x18e   : > { %v828_v4 = vmul.f32 0.044715, %v4579_v34  ;;  %v1008_v12 = vadd.f32 1.0, %v3589_v40  ;;  %v3591_v57 = vpop.eup %3590  ;;  %v890_v8 = vmul.f32 %v858_v59, %v4552_v55 }
 0x18f   : > { %v1006_v40 = vadd.f32 1.0, %v3591_v57  ;;  %v920_v57 = vadd.f32 %v888_v42, %v4532_v41  ;;  %v1251_v42 = vld [vmem:[#allocation7 + $0xe0] sm:$0xff] }
 0x190   : > { %v860_v21 = vmul.f32 %v828_v4, %v4579_v34  ;;  %v1040_v24 = vmul.f32 %v1008_v12, %v4515_v28  ;;  %v918_v4 = vadd.f32 %v886_v14, %v4518_v29  ;;  %v894_v28 = vmul.f32 %v4493_v16, %v4461_v45  ;;  %v731_v14 = vpop.f32.mrf.mxu0 }
 0x191   : > { %v1038_v36 = vmul.f32 %v1006_v40, %v4478_v60  ;;  %v874_v12 = vmul.f32 %v842_v10, %v4583_v38  ;;  %v922_v5 = vadd.f32 %v890_v8, %v4552_v55  ;;  %v896_v60 = vmul.f32 %v4521_v31, %v4470_v52  ;;  %v3593_v31 = vpop.eup %3592 }
 0x192   : > { %v950_v35 = vmul.f32 0.7978845, %v918_v4  ;;  %v892_v37 = vmul.f32 %v860_v21, %v4579_v34  ;;  %v952_v59 = vmul.f32 0.7978845, %v920_v57  ;;  %v926_v3 = vadd.f32 %v894_v28, %v4461_v45  ;;  %v4639_v57 = vpop.eup %3594 }
 0x193   : > { %3292 = vmatprep.mubr.f32.mxu1 %v1038_v36  ;;  %v844_v16 = vmul.f32 0.044715, %v4614_v25  ;;  %v954_v10 = vmul.f32 0.7978845, %v922_v5  ;;  %v928_v40 = vadd.f32 %v896_v60, %v4470_v52  ;;  %v898_v8 = vmul.f32 %v4538_v44, %v4484_v63 }
 0x194   : > { %3293 = vmatmul.mubr.f32.vlgmr.msra.gmra.mxu1 %v1040_v24  ;;  %3598 = vtanh.f32 %v950_v35  ;;  %v924_v21 = vadd.f32 %v892_v37, %v4579_v34  ;;  %v958_v24 = vmul.f32 0.7978845, %v926_v3  ;;  %v900_v45 = vmul.f32 %v4562_v6, %v4499_v18 }
 0x195   : > { %3317 = vmatpush3.msra.mxu1 %v4433_v2  ;;  %3600 = vtanh.f32 %v952_v59  ;;  %v1010_v4 = vadd.f32 1.0, %v3593_v31  ;;  %v960_v2 = vmul.f32 0.7978845, %v928_v40  ;;  %v930_v36 = vadd.f32 %v898_v8, %v4484_v63 }
 0x196   : > { %3318 = vmatprep.subr.mxu1 %v1253_v15  ;;  %v956_v35 = vmul.f32 0.7978845, %v924_v21  ;;  %3602 = vtanh.f32 %v954_v10  ;;  %v4642_v37 = vadd.f32 %v731_v14, %v4450_v30  ;;  %v932_v44 = vadd.f32 %v900_v45, %v4499_v18  ;;  %v3597_v59 = vpop.eup %3596 }
 0x197   : > { %3319 = vmatpush3.msra.mxu1 %v1253_v15  ;;  %v902_v28 = vmul.f32 %v870_v13, %v4549_v54  ;;  %v876_v6 = vmul.f32 %v844_v16, %v4614_v25  ;;  %v1042_v5 = vmul.f32 %v1010_v4, %v786_v11  ;;  %v1250_v15 = vld [vmem:[#allocation7 + $0xd8] sm:$0xff]  ;;  %v962_v60 = vmul.f32 0.7978845, %v930_v36  ;;  %v1249_v13 = vld [vmem:[#allocation7 + $0xd0] sm:$0xff] }
 0x198   : > { %3320 = vmatprep.subr.mxu1 %v1252_v1  ;;  %3604 = vtanh.f32 %v956_v35  ;;  %v964_v21 = vmul.f32 0.7978845, %v932_v44  ;;  %v904_v14 = vmul.f32 %v872_v22, %v4567_v9  ;;  %v788_v10 = vmul.f32 0.5, %v4475_v56  ;;  %v1248_v35 = vld [vmem:[#allocation7 + $0xc8] sm:$0xff] }
 0x199   : > { %3321 = vmatpush3.msra.mxu1 %v1252_v1  ;;  %3606 = vtanh.f32 %v958_v24  ;;  %v934_v3 = vadd.f32 %v902_v28, %v4549_v54  ;;  %3295 = vmatprep.mubr.f32.mxu1 %v1042_v5  ;;  %v1012_v40 = vadd.f32 1.0, %v3597_v59  ;;  %v906_v11 = vmul.f32 %v874_v12, %v4583_v38 }
 0x19a   : > { %3322 = vmatprep.subr.mxu1 %v1251_v42  ;;  %3608 = vtanh.f32 %v960_v2  ;;  %v825_v16 = vmul.f32 0.044715, %v4603_v0  ;;  %v936_v8 = vadd.f32 %v904_v14, %v4567_v9  ;;  %v908_v56 = vmul.f32 %v876_v6, %v4614_v25  ;;  %v1246_v14 = vld [vmem:[#allocation7 + $0xb8] sm:$0xff] }
 0x19b   : > { %3323 = vmatpush3.msra.mxu1 %v1251_v42  ;;  %3610 = vtanh.f32 %v962_v60  ;;  %v966_v1 = vmul.f32 0.7978845, %v934_v3  ;;  %v1044_v31 = vmul.f32 %v1012_v40, %v788_v10  ;;  %v938_v22 = vadd.f32 %v906_v11, %v4583_v38 }
 0x19c   : > { %3324 = vmatprep.subr.mxu1 %v1250_v15  ;;  %3612 = vtanh.f32 %v964_v21  ;;  %v879_v24 = vmul.f32 %v4510_v26, %v4464_v50  ;;  %v827_v45 = vmul.f32 0.044715, %v4624_v53  ;;  %v829_v12 = vmul.f32 0.044715, %v4642_v37 }
 0x19d   : > { %3325 = vmatpush3.msra.mxu1 %v1250_v15  ;;  %3614 = vtanh.f32 %v966_v1  ;;  %v968_v4 = vmul.f32 0.7978845, %v936_v8  ;;  %v970_v42 = vmul.f32 0.7978845, %v938_v22  ;;  %v940_v2 = vadd.f32 %v908_v56, %v4614_v25  ;;  %v1247_v15 = vld [vmem:[#allocation7 + $0xc0] sm:$0xff]  ;;  %v1245_v22 = vld [vmem:[#allocation7 + $0xb0] sm:$0xff] }
 0x19e   : > { %3326 = vmatprep.subr.mxu1 %v1249_v13  ;;  %3296 = vmatmul.mubr.f32.gmra.mxu1 %v1044_v31  ;;  %v911_v36 = vadd.f32 %v879_v24, %v4464_v50  ;;  %v883_v44 = vmul.f32 %v4559_v58, %v4496_v17  ;;  %v839_v28 = vmul.f32 0.044715, %v4589_v48  ;;  %v857_v26 = vmul.f32 %v825_v16, %v4603_v0 }
 0x19f   : > { %v4666_v6 = vmul.f32 0.044715, %v4607_v39  ;;  %v4670_v5 = vadd.f32 %v4576_v33, %v4450_v30  ;;  %3327 = vmatpush3.msra.mxu1 %v1249_v13  ;;  %v790_v59 = vmul.f32 0.5, %v4518_v29  ;;  %3616 = vtanh.f32 %v968_v4 }
 0x1a0   : > { %3328 = vmatprep.subr.mxu1 %v1248_v35  ;;  %v972_v21 = vmul.f32 0.7978845, %v940_v2  ;;  %v885_v58 = vmul.f32 %v4586_v47, %v4529_v32  ;;  %3618 = vtanh.f32 %v970_v42  ;;  %v915_v10 = vadd.f32 %v883_v44, %v4496_v17 }
 0x1a1   : > { %v3599_v60 = vpop.eup %3598  ;;  %3329 = vmatpush3.msra.mxu1 %v1248_v35  ;;  %v887_v33 = vmul.f32 %v4600_v7, %v4555_v61  ;;  %v859_v13 = vmul.f32 %v827_v45, %v4624_v53  ;;  %v861_v29 = vmul.f32 %v829_v12, %v4642_v37  ;;  %v792_v11 = vmul.f32 0.5, %v4532_v41 }
 0x1a2   : > { %v1014_v3 = vadd.f32 1.0, %v3599_v60  ;;  %v3601_v40 = vpop.eup %3600  ;;  %3330 = vmatprep.subr.mxu1 %v1247_v15  ;;  %v943_v16 = vmul.f32 0.7978845, %v911_v36  ;;  %v794_v31 = vmul.f32 0.5, %v4552_v55  ;;  %v796_v35 = vmul.f32 0.5, %v4579_v34 }
 0x1a3   : > { %v3603_v1 = vpop.eup %3602  ;;  %v1016_v8 = vadd.f32 1.0, %v3601_v40  ;;  %3331 = vmatpush3.msra.mxu1 %v1247_v15  ;;  %3620 = vtanh.f32 %v972_v21  ;;  %v917_v24 = vadd.f32 %v885_v58, %v4529_v32  ;;  %v889_v45 = vmul.f32 %v857_v26, %v4603_v0  ;;  %v1244_v15 = vld [vmem:[#allocation7 + $0xa8] sm:$0xff] }
 0x1a4   : > { %v1046_v47 = vmul.f32 %v1014_v3, %v790_v59  ;;  %v1018_v7 = vadd.f32 1.0, %v3603_v1  ;;  %3332 = vmatprep.subr.mxu1 %v1246_v14  ;;  %v947_v42 = vmul.f32 0.7978845, %v915_v10  ;;  %v919_v55 = vadd.f32 %v887_v33, %v4555_v61  ;;  %v1243_v10 = vld [vmem:[#allocation7 + $0xa0] sm:$0xff] }
 0x1a5   : > { %v3605_v56 = vpop.eup %3604  ;;  %v1048_v12 = vmul.f32 %v1016_v8, %v792_v11  ;;  %3333 = vmatpush3.msra.mxu1 %v1246_v14  ;;  %v867_v34 = vmul.f32 %v4541_v46, %v4507_v23  ;;  %3622 = vtanh.f32 %v943_v16  ;;  %v4690_v26 = vmul.f32 %v4572_v20, %v4545_v49  ;;  %v779_v46 = vpop.f32.mrf.mxu1  ;;  %v1242_v8 = vld [vmem:[#allocation7 + $0x98] sm:$0xff] }
 0x1a6   : > { %v3607_v41 = vpop.eup %3606  ;;  %3298 = vmatprep.mubr.f32.mxu1 %v1046_v47  ;;  %v1020_v4 = vadd.f32 1.0, %v3605_v56  ;;  %v1050_v36 = vmul.f32 %v1018_v7, %v794_v31  ;;  %3334 = vmatprep.subr.mxu1 %v1245_v22  ;;  %v843_v59 = vmul.f32 0.044715, %v4670_v5  ;;  %v891_v58 = vmul.f32 %v859_v13, %v4624_v53 }
 0x1a7   : > { %v3609_v2 = vpop.eup %3608  ;;  %v1022_v44 = vadd.f32 1.0, %v3607_v41  ;;  %3299 = vmatmul.mubr.f32.gmra.mxu1 %v1048_v12  ;;  %v4695_v14 = vmul.f32 %v839_v28, %v4589_v48  ;;  %v949_v33 = vmul.f32 0.7978845, %v917_v24  ;;  %v921_v40 = vadd.f32 %v889_v45, %v4603_v0 }
 0x1a8   : > { %v3611_v60 = vpop.eup %3610  ;;  %v1052_v21 = vmul.f32 %v1020_v4, %v796_v35  ;;  %3301 = vmatprep.mubr.f32.mxu1 %v1050_v36  ;;  %3335 = vmatpush3.msra.mxu1 %v1245_v22  ;;  %v893_v20 = vmul.f32 %v861_v29, %v4642_v37  ;;  %v4701_v11 = vmul.f32 %v4666_v6, %v4607_v39  ;;  %v1024_v16 = vadd.f32 1.0, %v3609_v2 }
 0x1a9   : > { %v3613_v3 = vpop.eup %3612  ;;  %3336 = vmatprep.subr.mxu1 %v1244_v15  ;;  %3624 = vtanh.f32 %v947_v42  ;;  %v951_v13 = vmul.f32 0.7978845, %v919_v55  ;;  %v1054_v28 = vmul.f32 %v1022_v44, %v4502_v19  ;;  %v1026_v47 = vadd.f32 1.0, %v3611_v60  ;;  %v1241_v19 = vld [vmem:[#allocation7 + $0x90] sm:$0xff]  ;;  %v1240_v42 = vld [vmem:[#allocation7 + $0x88] sm:$0xff] }
 0x1aa   : > { %v3615_v1 = vpop.eup %3614  ;;  %3337 = vmatpush3.msra.mxu1 %v1244_v15  ;;  %v923_v31 = vadd.f32 %v891_v58, %v4624_v53  ;;  %v895_v35 = vmul.f32 %v4513_v27, %v4467_v51  ;;  %v4708_v29 = vmul.f32 %v843_v59, %v4670_v5  ;;  %v4711_v6 = vadd.f32 %v779_v46, %v4450_v30  ;;  %v1239_v59 = vld [vmem:[#allocation7 + $0x80] sm:$0xff] }
 0x1ab   : > { %3302 = vmatmul.mubr.f32.gmra.mxu1 %v1052_v21  ;;  %v800_v22 = vmul.f32 0.5, %v4470_v52  ;;  %v802_v56 = vmul.f32 0.5, %v4484_v63  ;;  %3338 = vmatprep.subr.mxu1 %v1243_v10  ;;  %3626 = vtanh.f32 %v949_v33  ;;  %v953_v7 = vmul.f32 0.7978845, %v921_v40 }
 0x1ac   : > { %3304 = vmatprep.mubr.f32.mxu1 %v1054_v28  ;;  %3339 = vmatpush3.msra.mxu1 %v1243_v10  ;;  %v925_v24 = vadd.f32 %v893_v20, %v4642_v37  ;;  %v897_v27 = vmul.f32 %v4535_v43, %v4481_v62  ;;  %v3617_v45 = vpop.eup %3616  ;;  %v1028_v30 = vadd.f32 1.0, %v3613_v3  ;;  %3628 = vtanh.f32 %v951_v13 }
 0x1ad   : > { %v1056_v41 = vmul.f32 %v1024_v16, %v800_v22  ;;  %3340 = vmatprep.subr.mxu1 %v1242_v8  ;;  %v927_v52 = vadd.f32 %v895_v35, %v4467_v51  ;;  %v3619_v12 = vpop.eup %3618  ;;  %v1058_v63 = vmul.f32 %v1026_v47, %v802_v56  ;;  %v1030_v4 = vadd.f32 1.0, %v3615_v1 }
 0x1ae   : > { %3341 = vmatpush3.msra.mxu1 %v1242_v8  ;;  %v955_v55 = vmul.f32 0.7978845, %v923_v31  ;;  %v899_v2 = vmul.f32 %v867_v34, %v4507_v23  ;;  %v845_v36 = vmul.f32 0.044715, %v4711_v6  ;;  %v804_v43 = vmul.f32 0.5, %v4499_v18 }
 0x1af   : > { %3305 = vmatmul.mubr.f32.gmra.mxu1 %v1056_v41  ;;  %v806_v44 = vmul.f32 0.5, %v4549_v54  ;;  %v808_v15 = vmul.f32 0.5, %v4567_v9  ;;  %3342 = vmatprep.subr.mxu1 %v1241_v19  ;;  %v1032_v60 = vadd.f32 1.0, %v3617_v45  ;;  %3630 = vtanh.f32 %v953_v7 }
 0x1b0   : > { %3307 = vmatprep.mubr.f32.mxu1 %v1058_v63  ;;  %3343 = vmatpush3.msra.mxu1 %v1241_v19  ;;  %v957_v21 = vmul.f32 0.7978845, %v925_v24  ;;  %v929_v58 = vadd.f32 %v897_v27, %v4481_v62  ;;  %v3621_v3 = vpop.eup %3620  ;;  %v1060_v34 = vmul.f32 %v1028_v30, %v804_v43  ;;  %v1034_v46 = vadd.f32 1.0, %v3619_v12  ;;  %v5638_v19 = vld [vmem:[#allocation21_spill] sm:$0xff] }
 0x1b1   : > { %3344 = vmatprep.subr.mxu1 %v1240_v42  ;;  %v959_v10 = vmul.f32 0.7978845, %v927_v52  ;;  %v901_v18 = vmul.f32 %v4690_v26, %v4545_v49  ;;  %v1062_v54 = vmul.f32 %v1030_v4, %v806_v44  ;;  %3632 = vtanh.f32 %v955_v55 }
 0x1b2   : > { %3345 = vmatpush3.msra.mxu1 %v1240_v42  ;;  %v931_v9 = vadd.f32 %v899_v2, %v4507_v23  ;;  %v903_v33 = vmul.f32 %v4695_v14, %v4589_v48  ;;  %v3623_v40 = vpop.eup %3622  ;;  %v877_v20 = vmul.f32 %v845_v36, %v4711_v6  ;;  %v810_v16 = vmul.f32 0.5, %v4583_v38 }
 0x1b3   : > { %3308 = vmatmul.mubr.f32.gmra.mxu1 %v1060_v34  ;;  %v812_v13 = vmul.f32 0.5, %v4614_v25  ;;  %3346 = vmatprep.subr.mxu1 %v1239_v59  ;;  %v1064_v1 = vmul.f32 %v1032_v60, %v808_v15  ;;  %v1036_v26 = vadd.f32 1.0, %v3621_v3  ;;  %3634 = vtanh.f32 %v957_v21 }
 0x1b4   : > { %3310 = vmatprep.mubr.f32.mxu1 %v1062_v54  ;;  %3347 = vmatpush3.msra.mxu1 %v1239_v59  ;;  %v961_v28 = vmul.f32 0.7978845, %v929_v58  ;;  %v1066_v47 = vmul.f32 %v1034_v46, %v810_v16  ;;  %3636 = vtanh.f32 %v959_v10  ;;  %v933_v8 = vadd.f32 %v901_v18, %v4545_v49 }
 0x1b5   : > { %v905_v14 = vmul.f32 %v4701_v11, %v4607_v39  ;;  %v1007_v35 = vadd.f32 1.0, %v3623_v40  ;;  %v963_v22 = vmul.f32 0.7978845, %v931_v9  ;;  %v935_v38 = vadd.f32 %v903_v33, %v4589_v48 }
 0x1b6   : > { %v3625_v31 = vpop.eup %3624  ;;  %v907_v25 = vmul.f32 %v4708_v29, %v4670_v5  ;;  %v783_v56 = vmul.f32 0.5, %v4464_v50  ;;  %v785_v7 = vmul.f32 0.5, %v5638_v19  ;;  %v1068_v24 = vmul.f32 %v1036_v26, %v812_v13 }
 0x1b7   : > { %3311 = vmatmul.mubr.f32.gmra.mxu1 %v1064_v1  ;;  %v1009_v27 = vadd.f32 1.0, %v4639_v57  ;;  %3638 = vtanh.f32 %v961_v28  ;;  %v1011_v11 = vadd.f32 1.0, %v3625_v31  ;;  %v965_v41 = vmul.f32 0.7978845, %v933_v8 }
 0x1b8   : > { %3313 = vmatprep.mubr.f32.mxu1 %v1066_v47  ;;  %v3627_v45 = vpop.eup %3626  ;;  %v937_v30 = vadd.f32 %v905_v14, %v4607_v39  ;;  %v909_v52 = vmul.f32 %v877_v20, %v4711_v6  ;;  %v1039_v63 = vmul.f32 %v1007_v35, %v783_v56  ;;  %3640 = vtanh.f32 %v963_v22 }
 0x1b9   : > { %v3629_v12 = vpop.eup %3628  ;;  %v967_v29 = vmul.f32 0.7978845, %v935_v38  ;;  %v939_v50 = vadd.f32 %v907_v25, %v4670_v5  ;;  %v1041_v4 = vmul.f32 %v1009_v27, %v785_v7  ;;  %v787_v42 = vmul.f32 0.5, %v4496_v17 }
 0x1ba   : > { %v1013_v55 = vadd.f32 1.0, %v3627_v45  ;;  %3642 = vtanh.f32 %v965_v41  ;;  %v969_v2 = vmul.f32 0.7978845, %v937_v30  ;;  %v941_v36 = vadd.f32 %v909_v52, %v4711_v6  ;;  %v1410_v41 = vld [vmem:[#allocation8 + $0x10] sm:$0xff] }
 0x1bb   : > { %3314 = vmatmul.mubr.f32.gmra.mxu1 %v1068_v24  ;;  %v1043_v43 = vmul.f32 %v1011_v11, %v787_v42  ;;  %v1015_v44 = vadd.f32 1.0, %v3629_v12  ;;  %3644 = vtanh.f32 %v967_v29  ;;  %v971_v15 = vmul.f32 0.7978845, %v939_v50  ;;  %3398 = vmatprep.subr.mxu0 %v1410_v41  ;;  %v3037_v50 = vld [vmem:[%s5577_s4] ss:$0 sm:$0xff] }
 0x1bc   : > { %3348 = vmatprep.mubr.f32.mxu1 %v1039_v63  ;;  %v3631_v57 = vpop.eup %3630  ;;  %v789_v59 = vmul.f32 0.5, %v4529_v32  ;;  %v791_v21 = vmul.f32 0.5, %v4555_v61  ;;  %3646 = vtanh.f32 %v969_v2  ;;  %v973_v34 = vmul.f32 0.7978845, %v941_v36  ;;  %3399 = vmatpush3.msra.mxu0 %v1410_v41  ;;  %v1408_v63 = vld [vmem:[#allocation8] sm:$0xff] }
 0x1bd   : > { %v1017_v17 = vadd.f32 1.0, %v3631_v57  ;;  %3648 = vtanh.f32 %v971_v15  ;;  %v793_v54 = vmul.f32 0.5, %v4603_v0  ;;  %v795_v9 = vmul.f32 0.5, %v4624_v53 }
 0x1be   : > { %v3633_v60 = vpop.eup %3632  ;;  %v1045_v3 = vmul.f32 %v1013_v55, %v789_v59  ;;  %v1047_v10 = vmul.f32 %v1015_v44, %v791_v21  ;;  %3650 = vtanh.f32 %v973_v34  ;;  %v797_v13 = vmul.f32 0.5, %v4642_v37 }
 0x1bf   : > { %3349 = vmatmul.mubr.f32.vlgmr.msra.gmra.mxu1 %v1041_v4  ;;  %v1019_v18 = vadd.f32 1.0, %v3633_v60  ;;  %v1049_v32 = vmul.f32 %v1017_v17, %v793_v54  ;;  %v799_v1 = vmul.f32 0.5, %v4467_v51  ;;  %v801_v53 = vmul.f32 0.5, %v4481_v62 }
 0x1c0   : > { %3351 = vmatprep.mubr.f32.mxu1 %v1043_v43  ;;  %v3635_v58 = vpop.eup %3634  ;;  %v803_v31 = vmul.f32 0.5, %v4507_v23  ;;  %v805_v51 = vmul.f32 0.5, %v4545_v49  ;;  %v807_v19 = vmul.f32 0.5, %v4589_v48  ;;  %v809_v23 = vmul.f32 0.5, %v4607_v39  ;;  %v1409_v49 = vld [vmem:[#allocation8 + $0x8] sm:$0xff] }
 0x1c1   : > { %v3637_v46 = vpop.eup %3636  ;;  %v1021_v40 = vadd.f32 1.0, %v3635_v58  ;;  %v1051_v61 = vmul.f32 %v1019_v18, %v795_v9  ;;  %v811_v11 = vmul.f32 0.5, %v4670_v5  ;;  %v813_v48 = vmul.f32 0.5, %v4711_v6  ;;  %3400 = vmatprep.subr.mxu0 %v1409_v49 }
 0x1c2   : > { %v1023_v20 = vadd.f32 1.0, %v3637_v46  ;;  %3401 = vmatpush3.msra.mxu0 %v1409_v49  ;;  %v5639_v39 = vmov 0.0  }
 0x1c3   : > { %3352 = vmatmul.mubr.f32.gmra.mxu1 %v1045_v3  ;;  %v1053_v26 = vmul.f32 %v1021_v40, %v797_v13  ;;  %3402 = vmatprep.subr.mxu0 %v1408_v63 }
 0x1c4   : > { %3354 = vmatprep.mubr.f32.mxu1 %v1047_v10  ;;  %v3639_v33 = vpop.eup %3638  ;;  %v1055_v0 = vmul.f32 %v1023_v20, %v799_v1  ;;  %3403 = vmatpush3.msra.mxu0 %v1408_v63 }
 0x1c5   : > { %v3641_v16 = vpop.eup %3640  ;;  %v1025_v28 = vadd.f32 1.0, %v3639_v33 }
 0x1c6   : > { %v1027_v8 = vadd.f32 1.0, %v3641_v16 }
 0x1c7   : > { %3355 = vmatmul.mubr.f32.gmra.mxu1 %v1049_v32  ;;  %v3643_v47 = vpop.eup %3642  ;;  %v1057_v35 = vmul.f32 %v1025_v28, %v801_v53 }
 0x1c8   : > { %3357 = vmatprep.mubr.f32.mxu1 %v1051_v61  ;;  %v3645_v14 = vpop.eup %3644  ;;  %v1029_v22 = vadd.f32 1.0, %v3643_v47  ;;  %v1059_v25 = vmul.f32 %v1027_v8, %v803_v31  ;;  %v3039_v47 = vld [vmem:[%s5577_s4 + $0x1] ss:$0 sm:$0xff] }
 0x1c9   : > { %v3647_v38 = vpop.eup %3646  ;;  %v1031_v37 = vadd.f32 1.0, %v3645_v14 }
 0x1ca   : > { %v3649_v56 = vpop.eup %3648  ;;  %v1061_v7 = vmul.f32 %v1029_v22, %v805_v51  ;;  %v1033_v24 = vadd.f32 1.0, %v3647_v38 }
 0x1cb   : > { %3358 = vmatmul.mubr.f32.gmra.mxu1 %v1053_v26  ;;  %v3651_v27 = vpop.eup %3650  ;;  %v1063_v45 = vmul.f32 %v1031_v37, %v807_v19  ;;  %v1035_v62 = vadd.f32 1.0, %v3649_v56 }
 0x1cc   : > { %3360 = vmatprep.mubr.f32.mxu1 %v1055_v0  ;;  %v1065_v30 = vmul.f32 %v1033_v24, %v809_v23  ;;  %v1037_v52 = vadd.f32 1.0, %v3651_v27 }
 0x1cd   : > { %v1067_v12 = vmul.f32 %v1035_v62, %v811_v11 }
 0x1ce   : > { %v1069_v29 = vmul.f32 %v1037_v52, %v813_v48 }
 0x1cf   : > { %3361 = vmatmul.mubr.f32.gmra.mxu1 %v1057_v35 }
 0x1d0   : > { %3363 = vmatprep.mubr.f32.mxu1 %v1059_v25 }
 0x1d3   : > { %3364 = vmatmul.mubr.f32.gmra.mxu1 %v1061_v7 }
 0x1d4   : > { %3366 = vmatprep.mubr.f32.mxu1 %v1063_v45 }
 0x1d7   : > { %3367 = vmatmul.mubr.f32.gmra.mxu1 %v1065_v30 }
 0x1d8   : > { %3369 = vmatprep.mubr.f32.mxu1 %v1067_v12 }
 0x1db   : > { %3370 = vmatmul.mubr.f32.gmra.mxu1 %v1069_v29 }
 0x1dc   : > { %2298 = vmatprep.mubr.f32.mxu1 %v5639_v39 }
 0x254   : > { %v3294_v5 = vpop.f32.mrf.mxu1 }
 0x255   : > { %v4766_v57 = vadd.f32 %v3294_v5, %v3037_v50 }
 0x256   : > { %v1159_v4 = vpop.f32.mrf.mxu1 }
 0x257   : > { %v4764_v42 = vadd.f32 %v3037_v50, %v1159_v4 }
 0x259   : > { %3404 = vmatprep.mubr.f32.mxu0 %v4764_v42 }
 0x25a   : > { %3405 = vmatmul.mubr.f32.vlgmr.msra.gmra.mxu0 %v4766_v57 }
 0x25e   : > { %v3297_v6 = vpop.f32.mrf.mxu1 }
 0x25f   : > { %v4772_v36 = vadd.f32 %v3297_v6, %v3037_v50  ;;  %v4866_v6 = vld [vmem:[%s5579_s6] ss:$0 sm:$0xff] }
 0x260   : > { %v1169_v55 = vpop.f32.mrf.mxu1 }
 0x261   : > { %v4770_v2 = vadd.f32 %v3037_v50, %v1169_v55 }
 0x263   : > { %3407 = vmatprep.mubr.f32.mxu0 %v4770_v2 }
 0x264   : > { %3408 = vmatmul.mubr.f32.gmra.mxu0 %v4772_v36 }
 0x267   : > { %v3300_v43 = vpop.f32.mrf.mxu1 }
 0x268   : > { %v4778_v60 = vadd.f32 %v3300_v43, %v3037_v50 }
 0x269   : > { %v1179_v44 = vpop.f32.mrf.mxu1 }
 0x26a   : > { %v4776_v15 = vadd.f32 %v3037_v50, %v1179_v44 }
 0x26b   : > { %v3303_v59 = vpop.f32.mrf.mxu1 }
 0x26c   : > { %3410 = vmatprep.mubr.f32.mxu0 %v4776_v15  ;;  %v4784_v3 = vadd.f32 %v3303_v59, %v3037_v50 }
 0x26d   : > { %3411 = vmatmul.mubr.f32.gmra.mxu0 %v4778_v60  ;;  %v1189_v21 = vpop.f32.mrf.mxu1 }
 0x26e   : > { %v4782_v58 = vadd.f32 %v3037_v50, %v1189_v21 }
 0x26f   : > { %v3306_v17 = vpop.f32.mrf.mxu1 }
 0x270   : > { %3413 = vmatprep.mubr.f32.mxu0 %v4782_v58  ;;  %v4790_v10 = vadd.f32 %v3306_v17, %v3037_v50  ;;  %v4873_v17 = vld [vmem:[%s5580_s7] ss:$0 sm:$0xff] }
 0x271   : > { %v1199_v34 = vpop.f32.mrf.mxu1  ;;  %3414 = vmatmul.mubr.f32.gmra.mxu0 %v4784_v3 }
 0x272   : > { %v4788_v46 = vadd.f32 %v3037_v50, %v1199_v34 }
 0x273   : > { %v3309_v18 = vpop.f32.mrf.mxu1 }
 0x274   : > { %3416 = vmatprep.mubr.f32.mxu0 %v4788_v46  ;;  %v4796_v33 = vadd.f32 %v3309_v18, %v3037_v50 }
 0x275   : > { %v1209_v54 = vpop.f32.mrf.mxu1  ;;  %3417 = vmatmul.mubr.f32.gmra.mxu0 %v4790_v10 }
 0x276   : > { %v4794_v9 = vadd.f32 %v3037_v50, %v1209_v54 }
 0x277   : > { %v3312_v32 = vpop.f32.mrf.mxu1 }
 0x278   : > { %3419 = vmatprep.mubr.f32.mxu0 %v4794_v9  ;;  %v4802_v20 = vadd.f32 %v3312_v32, %v3037_v50 }
 0x279   : > { %v1219_v40 = vpop.f32.mrf.mxu1  ;;  %3420 = vmatmul.mubr.f32.gmra.mxu0 %v4796_v33 }
 0x27a   : > { %v4800_v61 = vadd.f32 %v3037_v50, %v1219_v40 }
 0x27b   : > { %v3315_v16 = vpop.f32.mrf.mxu1 }
 0x27c   : > { %3422 = vmatprep.mubr.f32.mxu0 %v4800_v61  ;;  %v4808_v26 = vadd.f32 %v3315_v16, %v3037_v50 }
 0x27d   : > { %v1229_v13 = vpop.f32.mrf.mxu1  ;;  %3423 = vmatmul.mubr.f32.gmra.mxu0 %v4802_v20 }
 0x27e   : > { %v4806_v1 = vadd.f32 %v3037_v50, %v1229_v13 }
 0x27f   : > { %v3350_v28 = vpop.f32.mrf.mxu1 }
 0x280   : > { %3425 = vmatprep.mubr.f32.mxu0 %v4806_v1  ;;  %v4817_v14 = vadd.f32 %v3350_v28, %v3039_v47 }
 0x281   : > { %v1329_v0 = vpop.f32.mrf.mxu1  ;;  %3426 = vmatmul.mubr.f32.gmra.mxu0 %v4808_v26 }
 0x282   : > { %v4815_v8 = vadd.f32 %v3039_v47, %v1329_v0 }
 0x283   : > { %v3353_v53 = vpop.f32.mrf.mxu1 }
 0x284   : > { %3428 = vmatprep.mubr.f32.mxu0 %v4815_v8  ;;  %v4823_v22 = vadd.f32 %v3353_v53, %v3039_v47 }
 0x285   : > { %v1339_v31 = vpop.f32.mrf.mxu1  ;;  %3429 = vmatmul.mubr.f32.gmra.mxu0 %v4817_v14 }
 0x286   : > { %v4821_v35 = vadd.f32 %v3039_v47, %v1339_v31 }
 0x287   : > { %v3356_v38 = vpop.f32.mrf.mxu1 }
 0x288   : > { %3431 = vmatprep.mubr.f32.mxu0 %v4821_v35  ;;  %v4829_v56 = vadd.f32 %v3356_v38, %v3039_v47 }
 0x289   : > { %v1349_v25 = vpop.f32.mrf.mxu1  ;;  %3432 = vmatmul.mubr.f32.gmra.mxu0 %v4823_v22 }
 0x28a   : > { %v4827_v37 = vadd.f32 %v3039_v47, %v1349_v25 }
 0x28b   : > { %v3359_v51 = vpop.f32.mrf.mxu1 }
 0x28c   : > { %3434 = vmatprep.mubr.f32.mxu0 %v4827_v37  ;;  %v4835_v24 = vadd.f32 %v3359_v51, %v3039_v47 }
 0x28d   : > { %v1359_v19 = vpop.f32.mrf.mxu1  ;;  %3435 = vmatmul.mubr.f32.gmra.mxu0 %v4829_v56 }
 0x28e   : > { %v4833_v7 = vadd.f32 %v3039_v47, %v1359_v19 }
 0x28f   : > { %v3362_v27 = vpop.f32.mrf.mxu1 }
 0x290   : > { %3437 = vmatprep.mubr.f32.mxu0 %v4833_v7  ;;  %v4841_v23 = vadd.f32 %v3362_v27, %v3039_v47 }
 0x291   : > { %v1369_v45 = vpop.f32.mrf.mxu1  ;;  %3438 = vmatmul.mubr.f32.gmra.mxu0 %v4835_v24 }
 0x292   : > { %v4839_v62 = vadd.f32 %v3039_v47, %v1369_v45 }
 0x293   : > { %v3365_v11 = vpop.f32.mrf.mxu1 }
 0x294   : > { %3440 = vmatprep.mubr.f32.mxu0 %v4839_v62  ;;  %v4847_v52 = vadd.f32 %v3365_v11, %v3039_v47 }
 0x295   : > { %v1379_v41 = vpop.f32.mrf.mxu1  ;;  %3441 = vmatmul.mubr.f32.gmra.mxu0 %v4841_v23 }
 0x296   : > { %v4845_v30 = vadd.f32 %v3039_v47, %v1379_v41 }
 0x297   : > { %v3368_v12 = vpop.f32.mrf.mxu1 }
 0x298   : > { %3443 = vmatprep.mubr.f32.mxu0 %v4845_v30  ;;  %v4853_v48 = vadd.f32 %v3368_v12, %v3039_v47 }
 0x299   : > { %v1389_v49 = vpop.f32.mrf.mxu1  ;;  %3444 = vmatmul.mubr.f32.gmra.mxu0 %v4847_v52 }
 0x29a   : > { %v4851_v63 = vadd.f32 %v3039_v47, %v1389_v49 }
 0x29b   : > { %v3371_v29 = vpop.f32.mrf.mxu1 }
 0x29c   : > { %3446 = vmatprep.mubr.f32.mxu0 %v4851_v63  ;;  %v4859_v4 = vadd.f32 %v3371_v29, %v3039_v47 }
 0x29d   : > { %v1399_v5 = vpop.f32.mrf.mxu1  ;;  %3447 = vmatmul.mubr.f32.gmra.mxu0 %v4853_v48 }
 0x29e   : > { %v4857_v50 = vadd.f32 %v3039_v47, %v1399_v5 }
 0x2a0   : > { %3449 = vmatprep.mubr.f32.mxu0 %v4857_v50 }
 0x2a1   : > { %3450 = vmatmul.mubr.f32.gmra.mxu0 %v4859_v4 }
 0x31a   : > { %v3406_v55 = vpop.f32.mrf.mxu0 }
 0x31b   : > { %v1503_v43 = vadd.f32 %v3406_v55, %v4866_v6 }
 0x31c   : > { %v1497_v44 = vpop.f32.mrf.mxu0 }
 0x31d   : > { %3652 = vtanh.f32 %v1503_v43  ;;  %v1498_v59 = vadd.f32 %v4866_v6, %v1497_v44 }
 0x31f   : > { %3654 = vtanh.f32 %v1498_v59 }
 0x324   : > { %v3409_v21 = vpop.f32.mrf.mxu0 }
 0x325   : > { %v1513_v5 = vadd.f32 %v3409_v21, %v4866_v6 }
 0x326   : > { %v1507_v32 = vpop.f32.mrf.mxu0 }
 0x327   : > { %v1508_v12 = vadd.f32 %v4866_v6, %v1507_v32 }
 0x32a   : > { %v3653_v34 = vpop.eup %3652 }
 0x32b   : > { %v1696_v18 = vmul.f32 %v3653_v34, %v4873_v17 }
 0x32c   : > { %v3655_v54 = vpop.eup %3654 }
 0x32d   : > { %1729 = vadd.xlane.f32.xlu1 %v1696_v18  ;;  %v1695_v40 = vmul.f32 %v3655_v54, %v4873_v17  ;;  %v3412_v16 = vpop.f32.mrf.mxu0 }
 0x32f   : > { %1727 = vadd.xlane.f32.xlu0 %v1695_v40  ;;  %v1517_v13 = vpop.f32.mrf.mxu0  ;;  %v1523_v40 = vadd.f32 %v3412_v16, %v4866_v6 }
 0x330   : > { %v1518_v34 = vadd.f32 %v4866_v6, %v1517_v13 }
 0x331   : > { %v3415_v28 = vpop.f32.mrf.mxu0 }
 0x333   : > { %v1527_v47 = vpop.f32.mrf.mxu0 }
 0x335   : > { %v4877_v0 = vpop.f32.mrf.mxu0 }
 0x337   : > { %v1537_v53 = vpop.f32.mrf.mxu0 }
 0x339   : > { %v4879_v31 = vpop.f32.mrf.mxu0 }
 0x33b   : > { %v4881_v38 = vpop.f32.mrf.mxu0 }
 0x33d   : > { %v4883_v25 = vpop.f32.mrf.mxu0 }
 0x33f   : > { %v4885_v51 = vpop.f32.mrf.mxu0 }
 0x341   : > { %v4887_v19 = vpop.f32.mrf.mxu0 }
 0x343   : > { %v4889_v27 = vpop.f32.mrf.mxu0 }
 0x345   : > { %v3430_v45 = vpop.f32.mrf.mxu0 }
 0x346   : > { %v1583_v11 = vadd.f32 %v3430_v45, %v4866_v6 }
 0x347   : > { %v1577_v41 = vpop.f32.mrf.mxu0 }
 0x348   : > { %3656 = vtanh.f32 %v1583_v11  ;;  %v1578_v49 = vadd.f32 %v4866_v6, %v1577_v41 }
 0x349   : > { %v3433_v29 = vpop.f32.mrf.mxu0 }
 0x34a   : > { %3658 = vtanh.f32 %v1578_v49  ;;  %v1593_v43 = vadd.f32 %v3433_v29, %v4866_v6  ;;  %v1528_v49 = vadd.f32 %v4866_v6, %v1527_v47 }
 0x34b   : > { %v1587_v55 = vpop.f32.mrf.mxu0  ;;  %3660 = vtanh.f32 %v1508_v12 }
 0x34c   : > { %v1588_v44 = vadd.f32 %v4866_v6, %v1587_v55 }
 0x34d   : > { %v3436_v59 = vpop.f32.mrf.mxu0 }
 0x34e   : > { %3662 = vtanh.f32 %v1588_v44  ;;  %v1603_v21 = vadd.f32 %v3436_v59, %v4866_v6 }
 0x34f   : > { %3664 = vtanh.f32 %v1513_v5  ;;  %v1597_v18 = vpop.f32.mrf.mxu0 }
 0x350   : > { %3666 = vtanh.f32 %v1593_v43  ;;  %v1598_v54 = vadd.f32 %v4866_v6, %v1597_v18  ;;  %v1533_v43 = vadd.f32 %v3415_v28, %v4866_v6 }
 0x351   : > { %v3439_v32 = vpop.f32.mrf.mxu0  ;;  %3668 = vtanh.f32 %v1518_v34 }
 0x352   : > { %3670 = vtanh.f32 %v1598_v54  ;;  %v1613_v59 = vadd.f32 %v3439_v32, %v4866_v6 }
 0x353   : > { %v1607_v11 = vpop.f32.mrf.mxu0  ;;  %3672 = vtanh.f32 %v1523_v40  ;;  %v1538_v40 = vadd.f32 %v4866_v6, %v1537_v53 }
 0x354   : > { %3674 = vtanh.f32 %v1603_v21  ;;  %v1608_v13 = vadd.f32 %v4866_v6, %v1607_v11 }
 0x355   : > { %v3657_v45 = vpop.eup %3656  ;;  %v3442_v16 = vpop.f32.mrf.mxu0  ;;  %3676 = vtanh.f32 %v1528_v49 }
 0x356   : > { %v1712_v41 = vmul.f32 %v3657_v45, %v4873_v17  ;;  %3678 = vtanh.f32 %v1608_v13  ;;  %v1623_v13 = vadd.f32 %v3442_v16, %v4866_v6 }
 0x357   : > { %v3659_v12 = vpop.eup %3658  ;;  %v1617_v54 = vpop.f32.mrf.mxu0  ;;  %3680 = vtanh.f32 %v1533_v43  ;;  %v1548_v43 = vadd.f32 %v4866_v6, %v4881_v38 }
 0x358   : > { %1761 = vadd.xlane.f32.xlu1 %v1712_v41  ;;  %v1711_v29 = vmul.f32 %v3659_v12, %v4873_v17  ;;  %v3661_v5 = vpop.eup %3660  ;;  %3682 = vtanh.f32 %v1613_v59  ;;  %v1618_v28 = vadd.f32 %v4866_v6, %v1617_v54  ;;  %v1543_v12 = vadd.f32 %v4877_v0, %v4866_v6 }
 0x359   : > { %v1697_v47 = vmul.f32 %v3661_v5, %v4873_v17  ;;  %v3445_v41 = vpop.f32.mrf.mxu0  ;;  %3684 = vtanh.f32 %v1538_v40 }
 0x35a   : > { %1759 = vadd.xlane.f32.xlu0 %v1711_v29  ;;  %3686 = vtanh.f32 %v1618_v28  ;;  %v1633_v40 = vadd.f32 %v3445_v41, %v4866_v6 }
 0x35b   : > { %v3663_v55 = vpop.eup %3662  ;;  %3688 = vtanh.f32 %v1543_v12 }
 0x35c   : > { %v3665_v44 = vpop.eup %3664  ;;  %v1713_v34 = vmul.f32 %v3663_v55, %v4873_v17  ;;  %v1627_v55 = vpop.f32.mrf.mxu0  ;;  %3690 = vtanh.f32 %v1623_v13 }
 0x35d   : > { %v3667_v18 = vpop.eup %3666  ;;  %v1698_v32 = vmul.f32 %v3665_v44, %v4873_v17  ;;  %v1628_v0 = vadd.f32 %v4866_v6, %v1627_v55  ;;  %3692 = vtanh.f32 %v1548_v43 }
 0x35e   : > { %1763 = vadd.xlane.f32.xlu1 %v1713_v34  ;;  %1731 = vadd.xlane.f32.xlu0 %v1697_v47  ;;  %v3669_v21 = vpop.eup %3668  ;;  %v1714_v45 = vmul.f32 %v3667_v18, %v4873_v17  ;;  %v3448_v47 = vpop.f32.mrf.mxu0  ;;  %v1553_v18 = vadd.f32 %v4879_v31, %v4866_v6 }
 0x35f   : > { %v3671_v11 = vpop.eup %3670  ;;  %v1699_v29 = vmul.f32 %v3669_v21, %v4873_v17  ;;  %3694 = vtanh.f32 %v1628_v0  ;;  %v1568_v0 = vadd.f32 %v4866_v6, %v4889_v27 }
 0x360   : > { %v3673_v49 = vpop.eup %3672  ;;  %v1715_v53 = vmul.f32 %v3671_v11, %v4873_v17  ;;  %3696 = vtanh.f32 %v1553_v18  ;;  %v1573_v18 = vadd.f32 %v4887_v19, %v4866_v6 }
 0x361   : > { %v3675_v5 = vpop.eup %3674  ;;  %v1700_v16 = vmul.f32 %v3673_v49, %v4873_v17  ;;  %3698 = vtanh.f32 %v1633_v40 }
 0x362   : > { %1765 = vadd.xlane.f32.xlu1 %v1714_v45  ;;  %1733 = vadd.xlane.f32.xlu0 %v1698_v32  ;;  %v3677_v44 = vpop.eup %3676  ;;  %v1716_v59 = vmul.f32 %v3675_v5, %v4873_v17  ;;  %v1637_v45 = vpop.f32.mrf.mxu0  ;;  %v1558_v32 = vadd.f32 %v4866_v6, %v4885_v51  ;;  %v1643_v5 = vadd.f32 %v3448_v47, %v4866_v6 }
 0x363   : > { %v3679_v34 = vpop.eup %3678  ;;  %v1701_v21 = vmul.f32 %v3677_v44, %v4873_v17  ;;  %v1638_v31 = vadd.f32 %v4866_v6, %v1637_v45 }
 0x364   : > { %v3681_v54 = vpop.eup %3680  ;;  %v1717_v38 = vmul.f32 %v3679_v34, %v4873_v17  ;;  %v3451_v13 = vpop.f32.mrf.mxu0  ;;  %3700 = vtanh.f32 %v1558_v32 }
 0x365   : > { %v3683_v28 = vpop.eup %3682  ;;  %v1702_v41 = vmul.f32 %v3681_v54, %v4873_v17  ;;  %3702 = vtanh.f32 %v1638_v31  ;;  %v1653_v40 = vadd.f32 %v3451_v13, %v4866_v6 }
 0x366   : > { %1767 = vadd.xlane.f32.xlu1 %v1715_v53  ;;  %1735 = vadd.xlane.f32.xlu0 %v1699_v29  ;;  %v3685_v11 = vpop.eup %3684  ;;  %v1718_v12 = vmul.f32 %v3683_v28, %v4873_v17  ;;  %v1563_v53 = vadd.f32 %v4883_v25, %v4866_v6  ;;  %v1647_v44 = vpop.f32.mrf.mxu0 }
 0x367   : > { %v3687_v49 = vpop.eup %3686  ;;  %v1703_v55 = vmul.f32 %v3685_v11, %v4873_v17  ;;  %v1648_v25 = vadd.f32 %v4866_v6, %v1647_v44 }
 0x368   : > { %v3689_v29 = vpop.eup %3688  ;;  %v1719_v51 = vmul.f32 %v3687_v49, %v4873_v17  ;;  %3704 = vtanh.f32 %v1563_v53 }
 0x369   : > { %v3691_v43 = vpop.eup %3690  ;;  %3706 = vtanh.f32 %v1643_v5  ;;  %v1704_v34 = vmul.f32 %v3689_v29, %v4873_v17 }
 0x36a   : > { %1769 = vadd.xlane.f32.xlu1 %v1716_v59  ;;  %1737 = vadd.xlane.f32.xlu0 %v1700_v16  ;;  %v3693_v59 = vpop.eup %3692  ;;  %v1720_v16 = vmul.f32 %v3691_v43, %v4873_v17  ;;  %3708 = vtanh.f32 %v1568_v0 }
 0x36b   : > { %3710 = vtanh.f32 %v1648_v25 }
 0x36c   : > { %v3695_v47 = vpop.eup %3694  ;;  %3712 = vtanh.f32 %v1573_v18 }
 0x36d   : > { %v3697_v54 = vpop.eup %3696  ;;  %v1721_v27 = vmul.f32 %v3695_v47, %v4873_v17  ;;  %3714 = vtanh.f32 %v1653_v40 }
 0x36e   : > { %1771 = vadd.xlane.f32.xlu1 %v1717_v38  ;;  %1739 = vadd.xlane.f32.xlu0 %v1701_v21  ;;  %v1705_v38 = vmul.f32 %v3693_v59, %v4873_v17  ;;  %v3699_v21 = vpop.eup %3698  ;;  %v1706_v32 = vmul.f32 %v3697_v54, %v4873_v17 }
 0x36f   : > { %v1722_v45 = vmul.f32 %v3699_v21, %v4873_v17 }
 0x371   : > { %v3701_v28 = vpop.eup %3700 }
 0x372   : > { %1773 = vadd.xlane.f32.xlu1 %v1718_v12  ;;  %1741 = vadd.xlane.f32.xlu0 %v1702_v41  ;;  %v3703_v19 = vpop.eup %3702  ;;  %v1707_v31 = vmul.f32 %v3701_v28, %v4873_v17 }
 0x373   : > { %v1723_v6 = vmul.f32 %v3703_v19, %v4873_v17 }
 0x375   : > { %v3705_v11 = vpop.eup %3704 }
 0x376   : > { %1775 = vadd.xlane.f32.xlu1 %v1719_v51  ;;  %1743 = vadd.xlane.f32.xlu0 %v1703_v55  ;;  %v3707_v12 = vpop.eup %3706  ;;  %v1708_v13 = vmul.f32 %v3705_v11, %v4873_v17 }
 0x377   : > { %v3709_v41 = vpop.eup %3708  ;;  %v1724_v49 = vmul.f32 %v3707_v12, %v4873_v17 }
 0x378   : > { %v3711_v53 = vpop.eup %3710  ;;  %v1709_v51 = vmul.f32 %v3709_v41, %v4873_v17 }
 0x379   : > { %v3713_v29 = vpop.eup %3712  ;;  %v1725_v5 = vmul.f32 %v3711_v53, %v4873_v17 }
 0x37a   : > { %1777 = vadd.xlane.f32.xlu1 %v1720_v16  ;;  %1745 = vadd.xlane.f32.xlu0 %v1704_v34  ;;  %v3715_v55 = vpop.eup %3714  ;;  %v1710_v44 = vmul.f32 %v3713_v29, %v4873_v17 }
 0x37b   : > { %v1726_v43 = vmul.f32 %v3715_v55, %v4873_v17 }
 0x37e   : > { %1779 = vadd.xlane.f32.xlu1 %v1721_v27  ;;  %1747 = vadd.xlane.f32.xlu0 %v1705_v38 }
 0x382   : > { %1781 = vadd.xlane.f32.xlu1 %v1722_v45  ;;  %1749 = vadd.xlane.f32.xlu0 %v1706_v32 }
 0x386   : > { %1783 = vadd.xlane.f32.xlu1 %v1723_v6  ;;  %1751 = vadd.xlane.f32.xlu0 %v1707_v31 }
 0x38a   : > { %1785 = vadd.xlane.f32.xlu1 %v1724_v49  ;;  %1753 = vadd.xlane.f32.xlu0 %v1708_v13 }
 0x38e   : > { %1787 = vadd.xlane.f32.xlu1 %v1725_v5  ;;  %1755 = vadd.xlane.f32.xlu0 %v1709_v51 }
 0x392   : > { %1789 = vadd.xlane.f32.xlu1 %v1726_v43  ;;  %1757 = vadd.xlane.f32.xlu0 %v1710_v44 }
 0x3b6   : > { %v1730_v0 = vpop.xlane.xlu1 %1729 }
 0x3b8   : > { %v1728_v59 = vpop.xlane.xlu0 %1727 }
 0x3e1   : > { %v1762_v25 = vpop.xlane.xlu1 %1761 }
 0x3e2   : > { %v1792_v16 = vsub.f32 %v1730_v0, %v1762_v25 }
 0x3e3   : > { %v1760_v34 = vpop.xlane.xlu0 %1759 }
 0x3e4   : > { %v3043_v47 = vmul.f32 -1.442695, %v1792_v16  ;;  %v1791_v18 = vsub.f32 %v1728_v59, %v1760_v34 }
 0x3e6   : > { %3716 = vpow2.f32 %v3043_v47  ;;  %v3042_v54 = vmul.f32 -1.442695, %v1791_v18 }
 0x3e7   : > { %v1764_v40 = vpop.xlane.xlu1 %1763  ;;  %v1732_v27 = vpop.xlane.xlu0 %1731 }
 0x3e8   : > { %3718 = vpow2.f32 %v3042_v54  ;;  %v1793_v38 = vsub.f32 %v1732_v27, %v1764_v40 }
 0x3ea   : > { %v3044_v21 = vmul.f32 -1.442695, %v1793_v38 }
 0x3eb   : > { %v1766_v28 = vpop.xlane.xlu1 %1765  ;;  %v1734_v45 = vpop.xlane.xlu0 %1733 }
 0x3ec   : > { %3720 = vpow2.f32 %v3044_v21  ;;  %v1794_v17 = vsub.f32 %v1734_v45, %v1766_v28 }
 0x3ee   : > { %v3045_v32 = vmul.f32 -1.442695, %v1794_v17 }
 0x3ef   : > { %v1768_v19 = vpop.xlane.xlu1 %1767  ;;  %v1736_v11 = vpop.xlane.xlu0 %1735 }
 0x3f0   : > { %3722 = vpow2.f32 %v3045_v32  ;;  %v1795_v6 = vsub.f32 %v1736_v11, %v1768_v19 }
 0x3f2   : > { %v3046_v31 = vmul.f32 -1.442695, %v1795_v6 }
 0x3f3   : > { %v3717_v12 = vpop.eup %3716  ;;  %v1770_v41 = vpop.xlane.xlu1 %1769 }
 0x3f4   : > { %v1738_v49 = vpop.xlane.xlu0 %1737  ;;  %v1856_v13 = vadd.f32 1.0, %v3717_v12  ;;  %3724 = vpow2.f32 %v3046_v31 }
 0x3f5   : > { %v1796_v53 = vsub.f32 %v1738_v49, %v1770_v41  ;;  %v3719_v29 = vpop.eup %3718 }
 0x3f6   : > { %3726 = vrcp.f32 %v1856_v13  ;;  %v1855_v5 = vadd.f32 1.0, %v3719_v29 }
 0x3f7   : > { %v3047_v51 = vmul.f32 -1.442695, %v1796_v53  ;;  %v1772_v55 = vpop.xlane.xlu1 %1771 }
 0x3f8   : > { %v1740_v43 = vpop.xlane.xlu0 %1739  ;;  %3728 = vrcp.f32 %v1855_v5 }
 0x3f9   : > { %v1797_v44 = vsub.f32 %v1740_v43, %v1772_v55  ;;  %v3721_v0 = vpop.eup %3720  ;;  %3730 = vpow2.f32 %v3047_v51 }
 0x3fa   : > { %v1857_v59 = vadd.f32 1.0, %v3721_v0 }
 0x3fb   : > { %v3048_v25 = vmul.f32 -1.442695, %v1797_v44  ;;  %v1774_v16 = vpop.xlane.xlu1 %1773 }
 0x3fc   : > { %v1742_v34 = vpop.xlane.xlu0 %1741  ;;  %3732 = vrcp.f32 %v1857_v59 }
 0x3fd   : > { %v1798_v47 = vsub.f32 %v1742_v34, %v1774_v16  ;;  %v3723_v18 = vpop.eup %3722  ;;  %3734 = vpow2.f32 %v3048_v25 }
 0x3fe   : > { %v1858_v54 = vadd.f32 1.0, %v3723_v18 }
 0x3ff   : > { %v3049_v40 = vmul.f32 -1.442695, %v1798_v47  ;;  %v1776_v27 = vpop.xlane.xlu1 %1775 }
 0x400   : > { %v1744_v38 = vpop.xlane.xlu0 %1743  ;;  %3736 = vrcp.f32 %v1858_v54 }
 0x401   : > { %v1799_v21 = vsub.f32 %v1744_v38, %v1776_v27  ;;  %v3725_v28 = vpop.eup %3724  ;;  %3738 = vpow2.f32 %v3049_v40 }
 0x402   : > { %v1859_v45 = vadd.f32 1.0, %v3725_v28 }
 0x403   : > { %v3050_v17 = vmul.f32 -1.442695, %v1799_v21  ;;  %v3727_v32 = vpop.eup %3726  ;;  %v1778_v19 = vpop.xlane.xlu1 %1777 }
 0x404   : > { %v1746_v11 = vpop.xlane.xlu0 %1745  ;;  %3740 = vrcp.f32 %v1859_v45  ;;  %v1920_v31 = vsub.f32 1.0, %v3727_v32  ;;  %v1904_v13 = vmul.f32 %v3727_v32, %v4766_v57 }
 0x405   : > { %v1800_v6 = vsub.f32 %v1746_v11, %v1778_v19  ;;  %v3729_v12 = vpop.eup %3728  ;;  %3742 = vpow2.f32 %v3050_v17 }
 0x406   : > { %v3731_v41 = vpop.eup %3730  ;;  %v1936_v53 = vmul.f32 %v1920_v31, %v4817_v14  ;;  %v1919_v29 = vsub.f32 1.0, %v3729_v12  ;;  %v1903_v43 = vmul.f32 %v3729_v12, %v4764_v42 }
 0x407   : > { %v3051_v49 = vmul.f32 -1.442695, %v1800_v6  ;;  %v1860_v5 = vadd.f32 1.0, %v3731_v41  ;;  %v1780_v51 = vpop.xlane.xlu1 %1779 }
 0x408   : > { %v1748_v55 = vpop.xlane.xlu0 %1747  ;;  %v4961_v0 = vadd.f32 %v1936_v53, %v1904_v13  ;;  %v1935_v59 = vmul.f32 %v1919_v29, %v4815_v8 }
 0x409   : > { %3744 = vpow2.f32 %v3051_v49  ;;  %v1801_v44 = vsub.f32 %v1748_v55, %v1780_v51  ;;  %v3733_v25 = vpop.eup %3732 }
 0x40a   : > { %3746 = vrcp.f32 %v1860_v5  ;;  %v3735_v16 = vpop.eup %3734  ;;  %1969 = vadd.xlane.f32.xlu1 %v4961_v0  ;;  %v4965_v57 = vadd.f32 %v1935_v59, %v1903_v43  ;;  %v1921_v14 = vsub.f32 1.0, %v3733_v25  ;;  %v1905_v40 = vmul.f32 %v3733_v25, %v4770_v2 }
 0x40b   : > { %v3052_v34 = vmul.f32 -1.442695, %v1801_v44  ;;  %v1861_v47 = vadd.f32 1.0, %v3735_v16  ;;  %v1782_v18 = vpop.xlane.xlu1 %1781 }
 0x40c   : > { %v1750_v54 = vpop.xlane.xlu0 %1749  ;;  %1967 = vadd.xlane.f32.xlu0 %v4965_v57  ;;  %v1937_v8 = vmul.f32 %v1921_v14, %v4821_v35 }
 0x40d   : > { %3748 = vpow2.f32 %v3052_v34  ;;  %v1802_v42 = vsub.f32 %v1750_v54, %v1782_v18  ;;  %v3737_v27 = vpop.eup %3736 }
 0x40e   : > { %3750 = vrcp.f32 %v1861_v47  ;;  %v3739_v38 = vpop.eup %3738  ;;  %v4970_v28 = vadd.f32 %v1937_v8, %v1905_v40  ;;  %v1922_v45 = vsub.f32 1.0, %v3737_v27  ;;  %v1906_v6 = vmul.f32 %v3737_v27, %v4772_v36 }
 0x40f   : > { %v3053_v21 = vmul.f32 -1.442695, %v1802_v42  ;;  %v1862_v17 = vadd.f32 1.0, %v3739_v38  ;;  %v1784_v32 = vpop.xlane.xlu1 %1783 }
 0x410   : > { %v1752_v19 = vpop.xlane.xlu0 %1751  ;;  %1971 = vadd.xlane.f32.xlu0 %v4970_v28  ;;  %v1938_v2 = vmul.f32 %v1922_v45, %v4823_v22 }
 0x411   : > { %3752 = vpow2.f32 %v3053_v21  ;;  %v1803_v11 = vsub.f32 %v1752_v19, %v1784_v32  ;;  %v3741_v31 = vpop.eup %3740 }
 0x412   : > { %3754 = vrcp.f32 %v1862_v17  ;;  %v3743_v35 = vpop.eup %3742  ;;  %v4975_v41 = vadd.f32 %v1938_v2, %v1906_v6  ;;  %v1923_v49 = vsub.f32 1.0, %v3741_v31  ;;  %v1907_v51 = vmul.f32 %v3741_v31, %v4776_v15 }
 0x413   : > { %v3054_v12 = vmul.f32 -1.442695, %v1803_v11  ;;  %v1863_v13 = vadd.f32 1.0, %v3743_v35  ;;  %v1786_v53 = vpop.xlane.xlu1 %1785 }
 0x414   : > { %v1754_v29 = vpop.xlane.xlu0 %1753  ;;  %1973 = vadd.xlane.f32.xlu1 %v4975_v41  ;;  %v1939_v36 = vmul.f32 %v1923_v49, %v4827_v37 }
 0x415   : > { %3756 = vpow2.f32 %v3054_v12  ;;  %v1804_v5 = vsub.f32 %v1754_v29, %v1786_v53 }
 0x416   : > { %v3745_v55 = vpop.eup %3744  ;;  %3758 = vrcp.f32 %v1863_v13  ;;  %v4980_v59 = vadd.f32 %v1939_v36, %v1907_v51 }
 0x417   : > { %v3747_v22 = vpop.eup %3746  ;;  %v1864_v43 = vadd.f32 1.0, %v3745_v55  ;;  %v3055_v44 = vmul.f32 -1.442695, %v1804_v5  ;;  %v1788_v25 = vpop.xlane.xlu1 %1787 }
 0x418   : > { %v1756_v16 = vpop.xlane.xlu0 %1755  ;;  %v1924_v34 = vsub.f32 1.0, %v3747_v22  ;;  %1975 = vadd.xlane.f32.xlu0 %v4980_v59  ;;  %v1908_v15 = vmul.f32 %v3747_v22, %v4778_v60 }
 0x419   : > { %3760 = vrcp.f32 %v1864_v43  ;;  %v1805_v14 = vsub.f32 %v1756_v16, %v1788_v25 }
 0x41a   : > { %v3749_v47 = vpop.eup %3748  ;;  %3762 = vpow2.f32 %v3055_v44  ;;  %v1940_v37 = vmul.f32 %v1924_v34, %v4829_v56 }
 0x41b   : > { %v3751_v18 = vpop.eup %3750  ;;  %v1865_v54 = vadd.f32 1.0, %v3749_v47  ;;  %v3056_v42 = vmul.f32 -1.442695, %v1805_v14  ;;  %v1790_v40 = vpop.xlane.xlu1 %1789 }
 0x41c   : > { %v1758_v8 = vpop.xlane.xlu0 %1757  ;;  %v4985_v27 = vadd.f32 %v1940_v37, %v1908_v15  ;;  %v1925_v38 = vsub.f32 1.0, %v3751_v18  ;;  %v1909_v17 = vmul.f32 %v3751_v18, %v4782_v58 }
 0x41d   : > { %3764 = vrcp.f32 %v1865_v54  ;;  %v1806_v21 = vsub.f32 %v1758_v8, %v1790_v40 }
 0x41e   : > { %v3753_v45 = vpop.eup %3752  ;;  %3766 = vpow2.f32 %v3056_v42  ;;  %1977 = vadd.xlane.f32.xlu1 %v4985_v27  ;;  %v1941_v60 = vmul.f32 %v1925_v38, %v4833_v7 }
 0x41f   : > { %v3755_v32 = vpop.eup %3754  ;;  %v1866_v56 = vadd.f32 1.0, %v3753_v45  ;;  %v3057_v19 = vmul.f32 -1.442695, %v1806_v21 }
 0x420   : > { %v4990_v11 = vadd.f32 %v1941_v60, %v1909_v17  ;;  %v1926_v6 = vsub.f32 1.0, %v3755_v32  ;;  %v1910_v31 = vmul.f32 %v3755_v32, %v4784_v3 }
 0x421   : > { %3768 = vrcp.f32 %v1866_v56 }
 0x422   : > { %v3757_v2 = vpop.eup %3756  ;;  %3770 = vpow2.f32 %v3057_v19  ;;  %1979 = vadd.xlane.f32.xlu0 %v4990_v11  ;;  %v1942_v35 = vmul.f32 %v1926_v6, %v4835_v24  ;;  %v2221_v6 = vld [vmem:[#allocation10 + $0xf8] sm:$0xff] }
 0x423   : > { %v3759_v12 = vpop.eup %3758  ;;  %v1867_v49 = vadd.f32 1.0, %v3757_v2  ;;  %v2220_v2 = vld [vmem:[#allocation10 + $0xf0] sm:$0xff]  ;;  %2234 = vmatprep.subr.mxu1 %v2221_v6  ;;  %v2207_v6 = vld [vmem:[#allocation10 + $0x88] sm:$0xff] }
 0x424   : > { %v4995_v58 = vadd.f32 %v1942_v35, %v1910_v31  ;;  %v1927_v7 = vsub.f32 1.0, %v3759_v12  ;;  %v1911_v53 = vmul.f32 %v3759_v12, %v4788_v46  ;;  %v2219_v31 = vld [vmem:[#allocation10 + $0xe8] sm:$0xff]  ;;  %2235 = vmatpush1.msra.mxu1 %v2220_v2  ;;  %v2216_v35 = vld [vmem:[#allocation10 + $0xd0] sm:$0xff] }
 0x425   : > { %3772 = vrcp.f32 %v1867_v49  ;;  %2236 = vmatprep.subr.mxu1 %v2219_v31  ;;  %v2215_v12 = vld [vmem:[#allocation10 + $0xc8] sm:$0xff] }
 0x426   : > { %v3761_v13 = vpop.eup %3760  ;;  %1981 = vadd.xlane.f32.xlu1 %v4995_v58  ;;  %v1943_v29 = vmul.f32 %v1927_v7, %v4839_v62 }
 0x427   : > { %v3763_v5 = vpop.eup %3762  ;;  %v1928_v51 = vsub.f32 1.0, %v3761_v13  ;;  %v1912_v3 = vmul.f32 %v3761_v13, %v4790_v10 }
 0x428   : > { %v1868_v36 = vadd.f32 1.0, %v3763_v5  ;;  %v5000_v55 = vadd.f32 %v1943_v29, %v1911_v53 }
 0x429   : > { %v1944_v24 = vmul.f32 %v1928_v51, %v4841_v23 }
 0x42a   : > { %v3765_v22 = vpop.eup %3764  ;;  %3774 = vrcp.f32 %v1868_v36  ;;  %1983 = vadd.xlane.f32.xlu0 %v5000_v55 }
 0x42b   : > { %v3767_v43 = vpop.eup %3766  ;;  %v5005_v44 = vadd.f32 %v1944_v24, %v1912_v3  ;;  %v1929_v25 = vsub.f32 1.0, %v3765_v22  ;;  %v1913_v62 = vmul.f32 %v3765_v22, %v4794_v9 }
 0x42c   : > { %v1869_v46 = vadd.f32 1.0, %v3767_v43 }
 0x42d   : > { %1985 = vadd.xlane.f32.xlu1 %v5005_v44  ;;  %v1945_v16 = vmul.f32 %v1929_v25, %v4845_v30 }
 0x42e   : > { %v3769_v34 = vpop.eup %3768  ;;  %3776 = vrcp.f32 %v1869_v46 }
 0x42f   : > { %v3771_v10 = vpop.eup %3770  ;;  %v5010_v14 = vadd.f32 %v1945_v16, %v1913_v62  ;;  %v1930_v23 = vsub.f32 1.0, %v3769_v34  ;;  %v1914_v15 = vmul.f32 %v3769_v34, %v4796_v33 }
 0x430   : > { %v1870_v47 = vadd.f32 1.0, %v3771_v10  ;;  %v2214_v10 = vld [vmem:[#allocation10 + $0xc0] sm:$0xff] }
 0x431   : > { %1987 = vadd.xlane.f32.xlu0 %v5010_v14  ;;  %v1946_v37 = vmul.f32 %v1930_v23, %v4847_v52  ;;  %v2213_v23 = vld [vmem:[#allocation10 + $0xb8] sm:$0xff] }
 0x432   : > { %v3773_v18 = vpop.eup %3772  ;;  %3778 = vrcp.f32 %v1870_v47 }
 0x433   : > { %v5015_v54 = vadd.f32 %v1946_v37, %v1914_v15  ;;  %v1931_v9 = vsub.f32 1.0, %v3773_v18  ;;  %v1915_v30 = vmul.f32 %v3773_v18, %v4800_v61 }
 0x435   : > { %1989 = vadd.xlane.f32.xlu1 %v5015_v54  ;;  %v1947_v42 = vmul.f32 %v1931_v9, %v4851_v63 }
 0x437   : > { %v3775_v40 = vpop.eup %3774  ;;  %v5020_v8 = vadd.f32 %v1947_v42, %v1915_v30 }
 0x438   : > { %v1932_v38 = vsub.f32 1.0, %v3775_v40  ;;  %v1916_v33 = vmul.f32 %v3775_v40, %v4802_v20 }
 0x439   : > { %1991 = vadd.xlane.f32.xlu0 %v5020_v8 }
 0x43a   : > { %v1948_v52 = vmul.f32 %v1932_v38, %v4853_v48 }
 0x43b   : > { %v3777_v21 = vpop.eup %3776 }
 0x43c   : > { %v5025_v45 = vadd.f32 %v1948_v52, %v1916_v33  ;;  %v1933_v17 = vsub.f32 1.0, %v3777_v21  ;;  %v1917_v61 = vmul.f32 %v3777_v21, %v4806_v1  ;;  %v2218_v1 = vld [vmem:[#allocation10 + $0xe0] sm:$0xff] }
 0x43d   : > { %2237 = vmatpush1.msra.mxu1 %v2218_v1  ;;  %v2205_v1 = vld [vmem:[#allocation10 + $0x78] sm:$0xff] }
 0x43e   : > { %1993 = vadd.xlane.f32.xlu1 %v5025_v45  ;;  %v1949_v63 = vmul.f32 %v1933_v17, %v4857_v50  ;;  %v2217_v50 = vld [vmem:[#allocation10 + $0xd8] sm:$0xff] }
 0x43f   : > { %v3779_v60 = vpop.eup %3778  ;;  %2238 = vmatprep.subr.mxu1 %v2217_v50 }
 0x440   : > { %v5030_v32 = vadd.f32 %v1949_v63, %v1917_v61  ;;  %v1934_v56 = vsub.f32 1.0, %v3779_v60  ;;  %v1918_v20 = vmul.f32 %v3779_v60, %v4808_v26  ;;  %2239 = vmatpush1.msra.mxu1 %v2216_v35  ;;  %v2211_v61 = vld [vmem:[#allocation10 + $0xa8] sm:$0xff]  ;;  %v2210_v63 = vld [vmem:[#allocation10 + $0xa0] sm:$0xff] }
 0x441   : > { %2240 = vmatprep.subr.mxu1 %v2215_v12  ;;  %v2204_v12 = vld [vmem:[#allocation10 + $0x70] sm:$0xff] }
 0x442   : > { %1995 = vadd.xlane.f32.xlu0 %v5030_v32  ;;  %v1950_v48 = vmul.f32 %v1934_v56, %v4859_v4  ;;  %2241 = vmatpush1.msra.mxu1 %v2214_v10  ;;  %v2209_v56 = vld [vmem:[#allocation10 + $0x98] sm:$0xff] }
 0x443   : > { %2242 = vmatprep.subr.mxu1 %v2213_v23  ;;  %v2192_v23 = vld [vmem:[#allocation10 + $0x10] sm:$0xff] }
 0x444   : > { %v5035_v19 = vadd.f32 %v1950_v48, %v1918_v20  ;;  %v2208_v48 = vld [vmem:[#allocation10 + $0x90] sm:$0xff] }
 0x446   : > { %1997 = vadd.xlane.f32.xlu1 %v5035_v19 }
 0x493   : > { %v1970_v26 = vpop.xlane.xlu1 %1969 }
 0x494   : > { %v2001_v4 = vmul.f32 0.0078125, %v1970_v26  ;;  %v2203_v26 = vld [vmem:[#allocation10 + $0x68] sm:$0xff] }
 0x495   : > { %v1968_v49 = vpop.xlane.xlu0 %1967 }
 0x496   : > { %v5039_v7 = vsub.f32 %v4961_v0, %v2001_v4  ;;  %v2000_v13 = vmul.f32 0.0078125, %v1968_v49 }
 0x498   : > { %v5042_v53 = vsub.f32 %v4965_v57, %v2000_v13  ;;  %v2033_v29 = vmul.f32 %v5039_v7, %v5039_v7  ;;  %v2201_v13 = vld [vmem:[#allocation10 + $0x58] sm:$0xff] }
 0x499   : > { %v1972_v5 = vpop.xlane.xlu0 %1971 }
 0x49a   : > { %v2002_v51 = vmul.f32 0.0078125, %v1972_v5  ;;  %2050 = vadd.xlane.f32.xlu1 %v2033_v29  ;;  %v2032_v36 = vmul.f32 %v5042_v53, %v5042_v53 }
 0x49c   : > { %v5049_v3 = vsub.f32 %v4970_v28, %v2002_v51  ;;  %2048 = vadd.xlane.f32.xlu0 %v2032_v36  ;;  %v2200_v51 = vld [vmem:[#allocation10 + $0x50] sm:$0xff]  ;;  %v2199_v36 = vld [vmem:[#allocation10 + $0x48] sm:$0xff] }
 0x49d   : > { %v1974_v24 = vpop.xlane.xlu1 %1973 }
 0x49e   : > { %v2003_v0 = vmul.f32 0.0078125, %v1974_v24  ;;  %v2034_v22 = vmul.f32 %v5049_v3, %v5049_v3 }
 0x4a0   : > { %v5054_v57 = vsub.f32 %v4975_v41, %v2003_v0  ;;  %2052 = vadd.xlane.f32.xlu0 %v2034_v22  ;;  %v2197_v0 = vld [vmem:[#allocation10 + $0x38] sm:$0xff] }
 0x4a1   : > { %v1976_v43 = vpop.xlane.xlu0 %1975 }
 0x4a2   : > { %v2004_v25 = vmul.f32 0.0078125, %v1976_v43  ;;  %v2035_v46 = vmul.f32 %v5054_v57, %v5054_v57 }
 0x4a4   : > { %v5059_v62 = vsub.f32 %v4980_v59, %v2004_v25  ;;  %2054 = vadd.xlane.f32.xlu1 %v2035_v46  ;;  %v2196_v25 = vld [vmem:[#allocation10 + $0x30] sm:$0xff] }
 0x4a6   : > { %v2036_v16 = vmul.f32 %v5059_v62, %v5059_v62 }
 0x4a7   : > { %v1978_v28 = vpop.xlane.xlu1 %1977 }
 0x4a8   : > { %v2005_v34 = vmul.f32 0.0078125, %v1978_v28  ;;  %2056 = vadd.xlane.f32.xlu0 %v2036_v16  ;;  %v2195_v28 = vld [vmem:[#allocation10 + $0x28] sm:$0xff]  ;;  %v2194_v16 = vld [vmem:[#allocation10 + $0x20] sm:$0xff] }
 0x4aa   : > { %v5064_v41 = vsub.f32 %v4985_v27, %v2005_v34  ;;  %v2193_v34 = vld [vmem:[#allocation10 + $0x18] sm:$0xff] }
 0x4ab   : > { %v1980_v47 = vpop.xlane.xlu0 %1979 }
 0x4ac   : > { %v2006_v15 = vmul.f32 0.0078125, %v1980_v47  ;;  %v2037_v59 = vmul.f32 %v5064_v41, %v5064_v41 }
 0x4ae   : > { %v5069_v37 = vsub.f32 %v4990_v11, %v2006_v15  ;;  %2058 = vadd.xlane.f32.xlu1 %v2037_v59  ;;  %v2191_v59 = vld [vmem:[#allocation10 + $0x8] sm:$0xff] }
 0x4af   : > { %v1982_v18 = vpop.xlane.xlu1 %1981 }
 0x4b0   : > { %v2007_v9 = vmul.f32 0.0078125, %v1982_v18  ;;  %v2038_v30 = vmul.f32 %v5069_v37, %v5069_v37  ;;  %v2190_v18 = vld [vmem:[#allocation10] sm:$0xff] }
 0x4b2   : > { %v5074_v42 = vsub.f32 %v4995_v58, %v2007_v9  ;;  %2060 = vadd.xlane.f32.xlu0 %v2038_v30  ;;  %v2212_v58 = vld [vmem:[#allocation10 + $0xb0] sm:$0xff] }
 0x4b3   : > { %v1984_v27 = vpop.xlane.xlu0 %1983  ;;  %2243 = vmatpush1.msra.mxu1 %v2212_v58  ;;  %v2712_v58 = vld [vmem:[#allocation11 + $0xe8] sm:$0xff] }
 0x4b4   : > { %v2008_v40 = vmul.f32 0.0078125, %v1984_v27  ;;  %v2039_v38 = vmul.f32 %v5074_v42, %v5074_v42  ;;  %2244 = vmatprep.subr.mxu1 %v2211_v61  ;;  %v2696_v61 = vld [vmem:[#allocation11 + $0x68] sm:$0xff] }
 0x4b5   : > { %2245 = vmatpush1.msra.mxu1 %v2210_v63  ;;  %v2711_v63 = vld [vmem:[#allocation11 + $0xe0] sm:$0xff] }
 0x4b6   : > { %v5079_v33 = vsub.f32 %v5000_v55, %v2008_v40  ;;  %2062 = vadd.xlane.f32.xlu1 %v2039_v38  ;;  %v1986_v11 = vpop.xlane.xlu1 %1985  ;;  %2246 = vmatprep.subr.mxu1 %v2209_v56  ;;  %v2694_v56 = vld [vmem:[#allocation11 + $0x58] sm:$0xff] }
 0x4b7   : > { %v2009_v52 = vmul.f32 0.0078125, %v1986_v11  ;;  %2247 = vmatpush1.msra.mxu1 %v2208_v48  ;;  %v2714_v11 = vld [vmem:[#allocation11 + $0xf8] sm:$0xff]  ;;  %v2708_v48 = vld [vmem:[#allocation11 + $0xc8] sm:$0xff] }
 0x4b8   : > { %v2040_v21 = vmul.f32 %v5079_v33, %v5079_v33  ;;  %2248 = vmatprep.subr.mxu1 %v2207_v6  ;;  %3180 = vmatprep.subr.mxu0 %v2714_v11  ;;  %v2692_v6 = vld [vmem:[#allocation11 + $0x48] sm:$0xff] }
 0x4b9   : > { %v5084_v17 = vsub.f32 %v5005_v44, %v2009_v52  ;;  %v2206_v44 = vld [vmem:[#allocation10 + $0x80] sm:$0xff]  ;;  %v2713_v52 = vld [vmem:[#allocation11 + $0xf0] sm:$0xff] }
 0x4ba   : > { %2064 = vadd.xlane.f32.xlu0 %v2040_v21  ;;  %v1988_v60 = vpop.xlane.xlu0 %1987  ;;  %2249 = vmatpush1.msra.mxu1 %v2206_v44  ;;  %v2697_v21 = vld [vmem:[#allocation11 + $0x70] sm:$0xff]  ;;  %v2707_v44 = vld [vmem:[#allocation11 + $0xc0] sm:$0xff] }
 0x4bb   : > { %v2010_v20 = vmul.f32 0.0078125, %v1988_v60  ;;  %v2041_v55 = vmul.f32 %v5084_v17, %v5084_v17  ;;  %2250 = vmatprep.subr.mxu1 %v2205_v1  ;;  %v2695_v60 = vld [vmem:[#allocation11 + $0x60] sm:$0xff] }
 0x4bc   : > { %2251 = vmatpush1.msra.mxu1 %v2204_v12 }
 0x4bd   : > { %v5089_v2 = vsub.f32 %v5010_v14, %v2010_v20  ;;  %2066 = vadd.xlane.f32.xlu1 %v2041_v55  ;;  %v2202_v14 = vld [vmem:[#allocation10 + $0x60] sm:$0xff]  ;;  %2252 = vmatprep.subr.mxu1 %v2203_v26  ;;  %v2709_v20 = vld [vmem:[#allocation11 + $0xd0] sm:$0xff] }
 0x4be   : > { %v1990_v31 = vpop.xlane.xlu1 %1989  ;;  %2253 = vmatpush1.msra.mxu1 %v2202_v14  ;;  %v2693_v55 = vld [vmem:[#allocation11 + $0x50] sm:$0xff] }
 0x4bf   : > { %v2011_v50 = vmul.f32 0.0078125, %v1990_v31  ;;  %v2042_v35 = vmul.f32 %v5089_v2, %v5089_v2  ;;  %2254 = vmatprep.subr.mxu1 %v2201_v13  ;;  %v2691_v31 = vld [vmem:[#allocation11 + $0x40] sm:$0xff] }
 0x4c0   : > { %2255 = vmatpush1.msra.mxu1 %v2200_v51 }
 0x4c1   : > { %v5094_v4 = vsub.f32 %v5015_v54, %v2011_v50  ;;  %2068 = vadd.xlane.f32.xlu0 %v2042_v35  ;;  %v2198_v54 = vld [vmem:[#allocation10 + $0x40] sm:$0xff]  ;;  %2256 = vmatprep.subr.mxu1 %v2199_v36 }
 0x4c2   : > { %v1992_v49 = vpop.xlane.xlu0 %1991  ;;  %2257 = vmatpush1.msra.mxu1 %v2198_v54 }
 0x4c3   : > { %v2012_v29 = vmul.f32 0.0078125, %v1992_v49  ;;  %v2043_v5 = vmul.f32 %v5094_v4, %v5094_v4  ;;  %2258 = vmatprep.subr.mxu1 %v2197_v0 }
 0x4c4   : > { %2259 = vmatpush1.msra.mxu1 %v2196_v25 }
 0x4c5   : > { %v5099_v24 = vsub.f32 %v5020_v8, %v2012_v29  ;;  %2070 = vadd.xlane.f32.xlu1 %v2043_v5  ;;  %2260 = vmatprep.subr.mxu1 %v2195_v28 }
 0x4c6   : > { %2261 = vmatpush1.msra.mxu1 %v2194_v16 }
 0x4c7   : > { %v1994_v22 = vpop.xlane.xlu1 %1993  ;;  %v2044_v43 = vmul.f32 %v5099_v24, %v5099_v24  ;;  %2262 = vmatprep.subr.mxu1 %v2193_v34 }
 0x4c8   : > { %v2013_v46 = vmul.f32 0.0078125, %v1994_v22  ;;  %2263 = vmatpush1.msra.mxu1 %v2192_v23  ;;  %v5123_v23 = vld [vmem:[%s5581_s8] ss:$0 sm:$0xff] }
 0x4c9   : > { %2072 = vadd.xlane.f32.xlu0 %v2044_v43  ;;  %2264 = vmatprep.subr.mxu1 %v2191_v59 }
 0x4ca   : > { %v5104_v8 = vsub.f32 %v5025_v45, %v2013_v46  ;;  %2265 = vmatpush1.msra.mxu1 %v2190_v18 }
 0x4cb   : > { %v1996_v10 = vpop.xlane.xlu0 %1995 }
 0x4cc   : > { %v2014_v47 = vmul.f32 0.0078125, %v1996_v10  ;;  %v2045_v15 = vmul.f32 %v5104_v8, %v5104_v8 }
 0x4ce   : > { %v5109_v9 = vsub.f32 %v5030_v32, %v2014_v47  ;;  %2074 = vadd.xlane.f32.xlu1 %v2045_v15  ;;  %v2698_v32 = vld [vmem:[#allocation11 + $0x78] sm:$0xff] }
 0x4cf   : > { %v1998_v45 = vpop.xlane.xlu1 %1997  ;;  %3181 = vmatpush3.msra.mxu0 %v2698_v32 }
 0x4d0   : > { %v2015_v30 = vmul.f32 0.0078125, %v1998_v45  ;;  %v2046_v27 = vmul.f32 %v5109_v9, %v5109_v9  ;;  %3182 = vmatprep.subr.mxu0 %v2713_v52  ;;  %v5129_v45 = vld [vmem:[%s5582_s9] ss:$0 sm:$0xff] }
 0x4d1   : > { %3183 = vmatpush3.msra.mxu0 %v2697_v21 }
 0x4d2   : > { %v5114_v40 = vsub.f32 %v5035_v19, %v2015_v30  ;;  %2076 = vadd.xlane.f32.xlu0 %v2046_v27  ;;  %3184 = vmatprep.subr.mxu0 %v2712_v58  ;;  %v2710_v19 = vld [vmem:[#allocation11 + $0xd8] sm:$0xff] }
 0x4d3   : > { %3185 = vmatpush3.msra.mxu0 %v2696_v61 }
 0x4d4   : > { %v2047_v38 = vmul.f32 %v5114_v40, %v5114_v40  ;;  %3186 = vmatprep.subr.mxu0 %v2711_v63 }
 0x4d5   : > { %3187 = vmatpush3.msra.mxu0 %v2695_v60 }
 0x4d6   : > { %2078 = vadd.xlane.f32.xlu1 %v2047_v38  ;;  %3188 = vmatprep.subr.mxu0 %v2710_v19 }
 0x4d7   : > { %3189 = vmatpush3.msra.mxu0 %v2694_v56 }
 0x4d8   : > { %3190 = vmatprep.subr.mxu0 %v2709_v20 }
 0x4d9   : > { %3191 = vmatpush3.msra.mxu0 %v2693_v55 }
 0x4da   : > { %3192 = vmatprep.subr.mxu0 %v2708_v48 }
 0x4db   : > { %3193 = vmatpush3.msra.mxu0 %v2692_v6 }
 0x4dc   : > { %3194 = vmatprep.subr.mxu0 %v2707_v44 }
 0x4dd   : > { %3195 = vmatpush3.msra.mxu0 %v2691_v31 }
 0x523   : > { %v2051_v1 = vpop.xlane.xlu1 %2050 }
 0x524   : > { %v2081_v50 = vmul.f32 0.0078125, %v2051_v1 }
 0x525   : > { %v2049_v35 = vpop.xlane.xlu0 %2048 }
 0x526   : > { %v2097_v12 = vadd.f32 1e-05, %v2081_v50  ;;  %v2080_v26 = vmul.f32 0.0078125, %v2049_v35 }
 0x528   : > { %3780 = vrsqrt.f32 %v2097_v12  ;;  %v2096_v14 = vadd.f32 1e-05, %v2080_v26 }
 0x529   : > { %v2053_v49 = vpop.xlane.xlu0 %2052 }
 0x52a   : > { %3782 = vrsqrt.f32 %v2096_v14  ;;  %v2082_v13 = vmul.f32 0.0078125, %v2053_v49 }
 0x52c   : > { %v2098_v29 = vadd.f32 1e-05, %v2082_v13 }
 0x52d   : > { %v2055_v5 = vpop.xlane.xlu1 %2054 }
 0x52e   : > { %3784 = vrsqrt.f32 %v2098_v29  ;;  %v2083_v51 = vmul.f32 0.0078125, %v2055_v5 }
 0x530   : > { %v2099_v36 = vadd.f32 1e-05, %v2083_v51 }
 0x531   : > { %v2057_v54 = vpop.xlane.xlu0 %2056 }
 0x532   : > { %3786 = vrsqrt.f32 %v2099_v36  ;;  %v2084_v0 = vmul.f32 0.0078125, %v2057_v54 }
 0x534   : > { %v2100_v22 = vadd.f32 1e-05, %v2084_v0 }
 0x535   : > { %v3781_v43 = vpop.eup %3780 }
 0x536   : > { %3788 = vrsqrt.f32 %v2100_v22  ;;  %v2129_v34 = vmul.f32 %v3781_v43, %v5039_v7 }
 0x537   : > { %v2059_v25 = vpop.xlane.xlu1 %2058  ;;  %v3783_v46 = vpop.eup %3782 }
 0x538   : > { %v2085_v28 = vmul.f32 0.0078125, %v2059_v25  ;;  %v2128_v16 = vmul.f32 %v3783_v46, %v5042_v53  ;;  %v2152_v7 = vmul.f32 %v5123_v23, %v2129_v34 }
 0x53a   : > { %v2101_v10 = vadd.f32 1e-05, %v2085_v28  ;;  %v2151_v15 = vmul.f32 %v5123_v23, %v2128_v16  ;;  %v2175_v52 = vadd.f32 %v5129_v45, %v2152_v7 }
 0x53b   : > { %v2061_v47 = vpop.xlane.xlu0 %2060  ;;  %v3785_v59 = vpop.eup %3784 }
 0x53c   : > { %3790 = vrsqrt.f32 %v2101_v10  ;;  %v2086_v18 = vmul.f32 0.0078125, %v2061_v47  ;;  %v2174_v53 = vadd.f32 %v5129_v45, %v2151_v15  ;;  %v2130_v30 = vmul.f32 %v3785_v59, %v5049_v3 }
 0x53e   : > { %v2102_v27 = vadd.f32 1e-05, %v2086_v18  ;;  %2299 = vmatmul.mubr.f32.vlgmr.msra.gmra.mxu1 %v2174_v53  ;;  %v2153_v21 = vmul.f32 %v5123_v23, %v2130_v30 }
 0x53f   : > { %v2063_v38 = vpop.xlane.xlu1 %2062  ;;  %v3787_v11 = vpop.eup %3786  ;;  %2304 = vmatprep.mubr.f32.mxu1 %v5639_v39 }
 0x540   : > { %3792 = vrsqrt.f32 %v2102_v27  ;;  %v2087_v32 = vmul.f32 0.0078125, %v2063_v38  ;;  %v2131_v58 = vmul.f32 %v3787_v11, %v5054_v57  ;;  %v2176_v19 = vadd.f32 %v5129_v45, %v2153_v21 }
 0x542   : > { %v2103_v61 = vadd.f32 1e-05, %v2087_v32  ;;  %2305 = vmatmul.mubr.f32.gmra.mxu1 %v2175_v52  ;;  %v2154_v56 = vmul.f32 %v5123_v23, %v2131_v58 }
 0x543   : > { %v2065_v63 = vpop.xlane.xlu0 %2064  ;;  %v3789_v60 = vpop.eup %3788  ;;  %2310 = vmatprep.mubr.f32.mxu1 %v5639_v39 }
 0x544   : > { %3794 = vrsqrt.f32 %v2103_v61  ;;  %v2088_v3 = vmul.f32 0.0078125, %v2065_v63  ;;  %v2132_v20 = vmul.f32 %v3789_v60, %v5059_v62  ;;  %v2177_v31 = vadd.f32 %v5129_v45, %v2154_v56 }
 0x546   : > { %v2104_v55 = vadd.f32 1e-05, %v2088_v3  ;;  %v2067_v48 = vpop.xlane.xlu1 %2066  ;;  %2311 = vmatmul.mubr.f32.gmra.mxu1 %v2176_v19  ;;  %v2155_v1 = vmul.f32 %v5123_v23, %v2132_v20 }
 0x547   : > { %v2089_v6 = vmul.f32 0.0078125, %v2067_v48  ;;  %2316 = vmatprep.mubr.f32.mxu1 %v5639_v39 }
 0x548   : > { %3796 = vrsqrt.f32 %v2104_v55  ;;  %v2178_v14 = vadd.f32 %v5129_v45, %v2155_v1 }
 0x549   : > { %v3791_v57 = vpop.eup %3790  ;;  %v2105_v44 = vadd.f32 1e-05, %v2089_v6 }
 0x54a   : > { %v2069_v50 = vpop.xlane.xlu0 %2068  ;;  %v2133_v35 = vmul.f32 %v3791_v57, %v5064_v41  ;;  %2317 = vmatmul.mubr.f32.gmra.mxu1 %v2177_v31 }
 0x54b   : > { %3798 = vrsqrt.f32 %v2105_v44  ;;  %v2090_v12 = vmul.f32 0.0078125, %v2069_v50  ;;  %2322 = vmatprep.mubr.f32.mxu1 %v5639_v39 }
 0x54c   : > { %v2156_v49 = vmul.f32 %v5123_v23, %v2133_v35 }
 0x54d   : > { %v3793_v62 = vpop.eup %3792  ;;  %v2106_v26 = vadd.f32 1e-05, %v2090_v12  ;;  %v2706_v12 = vld [vmem:[#allocation11 + $0xb8] sm:$0xff] }
 0x54e   : > { %v2071_v13 = vpop.xlane.xlu1 %2070  ;;  %v2134_v29 = vmul.f32 %v3793_v62, %v5069_v37  ;;  %2323 = vmatmul.mubr.f32.gmra.mxu1 %v2178_v14  ;;  %v2179_v36 = vadd.f32 %v5129_v45, %v2156_v49  ;;  %v2690_v62 = vld [vmem:[#allocation11 + $0x38] sm:$0xff]  ;;  %3196 = vmatprep.subr.mxu0 %v2706_v12  ;;  %v2689_v14 = vld [vmem:[#allocation11 + $0x30] sm:$0xff]  ;;  %v2688_v49 = vld [vmem:[#allocation11 + $0x28] sm:$0xff] }
 0x54f   : > { %3800 = vrsqrt.f32 %v2106_v26  ;;  %v2091_v5 = vmul.f32 0.0078125, %v2071_v13  ;;  %2328 = vmatprep.mubr.f32.mxu1 %v5639_v39  ;;  %v2705_v26 = vld [vmem:[#allocation11 + $0xb0] sm:$0xff]  ;;  %3197 = vmatpush3.msra.mxu0 %v2690_v62  ;;  %v2703_v13 = vld [vmem:[#allocation11 + $0xa0] sm:$0xff] }
 0x550   : > { %v2157_v54 = vmul.f32 %v5123_v23, %v2134_v29  ;;  %3198 = vmatprep.subr.mxu0 %v2705_v26  ;;  %v2701_v29 = vld [vmem:[#allocation11 + $0x90] sm:$0xff] }
 0x551   : > { %v3795_v41 = vpop.eup %3794  ;;  %v2107_v51 = vadd.f32 1e-05, %v2091_v5  ;;  %3199 = vmatpush3.msra.mxu0 %v2689_v14  ;;  %v2685_v5 = vld [vmem:[#allocation11 + $0x10] sm:$0xff] }
 0x552   : > { %v2073_v0 = vpop.xlane.xlu0 %2072  ;;  %v2135_v22 = vmul.f32 %v3795_v41, %v5074_v42  ;;  %2329 = vmatmul.mubr.f32.gmra.mxu1 %v2179_v36  ;;  %v2180_v46 = vadd.f32 %v5129_v45, %v2157_v54  ;;  %v2700_v41 = vld [vmem:[#allocation11 + $0x88] sm:$0xff]  ;;  %v2699_v36 = vld [vmem:[#allocation11 + $0x80] sm:$0xff] }
 0x553   : > { %3802 = vrsqrt.f32 %v2107_v51  ;;  %v2092_v43 = vmul.f32 0.0078125, %v2073_v0  ;;  %2334 = vmatprep.mubr.f32.mxu1 %v5639_v39  ;;  %v2684_v51 = vld [vmem:[#allocation11 + $0x8] sm:$0xff]  ;;  %v2683_v54 = vld [vmem:[#allocation11] sm:$0xff] }
 0x554   : > { %v2158_v28 = vmul.f32 %v5123_v23, %v2135_v22  ;;  %v2222_v0 = vld [vmem:[%s5584_s11] sm:$0x3] }
 0x555   : > { %v3797_v37 = vpop.eup %3796  ;;  %v2108_v25 = vadd.f32 1e-05, %v2092_v43  ;;  %v5640_v22 = vld [vmem:[#allocation20_spill] sm:$0xff] }
 0x556   : > { %v2136_v16 = vmul.f32 %v3797_v37, %v5079_v33  ;;  %2335 = vmatmul.mubr.f32.gmra.mxu1 %v2180_v46  ;;  %v2181_v42 = vadd.f32 %v5129_v45, %v2158_v28  ;;  %v5641_v43 = vsub.s32 0, %v5640_v22 }
 0x557   : > { %3804 = vrsqrt.f32 %v2108_v25  ;;  %v2075_v34 = vpop.xlane.xlu1 %2074  ;;  %2340 = vmatprep.mubr.f32.mxu1 %v5639_v39  ;;  %v5642_v25 = vsub.s32 1, %v5640_v22 }
 0x558   : > { %v3799_v10 = vpop.eup %3798  ;;  %v2093_v47 = vmul.f32 0.0078125, %v2075_v34  ;;  %v2159_v15 = vmul.f32 %v5123_v23, %v2136_v16  ;;  %v5196_v37 = vrot.slane %v2222_v0, %v5641_v43 }
 0x559   : > { %v2137_v59 = vmul.f32 %v3799_v10, %v5084_v17  ;;  %v5200_v46 = vrot.slane %v2222_v0, %v5642_v25 }
 0x55a   : > { %v2109_v18 = vadd.f32 1e-05, %v2093_v47  ;;  %2341 = vmatmul.mubr.f32.gmra.mxu1 %v2181_v42  ;;  %v2182_v33 = vadd.f32 %v5129_v45, %v2159_v15 }
 0x55b   : > { %v2077_v53 = vpop.xlane.xlu0 %2076  ;;  %2346 = vmatprep.mubr.f32.mxu1 %v5639_v39  ;;  %v2160_v27 = vmul.f32 %v5123_v23, %v2137_v59 }
 0x55c   : > { %v3801_v7 = vpop.eup %3800  ;;  %3806 = vrsqrt.f32 %v2109_v18  ;;  %v2094_v30 = vmul.f32 0.0078125, %v2077_v53 }
 0x55d   : > { %v2138_v38 = vmul.f32 %v3801_v7, %v5089_v2  ;;  %v2183_v21 = vadd.f32 %v5129_v45, %v2160_v27 }
 0x55e   : > { %v2110_v11 = vadd.f32 1e-05, %v2094_v30  ;;  %2347 = vmatmul.mubr.f32.gmra.mxu1 %v2182_v33 }
 0x55f   : > { %v2079_v32 = vpop.xlane.xlu1 %2078  ;;  %2352 = vmatprep.mubr.f32.mxu1 %v5639_v39  ;;  %v2161_v58 = vmul.f32 %v5123_v23, %v2138_v38 }
 0x560   : > { %v3803_v52 = vpop.eup %3802  ;;  %3808 = vrsqrt.f32 %v2110_v11  ;;  %v2095_v17 = vmul.f32 0.0078125, %v2079_v32 }
 0x561   : > { %v2139_v61 = vmul.f32 %v3803_v52, %v5094_v4  ;;  %v2184_v2 = vadd.f32 %v5129_v45, %v2161_v58 }
 0x562   : > { %v2111_v63 = vadd.f32 1e-05, %v2095_v17  ;;  %2353 = vmatmul.mubr.f32.gmra.mxu1 %v2183_v21 }
 0x563   : > { %2358 = vmatprep.mubr.f32.mxu1 %v5639_v39  ;;  %v2162_v3 = vmul.f32 %v5123_v23, %v2139_v61 }
 0x564   : > { %v3805_v60 = vpop.eup %3804  ;;  %3810 = vrsqrt.f32 %v2111_v63 }
 0x565   : > { %v2140_v19 = vmul.f32 %v3805_v60, %v5099_v24  ;;  %v2185_v20 = vadd.f32 %v5129_v45, %v2162_v3 }
 0x566   : > { %2359 = vmatmul.mubr.f32.gmra.mxu1 %v2184_v2 }
 0x567   : > { %2364 = vmatprep.mubr.f32.mxu1 %v5639_v39  ;;  %v2163_v4 = vmul.f32 %v5123_v23, %v2140_v19 }
 0x569   : > { %v3807_v56 = vpop.eup %3806  ;;  %v2186_v6 = vadd.f32 %v5129_v45, %v2163_v4 }
 0x56a   : > { %v2141_v55 = vmul.f32 %v3807_v56, %v5104_v8  ;;  %2365 = vmatmul.mubr.f32.gmra.mxu1 %v2185_v20 }
 0x56b   : > { %2370 = vmatprep.mubr.f32.mxu1 %v5639_v39 }
 0x56c   : > { %v2164_v57 = vmul.f32 %v5123_v23, %v2141_v55 }
 0x56d   : > { %v3809_v48 = vpop.eup %3808 }
 0x56e   : > { %v2142_v24 = vmul.f32 %v3809_v48, %v5109_v9  ;;  %2371 = vmatmul.mubr.f32.gmra.mxu1 %v2186_v6  ;;  %v2187_v31 = vadd.f32 %v5129_v45, %v2164_v57 }
 0x56f   : > { %2376 = vmatprep.mubr.f32.mxu1 %v5639_v39 }
 0x570   : > { %v2165_v1 = vmul.f32 %v5123_v23, %v2142_v24 }
 0x571   : > { %v3811_v44 = vpop.eup %3810 }
 0x572   : > { %v2143_v8 = vmul.f32 %v3811_v44, %v5114_v40  ;;  %2377 = vmatmul.mubr.f32.gmra.mxu1 %v2187_v31  ;;  %v2188_v50 = vadd.f32 %v5129_v45, %v2165_v1  ;;  %v2704_v40 = vld [vmem:[#allocation11 + $0xa8] sm:$0xff] }
 0x573   : > { %2382 = vmatprep.mubr.f32.mxu1 %v5639_v39  ;;  %3200 = vmatprep.subr.mxu0 %v2704_v40 }
 0x574   : > { %v2166_v35 = vmul.f32 %v5123_v23, %v2143_v8  ;;  %3201 = vmatpush3.msra.mxu0 %v2688_v49  ;;  %v2687_v23 = vld [vmem:[#allocation11 + $0x20] sm:$0xff] }
 0x575   : > { %3202 = vmatprep.subr.mxu0 %v2703_v13 }
 0x576   : > { %2383 = vmatmul.mubr.f32.gmra.mxu1 %v2188_v50  ;;  %v2189_v9 = vadd.f32 %v5129_v45, %v2166_v35  ;;  %3203 = vmatpush3.msra.mxu0 %v2687_v23  ;;  %v2686_v45 = vld [vmem:[#allocation11 + $0x18] sm:$0xff] }
 0x577   : > { %2388 = vmatprep.mubr.f32.mxu1 %v5639_v39  ;;  %v2702_v39 = vld [vmem:[#allocation11 + $0x98] sm:$0xff] }
 0x578   : > { %3204 = vmatprep.subr.mxu0 %v2702_v39 }
 0x579   : > { %3205 = vmatpush3.msra.mxu0 %v2686_v45 }
 0x57a   : > { %2389 = vmatmul.mubr.f32.gmra.mxu1 %v2189_v9  ;;  %3206 = vmatprep.subr.mxu0 %v2701_v29 }
 0x57b   : > { %3207 = vmatpush3.msra.mxu0 %v2685_v5 }
 0x57c   : > { %3208 = vmatprep.subr.mxu0 %v2700_v41 }
 0x57d   : > { %3209 = vmatpush3.msra.mxu0 %v2684_v51 }
 0x57e   : > { %3210 = vmatprep.subr.mxu0 %v2699_v36 }
 0x57f   : > { %3211 = vmatpush3.msra.mxu0 %v2683_v54 }
 0x5fe   : > { %v2300_v28 = vpop.f32.mrf.mxu1 }
 0x5ff   : > { %v5203_v16 = vadd.f32 %v2300_v28, %v5196_v37 }
 0x600   : > { %v2302_v34 = vpop.f32.mrf.mxu1 }
 0x601   : > { %v2427_v10 = vmul.f32 0.044715, %v5203_v16  ;;  %v5207_v47 = vadd.f32 %v2302_v34, %v5200_v46 }
 0x602   : > { %v2306_v42 = vpop.f32.mrf.mxu1 }
 0x603   : > { %v2459_v15 = vmul.f32 %v2427_v10, %v5203_v16  ;;  %v2428_v59 = vmul.f32 0.044715, %v5207_v47  ;;  %v5212_v18 = vadd.f32 %v2306_v42, %v5196_v37 }
 0x604   : > { %v2308_v53 = vpop.f32.mrf.mxu1 }
 0x605   : > { %v2491_v7 = vmul.f32 %v2459_v15, %v5203_v16  ;;  %v2460_v30 = vmul.f32 %v2428_v59, %v5207_v47  ;;  %v2429_v33 = vmul.f32 0.044715, %v5212_v18  ;;  %v5218_v27 = vadd.f32 %v2308_v53, %v5200_v46 }
 0x606   : > { %v2312_v38 = vpop.f32.mrf.mxu1 }
 0x607   : > { %v2523_v11 = vadd.f32 %v2491_v7, %v5203_v16  ;;  %v2461_v32 = vmul.f32 %v2429_v33, %v5212_v18  ;;  %v2430_v52 = vmul.f32 0.044715, %v5218_v27  ;;  %v5224_v17 = vadd.f32 %v2312_v38, %v5196_v37 }
 0x608   : > { %v2314_v21 = vpop.f32.mrf.mxu1  ;;  %v2492_v58 = vmul.f32 %v2460_v30, %v5207_v47 }
 0x609   : > { %v2555_v61 = vmul.f32 0.7978845, %v2523_v11  ;;  %v2462_v63 = vmul.f32 %v2430_v52, %v5218_v27  ;;  %v2431_v60 = vmul.f32 0.044715, %v5224_v17  ;;  %v5230_v2 = vadd.f32 %v2314_v21, %v5200_v46 }
 0x60a   : > { %v2318_v3 = vpop.f32.mrf.mxu1  ;;  %v2524_v19 = vadd.f32 %v2492_v58, %v5207_v47  ;;  %v2493_v56 = vmul.f32 %v2461_v32, %v5212_v18  ;;  %v2395_v52 = vmul.f32 0.5, %v5203_v16 }
 0x60b   : > { %3812 = vtanh.f32 %v2555_v61  ;;  %v2463_v20 = vmul.f32 %v2431_v60, %v5224_v17  ;;  %v2432_v4 = vmul.f32 0.044715, %v5230_v2  ;;  %v5237_v55 = vadd.f32 %v2318_v3, %v5196_v37 }
 0x60c   : > { %v2320_v48 = vpop.f32.mrf.mxu1  ;;  %v2556_v6 = vmul.f32 0.7978845, %v2524_v19  ;;  %v2494_v57 = vmul.f32 %v2462_v63, %v5218_v27  ;;  %v2525_v24 = vadd.f32 %v2493_v56, %v5212_v18  ;;  %v2396_v3 = vmul.f32 0.5, %v5207_v47 }
 0x60d   : > { %v2464_v44 = vmul.f32 %v2432_v4, %v5230_v2  ;;  %v2433_v31 = vmul.f32 0.044715, %v5237_v55  ;;  %v5244_v1 = vadd.f32 %v2320_v48, %v5200_v46  ;;  %v2495_v8 = vmul.f32 %v2463_v20, %v5224_v17 }
 0x60e   : > { %v2324_v50 = vpop.f32.mrf.mxu1  ;;  %3814 = vtanh.f32 %v2556_v6  ;;  %v2526_v35 = vadd.f32 %v2494_v57, %v5218_v27  ;;  %v2557_v9 = vmul.f32 0.7978845, %v2525_v24  ;;  %v2397_v19 = vmul.f32 0.5, %v5212_v18 }
 0x60f   : > { %v2465_v12 = vmul.f32 %v2433_v31, %v5237_v55  ;;  %v2434_v62 = vmul.f32 0.044715, %v5244_v1  ;;  %v5251_v26 = vadd.f32 %v2324_v50, %v5196_v37  ;;  %v2496_v14 = vmul.f32 %v2464_v44, %v5230_v2 }
 0x610   : > { %v2326_v40 = vpop.f32.mrf.mxu1  ;;  %v2558_v49 = vmul.f32 0.7978845, %v2526_v35  ;;  %3816 = vtanh.f32 %v2557_v9  ;;  %v2527_v13 = vadd.f32 %v2495_v8, %v5224_v17  ;;  %v2398_v44 = vmul.f32 0.5, %v5218_v27 }
 0x611   : > { %v2466_v23 = vmul.f32 %v2434_v62, %v5244_v1  ;;  %v2435_v39 = vmul.f32 0.044715, %v5251_v26  ;;  %v5258_v45 = vadd.f32 %v2326_v40, %v5200_v46  ;;  %v2528_v29 = vadd.f32 %v2496_v14, %v5230_v2 }
 0x612   : > { %v2330_v5 = vpop.f32.mrf.mxu1  ;;  %3818 = vtanh.f32 %v2558_v49  ;;  %v2559_v41 = vmul.f32 0.7978845, %v2527_v13  ;;  %v2497_v51 = vmul.f32 %v2465_v12, %v5237_v55  ;;  %v2399_v12 = vmul.f32 0.5, %v5224_v17 }
 0x613   : > { %v2467_v36 = vmul.f32 %v2435_v39, %v5251_v26  ;;  %v2436_v54 = vmul.f32 0.044715, %v5258_v45  ;;  %v5265_v0 = vadd.f32 %v2330_v5, %v5196_v37  ;;  %v2560_v22 = vmul.f32 0.7978845, %v2528_v29 }
 0x614   : > { %v2332_v43 = vpop.f32.mrf.mxu1  ;;  %3820 = vtanh.f32 %v2559_v41  ;;  %v2498_v25 = vmul.f32 %v2466_v23, %v5244_v1  ;;  %v2529_v28 = vadd.f32 %v2497_v51, %v5237_v55 }
 0x615   : > { %v2468_v34 = vmul.f32 %v2436_v54, %v5258_v45  ;;  %v2437_v10 = vmul.f32 0.044715, %v5265_v0  ;;  %v5272_v42 = vadd.f32 %v2332_v43, %v5200_v46  ;;  %3822 = vtanh.f32 %v2560_v22 }
 0x616   : > { %v2336_v15 = vpop.f32.mrf.mxu1  ;;  %v2530_v59 = vadd.f32 %v2498_v25, %v5244_v1  ;;  %v2561_v53 = vmul.f32 0.7978845, %v2529_v28  ;;  %v2499_v7 = vmul.f32 %v2467_v36, %v5251_v26  ;;  %v2400_v36 = vmul.f32 0.5, %v5230_v2 }
 0x617   : > { %v2469_v30 = vmul.f32 %v2437_v10, %v5265_v0  ;;  %v2438_v33 = vmul.f32 0.044715, %v5272_v42  ;;  %v5279_v38 = vadd.f32 %v2336_v15, %v5196_v37  ;;  %v2500_v11 = vmul.f32 %v2468_v34, %v5258_v45 }
 0x618   : > { %v3813_v32 = vpop.eup %3812  ;;  %v2338_v21 = vpop.f32.mrf.mxu1  ;;  %v2562_v58 = vmul.f32 0.7978845, %v2530_v59  ;;  %3824 = vtanh.f32 %v2561_v53  ;;  %v2531_v61 = vadd.f32 %v2499_v7, %v5251_v26  ;;  %v2402_v25 = vmul.f32 0.5, %v5244_v1 }
 0x619   : > { %v2470_v63 = vmul.f32 %v2438_v33, %v5272_v42  ;;  %v5286_v60 = vadd.f32 %v2338_v21, %v5200_v46  ;;  %v2532_v20 = vadd.f32 %v2500_v11, %v5258_v45  ;;  %v2501_v16 = vmul.f32 %v2469_v30, %v5265_v0 }
 0x61a   : > { %v2342_v56 = vpop.f32.mrf.mxu1  ;;  %3826 = vtanh.f32 %v2562_v58  ;;  %v2563_v4 = vmul.f32 0.7978845, %v2531_v61  ;;  %v2439_v6 = vmul.f32 0.044715, %v5279_v38  ;;  %v2619_v24 = vadd.f32 1.0, %v3813_v32 }
 0x61b   : > { %v3815_v48 = vpop.eup %3814  ;;  %v2440_v57 = vmul.f32 0.044715, %v5286_v60  ;;  %v2564_v47 = vmul.f32 0.7978845, %v2532_v20  ;;  %v2502_v18 = vmul.f32 %v2470_v63, %v5272_v42  ;;  %v5297_v35 = vadd.f32 %v2342_v56, %v5196_v37 }
 0x61c   : > { %v2344_v31 = vpop.f32.mrf.mxu1  ;;  %v2620_v8 = vadd.f32 1.0, %v3815_v48  ;;  %3828 = vtanh.f32 %v2563_v4  ;;  %v2533_v62 = vadd.f32 %v2501_v16, %v5265_v0  ;;  %v2651_v39 = vmul.f32 %v2619_v24, %v2395_v52 }
 0x61d   : > { %v3817_v50 = vpop.eup %3816  ;;  %v5300_v9 = vadd.f32 %v2344_v31, %v5200_v46  ;;  %v2472_v14 = vmul.f32 %v2440_v57, %v5286_v60  ;;  %3830 = vtanh.f32 %v2564_v47  ;;  %v2534_v49 = vadd.f32 %v2502_v18, %v5272_v42 }
 0x61e   : > { %v2348_v27 = vpop.f32.mrf.mxu1  ;;  %v2652_v40 = vmul.f32 %v2620_v8, %v2396_v3  ;;  %v2621_v29 = vadd.f32 1.0, %v3817_v50  ;;  %v2565_v5 = vmul.f32 0.7978845, %v2533_v62  ;;  %v2471_v41 = vmul.f32 %v2439_v6, %v5279_v38 }
 0x61f   : > { %v3819_v13 = vpop.eup %3818  ;;  %v2442_v23 = vmul.f32 0.044715, %v5300_v9  ;;  %v2566_v54 = vmul.f32 0.7978845, %v2534_v49  ;;  %v2441_v43 = vmul.f32 0.044715, %v5297_v35  ;;  %v2504_v53 = vmul.f32 %v2472_v14, %v5286_v60 }
 0x620   : > { %2786 = vmatprep.mubr.f32.mxu0 %v2652_v40  ;;  %v2350_v51 = vpop.f32.mrf.mxu1  ;;  %v2622_v17 = vadd.f32 1.0, %v3819_v13  ;;  %v2401_v28 = vmul.f32 0.5, %v5237_v55  ;;  %3832 = vtanh.f32 %v2565_v5  ;;  %v2653_v7 = vmul.f32 %v2621_v29, %v2397_v19 }
 0x621   : > { %v3821_v22 = vpop.eup %3820  ;;  %2787 = vmatmul.mubr.f32.vlgmr.msra.gmra.mxu0 %v2651_v39  ;;  %v5313_v10 = vadd.f32 %v2350_v51, %v5200_v46  ;;  %3834 = vtanh.f32 %v2566_v54  ;;  %v2474_v2 = vmul.f32 %v2442_v23, %v5300_v9  ;;  %v5318_v11 = vadd.f32 %v2348_v27, %v5196_v37 }
 0x622   : > { %v3823_v34 = vpop.eup %3822  ;;  %v2354_v15 = vpop.f32.mrf.mxu1  ;;  %v2654_v59 = vmul.f32 %v2622_v17, %v2398_v44  ;;  %v2623_v33 = vadd.f32 1.0, %v3821_v22  ;;  %v2403_v1 = vmul.f32 0.5, %v5251_v26  ;;  %v2536_v32 = vadd.f32 %v2504_v53, %v5286_v60 }
 0x623   : > { %v2624_v30 = vadd.f32 1.0, %v3823_v34  ;;  %v2503_v52 = vmul.f32 %v2471_v41, %v5279_v38  ;;  %v2404_v61 = vmul.f32 0.5, %v5258_v45  ;;  %v5325_v63 = vmul.f32 0.5, %v5272_v42 }
 0x624   : > { %2791 = vmatprep.mubr.f32.mxu0 %v2654_v59  ;;  %v2356_v55 = vpop.f32.mrf.mxu1  ;;  %v5328_v3 = vmul.f32 0.5, %v5265_v0  ;;  %v2444_v19 = vmul.f32 0.044715, %v5313_v10  ;;  %v2568_v20 = vmul.f32 0.7978845, %v2536_v32  ;;  %v2473_v48 = vmul.f32 %v2441_v43, %v5297_v35 }
 0x625   : > { %v3825_v21 = vpop.eup %3824  ;;  %2792 = vmatmul.mubr.f32.gmra.mxu0 %v2653_v7  ;;  %v2656_v58 = vmul.f32 %v2624_v30, %v2400_v36  ;;  %v5332_v56 = vadd.f32 %v2356_v55, %v5200_v46  ;;  %v2535_v4 = vadd.f32 %v2503_v52, %v5279_v38  ;;  %v2655_v45 = vmul.f32 %v2623_v33, %v2399_v12 }
 0x626   : > { %v2360_v26 = vpop.f32.mrf.mxu1  ;;  %v2625_v6 = vadd.f32 1.0, %v3825_v21  ;;  %v2506_v42 = vmul.f32 %v2474_v2, %v5300_v9  ;;  %v2443_v0 = vmul.f32 0.044715, %v5318_v11  ;;  %3836 = vtanh.f32 %v2568_v20 }
 0x627   : > { %v3827_v16 = vpop.eup %3826  ;;  %2796 = vmatprep.mubr.f32.mxu0 %v2656_v58  ;;  %v2567_v44 = vmul.f32 0.7978845, %v2535_v4  ;;  %v5339_v8 = vadd.f32 %v2354_v15, %v5196_v37  ;;  %v5342_v47 = vadd.f32 %v2360_v26, %v5196_v37  ;;  %v5345_v18 = vmul.f32 0.5, %v5286_v60 }
 0x628   : > { %v2362_v57 = vpop.f32.mrf.mxu1  ;;  %v2626_v24 = vadd.f32 1.0, %v3827_v16  ;;  %v2538_v50 = vadd.f32 %v2506_v42, %v5300_v9  ;;  %v2476_v12 = vmul.f32 %v2444_v19, %v5313_v10  ;;  %v2446_v62 = vmul.f32 0.044715, %v5332_v56 }
 0x629   : > { %v3829_v31 = vpop.eup %3828  ;;  %2797 = vmatmul.mubr.f32.gmra.mxu0 %v2655_v45  ;;  %3838 = vtanh.f32 %v2567_v44  ;;  %v5351_v49 = vadd.f32 %v2362_v57, %v5200_v46  ;;  %v2657_v13 = vmul.f32 %v2625_v6, %v2401_v28  ;;  %v2475_v29 = vmul.f32 %v2443_v0, %v5318_v11 }
 0x62a   : > { %v2366_v14 = vpop.f32.mrf.mxu1  ;;  %v2658_v27 = vmul.f32 %v2626_v24, %v2402_v25  ;;  %v3831_v40 = vpop.eup %3830  ;;  %v2627_v23 = vadd.f32 1.0, %v3829_v31  ;;  %v2570_v39 = vmul.f32 0.7978845, %v2538_v50  ;;  %v5355_v41 = vmul.f32 0.5, %v5279_v38 }
 0x62b   : > { %v2628_v5 = vadd.f32 1.0, %v3831_v40  ;;  %v2505_v51 = vmul.f32 %v2473_v48, %v5297_v35  ;;  %v2445_v17 = vmul.f32 0.044715, %v5339_v8  ;;  %v2447_v36 = vmul.f32 0.044715, %v5342_v47 }
 0x62c   : > { %2801 = vmatprep.mubr.f32.mxu0 %v2658_v27  ;;  %v2368_v60 = vpop.f32.mrf.mxu1  ;;  %v5361_v54 = vmul.f32 0.5, %v5300_v9  ;;  %3840 = vtanh.f32 %v2570_v39  ;;  %v2478_v43 = vmul.f32 %v2446_v62, %v5332_v56  ;;  %v2508_v38 = vmul.f32 %v2476_v12, %v5313_v10 }
 0x62d   : > { %2802 = vmatmul.mubr.f32.gmra.mxu0 %v2657_v13  ;;  %v3833_v22 = vpop.eup %3832  ;;  %v2660_v28 = vmul.f32 %v2628_v5, %v2404_v61  ;;  %v2537_v34 = vadd.f32 %v2505_v51, %v5297_v35  ;;  %v2448_v59 = vmul.f32 0.044715, %v5351_v49  ;;  %v5368_v53 = vadd.f32 %v2366_v14, %v5196_v37 }
 0x62e   : > { %v2372_v25 = vpop.f32.mrf.mxu1  ;;  %v3835_v15 = vpop.eup %3834  ;;  %v2659_v2 = vmul.f32 %v2627_v23, %v2403_v1  ;;  %v2629_v7 = vadd.f32 1.0, %v3833_v22  ;;  %v2540_v55 = vadd.f32 %v2508_v38, %v5313_v10  ;;  %v2507_v32 = vmul.f32 %v2475_v29, %v5318_v11 }
 0x62f   : > { %2806 = vmatprep.mubr.f32.mxu0 %v2660_v28  ;;  %v2630_v30 = vadd.f32 1.0, %v3835_v15  ;;  %v2569_v33 = vmul.f32 0.7978845, %v2537_v34  ;;  %v2477_v52 = vmul.f32 %v2445_v17, %v5339_v8  ;;  %v2479_v21 = vmul.f32 %v2447_v36, %v5342_v47 }
 0x630   : > { %v2374_v9 = vpop.f32.mrf.mxu1  ;;  %v5375_v58 = vadd.f32 %v2368_v60, %v5200_v46  ;;  %v5378_v61 = vmul.f32 0.5, %v5297_v35  ;;  %v2572_v26 = vmul.f32 0.7978845, %v2540_v55  ;;  %v2539_v20 = vadd.f32 %v2507_v32, %v5318_v11 }
 0x631   : > { %2807 = vmatmul.mubr.f32.gmra.mxu0 %v2659_v2  ;;  %v2662_v19 = vmul.f32 %v2630_v30, %v5325_v63  ;;  %3842 = vtanh.f32 %v2569_v33  ;;  %v2480_v4 = vmul.f32 %v2448_v59, %v5351_v49  ;;  %v5384_v16 = vadd.f32 %v2374_v9, %v5200_v46 }
 0x632   : > { %v2378_v1 = vpop.f32.mrf.mxu1  ;;  %v2661_v48 = vmul.f32 %v2629_v7, %v5328_v3  ;;  %v5388_v45 = vmul.f32 0.5, %v5313_v10  ;;  %v2449_v35 = vmul.f32 0.044715, %v5368_v53  ;;  %3844 = vtanh.f32 %v2572_v26 }
 0x633   : > { %2811 = vmatprep.mubr.f32.mxu0 %v2662_v19  ;;  %v2571_v63 = vmul.f32 0.7978845, %v2539_v20  ;;  %v2510_v42 = vmul.f32 %v2478_v43, %v5332_v56  ;;  %v3837_v0 = vpop.eup %3836  ;;  %v2450_v57 = vmul.f32 0.044715, %v5375_v58  ;;  %v5394_v24 = vadd.f32 %v2372_v25, %v5196_v37 }
 0x634   : > { %v2380_v6 = vpop.f32.mrf.mxu1  ;;  %v5397_v3 = vmul.f32 0.5, %v5318_v11  ;;  %v2509_v10 = vmul.f32 %v2477_v52, %v5339_v8  ;;  %v5401_v44 = vadd.f32 %v2378_v1, %v5196_v37  ;;  %v2632_v50 = vadd.f32 1.0, %v3837_v0 }
 0x635   : > { %2812 = vmatmul.mubr.f32.gmra.mxu0 %v2661_v48  ;;  %3846 = vtanh.f32 %v2571_v63  ;;  %v2542_v12 = vadd.f32 %v2510_v42, %v5332_v56  ;;  %v2452_v14 = vmul.f32 0.044715, %v5384_v16  ;;  %v5406_v27 = vadd.f32 %v2380_v6, %v5200_v46 }
 0x636   : > { %v2384_v31 = vpop.f32.mrf.mxu1  ;;  %v3839_v62 = vpop.eup %3838  ;;  %v2541_v11 = vadd.f32 %v2509_v10, %v5339_v8  ;;  %v2664_v13 = vmul.f32 %v2632_v50, %v5345_v18  ;;  %v2512_v60 = vmul.f32 %v2480_v4, %v5351_v49  ;;  %v2482_v5 = vmul.f32 %v2450_v57, %v5375_v58 }
 0x637   : > { %v5409_v40 = vadd.f32 %v2384_v31, %v5196_v37  ;;  %v2631_v39 = vadd.f32 1.0, %v3839_v62  ;;  %v2574_v29 = vmul.f32 0.7978845, %v2542_v12  ;;  %v2451_v51 = vmul.f32 0.044715, %v5394_v24 }
 0x638   : > { %v2386_v23 = vpop.f32.mrf.mxu1  ;;  %v2573_v36 = vmul.f32 0.7978845, %v2541_v11  ;;  %v2453_v43 = vmul.f32 0.044715, %v5401_v44  ;;  %2816 = vmatprep.mubr.f32.mxu0 %v2664_v13  ;;  %v2544_v28 = vadd.f32 %v2512_v60, %v5351_v49  ;;  %v2481_v34 = vmul.f32 %v2449_v35, %v5368_v53 }
 0x639   : > { %v5417_v17 = vadd.f32 %v2386_v23, %v5200_v46  ;;  %v3841_v22 = vpop.eup %3840  ;;  %v2663_v25 = vmul.f32 %v2631_v39, %v5355_v41  ;;  %3848 = vtanh.f32 %v2574_v29  ;;  %v2454_v38 = vmul.f32 0.044715, %v5406_v27 }
 0x63a   : > { %v2390_v18 = vpop.f32.mrf.mxu1  ;;  %v2455_v15 = vmul.f32 0.044715, %v5409_v40  ;;  %v2634_v59 = vadd.f32 1.0, %v3841_v22  ;;  %v2484_v2 = vmul.f32 %v2452_v14, %v5384_v16  ;;  %3850 = vtanh.f32 %v2573_v36 }
 0x63b   : > { %2817 = vmatmul.mubr.f32.gmra.mxu0 %v2663_v25  ;;  %v2576_v9 = vmul.f32 0.7978845, %v2544_v28  ;;  %v2511_v30 = vmul.f32 %v2479_v21, %v5342_v47  ;;  %v2483_v41 = vmul.f32 %v2451_v51, %v5394_v24  ;;  %v2456_v33 = vmul.f32 0.044715, %v5417_v17 }
 0x63c   : > { %v2392_v7 = vpop.f32.mrf.mxu1  ;;  %v2666_v55 = vmul.f32 %v2634_v59, %v5361_v54  ;;  %v2485_v52 = vmul.f32 %v2453_v43, %v5401_v44  ;;  %v2514_v19 = vmul.f32 %v2482_v5, %v5375_v58  ;;  %v2486_v20 = vmul.f32 %v2454_v38, %v5406_v27 }
 0x63d   : > { %v5431_v32 = vadd.f32 %v2392_v7, %v5200_v46  ;;  %3852 = vtanh.f32 %v2576_v9  ;;  %v2543_v1 = vadd.f32 %v2511_v30, %v5342_v47  ;;  %v2487_v21 = vmul.f32 %v2455_v15, %v5409_v40 }
 0x63e   : > { %v3843_v26 = vpop.eup %3842  ;;  %v5439_v4 = vadd.f32 %v2390_v18, %v5196_v37  ;;  %2821 = vmatprep.mubr.f32.mxu0 %v2666_v55  ;;  %v2513_v54 = vmul.f32 %v2481_v34, %v5368_v53  ;;  %v2546_v35 = vadd.f32 %v2514_v19, %v5375_v58  ;;  %v2516_v6 = vmul.f32 %v2484_v2, %v5384_v16 }
 0x63f   : > { %v2633_v46 = vadd.f32 1.0, %v3843_v26  ;;  %v2575_v48 = vmul.f32 0.7978845, %v2543_v1  ;;  %v3845_v63 = vpop.eup %3844  ;;  %v2488_v42 = vmul.f32 %v2456_v33, %v5417_v17  ;;  %v2458_v0 = vmul.f32 0.044715, %v5431_v32 }
 0x640   : > { %v2545_v57 = vadd.f32 %v2513_v54, %v5368_v53  ;;  %v2515_v10 = vmul.f32 %v2483_v41, %v5394_v24  ;;  %v2636_v31 = vadd.f32 1.0, %v3845_v63  ;;  %v2578_v50 = vmul.f32 0.7978845, %v2546_v35 }
 0x641   : > { %v2665_v37 = vmul.f32 %v2633_v46, %v5378_v61  ;;  %3854 = vtanh.f32 %v2575_v48  ;;  %v2457_v62 = vmul.f32 0.044715, %v5439_v4  ;;  %v2548_v11 = vadd.f32 %v2516_v6, %v5384_v16 }
 0x642   : > { %v3847_v12 = vpop.eup %3846  ;;  %v2577_v14 = vmul.f32 0.7978845, %v2545_v57  ;;  %v2547_v13 = vadd.f32 %v2515_v10, %v5394_v24  ;;  %v2668_v23 = vmul.f32 %v2636_v31, %v5388_v45  ;;  %3856 = vtanh.f32 %v2578_v50 }
 0x643   : > { %2822 = vmatmul.mubr.f32.gmra.mxu0 %v2665_v37  ;;  %v2635_v39 = vadd.f32 1.0, %v3847_v12  ;;  %v2518_v29 = vmul.f32 %v2486_v20, %v5406_v27  ;;  %v2490_v61 = vmul.f32 %v2458_v0, %v5431_v32  ;;  %v2580_v60 = vmul.f32 0.7978845, %v2548_v11 }
 0x644   : > { %3858 = vtanh.f32 %v2577_v14  ;;  %v2579_v5 = vmul.f32 0.7978845, %v2547_v13  ;;  %2826 = vmatprep.mubr.f32.mxu0 %v2668_v23  ;;  %v2414_v36 = vmul.f32 0.5, %v5332_v56  ;;  %v2517_v43 = vmul.f32 %v2485_v52, %v5401_v44 }
 0x645   : > { %v2667_v51 = vmul.f32 %v2635_v39, %v5397_v3  ;;  %v2550_v22 = vadd.f32 %v2518_v29, %v5406_v27  ;;  %v2489_v45 = vmul.f32 %v2457_v62, %v5439_v4  ;;  %3860 = vtanh.f32 %v2580_v60 }
 0x646   : > { %v3849_v25 = vpop.eup %3848  ;;  %v2520_v18 = vmul.f32 %v2488_v42, %v5417_v17  ;;  %v2519_v28 = vmul.f32 %v2487_v21, %v5409_v40  ;;  %3862 = vtanh.f32 %v2579_v5  ;;  %v2549_v3 = vadd.f32 %v2517_v43, %v5401_v44 }
 0x647   : > { %2827 = vmatmul.mubr.f32.gmra.mxu0 %v2667_v51  ;;  %v2638_v34 = vadd.f32 1.0, %v3849_v25  ;;  %v2582_v38 = vmul.f32 0.7978845, %v2550_v22  ;;  %v3851_v15 = vpop.eup %3850  ;;  %v2413_v56 = vmul.f32 0.5, %v5339_v8  ;;  %v2522_v7 = vmul.f32 %v2490_v61, %v5431_v32 }
 0x648   : > { %v2552_v59 = vadd.f32 %v2520_v18, %v5417_v17  ;;  %v2551_v2 = vadd.f32 %v2519_v28, %v5409_v40  ;;  %v2637_v30 = vadd.f32 1.0, %v3851_v15  ;;  %v2581_v41 = vmul.f32 0.7978845, %v2549_v3 }
 0x649   : > { %v2670_v9 = vmul.f32 %v2638_v34, %v2414_v36  ;;  %3864 = vtanh.f32 %v2582_v38  ;;  %v2416_v55 = vmul.f32 0.5, %v5351_v49  ;;  %v2554_v19 = vadd.f32 %v2522_v7, %v5431_v32  ;;  %v5485_v7 = vld [vmem:[%s5643_s13] ss:$0 sm:$0xff] }
 0x64a   : > { %v3853_v33 = vpop.eup %3852  ;;  %v2584_v52 = vmul.f32 0.7978845, %v2552_v59  ;;  %v2583_v1 = vmul.f32 0.7978845, %v2551_v2  ;;  %v2669_v26 = vmul.f32 %v2637_v30, %v2413_v56  ;;  %3866 = vtanh.f32 %v2581_v41 }
 0x64b   : > { %2831 = vmatprep.mubr.f32.mxu0 %v2670_v9  ;;  %v2640_v8 = vadd.f32 1.0, %v3853_v33  ;;  %v2521_v20 = vmul.f32 %v2489_v45, %v5439_v4  ;;  %v2586_v21 = vmul.f32 0.7978845, %v2554_v19  ;;  %v2415_v49 = vmul.f32 0.5, %v5342_v47 }
 0x64c   : > { %3868 = vtanh.f32 %v2584_v52  ;;  %2832 = vmatmul.mubr.f32.gmra.mxu0 %v2669_v26  ;;  %v2418_v57 = vmul.f32 0.5, %v5375_v58  ;;  %v2417_v12 = vmul.f32 0.5, %v5368_v53  ;;  %v2420_v14 = vmul.f32 0.5, %v5384_v16 }
 0x64d   : > { %v2672_v54 = vmul.f32 %v2640_v8, %v2416_v55  ;;  %3870 = vtanh.f32 %v2583_v1  ;;  %v2553_v46 = vadd.f32 %v2521_v20, %v5439_v4  ;;  %v2419_v58 = vmul.f32 0.5, %v5394_v24 }
 0x64e   : > { %v3855_v48 = vpop.eup %3854  ;;  %3872 = vtanh.f32 %v2586_v21  ;;  %v2422_v29 = vmul.f32 0.5, %v5406_v27  ;;  %v2424_v16 = vmul.f32 0.5, %v5417_v17  ;;  %v2421_v45 = vmul.f32 0.5, %v5401_v44 }
 0x64f   : > { %2836 = vmatprep.mubr.f32.mxu0 %v2672_v54  ;;  %v2639_v35 = vadd.f32 1.0, %v3855_v48  ;;  %v2585_v6 = vmul.f32 0.7978845, %v2553_v46  ;;  %v3857_v63 = vpop.eup %3856  ;;  %v2426_v38 = vmul.f32 0.5, %v5431_v32  ;;  %v2423_v3 = vmul.f32 0.5, %v5409_v40 }
 0x650   : > { %v2642_v10 = vadd.f32 1.0, %v3857_v63  ;;  %v2425_v59 = vmul.f32 0.5, %v5439_v4 }
 0x651   : > { %v3859_v42 = vpop.eup %3858  ;;  %v2671_v0 = vmul.f32 %v2639_v35, %v2415_v49  ;;  %3874 = vtanh.f32 %v2585_v6 }
 0x652   : > { %v2641_v37 = vadd.f32 1.0, %v3859_v42  ;;  %v3861_v31 = vpop.eup %3860  ;;  %v2674_v50 = vmul.f32 %v2642_v10, %v2418_v57 }
 0x653   : > { %2837 = vmatmul.mubr.f32.gmra.mxu0 %v2671_v0  ;;  %v3863_v62 = vpop.eup %3862  ;;  %v2644_v11 = vadd.f32 1.0, %v3861_v31 }
 0x654   : > { %2841 = vmatprep.mubr.f32.mxu0 %v2674_v50  ;;  %v2673_v47 = vmul.f32 %v2641_v37, %v2417_v12  ;;  %v2643_v13 = vadd.f32 1.0, %v3863_v62 }
 0x655   : > { %v2676_v39 = vmul.f32 %v2644_v11, %v2420_v14 }
 0x656   : > { %v3865_v23 = vpop.eup %3864  ;;  %v2675_v51 = vmul.f32 %v2643_v13, %v2419_v58 }
 0x657   : > { %2842 = vmatmul.mubr.f32.gmra.mxu0 %v2673_v47  ;;  %v2646_v61 = vadd.f32 1.0, %v3865_v23  ;;  %v3867_v60 = vpop.eup %3866 }
 0x658   : > { %2846 = vmatprep.mubr.f32.mxu0 %v2676_v39  ;;  %v2645_v36 = vadd.f32 1.0, %v3867_v60 }
 0x659   : > { %v3869_v5 = vpop.eup %3868  ;;  %v2678_v53 = vmul.f32 %v2646_v61, %v2422_v29 }
 0x65a   : > { %v3871_v22 = vpop.eup %3870  ;;  %v2648_v43 = vadd.f32 1.0, %v3869_v5  ;;  %v2677_v28 = vmul.f32 %v2645_v36, %v2421_v45 }
 0x65b   : > { %v3873_v25 = vpop.eup %3872  ;;  %2847 = vmatmul.mubr.f32.gmra.mxu0 %v2675_v51  ;;  %v2647_v27 = vadd.f32 1.0, %v3871_v22 }
 0x65c   : > { %2851 = vmatprep.mubr.f32.mxu0 %v2678_v53  ;;  %v2680_v18 = vmul.f32 %v2648_v43, %v2424_v16  ;;  %v2650_v24 = vadd.f32 1.0, %v3873_v25 }
 0x65d   : > { %v2679_v17 = vmul.f32 %v2647_v27, %v2423_v3 }
 0x65e   : > { %v3875_v34 = vpop.eup %3874  ;;  %v2682_v15 = vmul.f32 %v2650_v24, %v2426_v38 }
 0x65f   : > { %2852 = vmatmul.mubr.f32.gmra.mxu0 %v2677_v28  ;;  %v2649_v56 = vadd.f32 1.0, %v3875_v34 }
 0x660   : > { %2856 = vmatprep.mubr.f32.mxu0 %v2680_v18 }
 0x661   : > { %v2681_v44 = vmul.f32 %v2649_v56, %v2425_v59 }
 0x663   : > { %2857 = vmatmul.mubr.f32.gmra.mxu0 %v2679_v17 }
 0x664   : > { %2861 = vmatprep.mubr.f32.mxu0 %v2682_v15 }
 0x667   : > { %2862 = vmatmul.mubr.f32.gmra.mxu0 %v2681_v44 }
 0x6e1   : > { %v3212_v2 = vpop.f32.mrf.mxu0 }
 0x6e3   : > { %v3213_v32 = vpop.f32.mrf.mxu0 }
 0x6e4   : > { %v3214_v9 = vadd.f32 %v3213_v32, %v3212_v2 }
 0x6e5   : > { %v3215_v40 = vpop.f32.mrf.mxu0 }
 0x6e6   : > { %v2789_v30 = vadd.f32 %v3214_v9, %v5485_v7 }
 0x6e7   : > { %v3216_v41 = vpop.f32.mrf.mxu0 }
 0x6e8   : > { %2867 = vst [vmem:[%s5490_s28] sm:$0xff] %v2789_v30  ;;  %v3217_v4 = vadd.f32 %v3216_v41, %v3215_v40 }
 0x6e9   : > { %v3218_v33 = vpop.f32.mrf.mxu0 }
 0x6ea   : > { %v2794_v55 = vadd.f32 %v3217_v4, %v5485_v7 }
 0x6eb   : > { %v3219_v52 = vpop.f32.mrf.mxu0 }
 0x6ec   : > { %2868 = vst [vmem:[%s5490_s28 + $0x8] sm:$0xff] %v2794_v55  ;;  %v3220_v1 = vadd.f32 %v3219_v52, %v3218_v33 }
 0x6ed   : > { %v3221_v19 = vpop.f32.mrf.mxu0 }
 0x6ee   : > { %v2799_v26 = vadd.f32 %v3220_v1, %v5485_v7 }
 0x6ef   : > { %v3222_v8 = vpop.f32.mrf.mxu0 }
 0x6f0   : > { %2869 = vst [vmem:[%s5490_s28 + $0x10] sm:$0xff] %v2799_v26  ;;  %v3223_v20 = vadd.f32 %v3222_v8, %v3221_v19 }
 0x6f1   : > { %v3224_v21 = vpop.f32.mrf.mxu0 }
 0x6f2   : > { %v2804_v54 = vadd.f32 %v3223_v20, %v5485_v7 }
 0x6f3   : > { %v3225_v46 = vpop.f32.mrf.mxu0 }
 0x6f4   : > { %2870 = vst [vmem:[%s5490_s28 + $0x18] sm:$0xff] %v2804_v54  ;;  %v3226_v48 = vadd.f32 %v3225_v46, %v3224_v21 }
 0x6f5   : > { %v3227_v49 = vpop.f32.mrf.mxu0 }
 0x6f6   : > { %v2809_v35 = vadd.f32 %v3226_v48, %v5485_v7 }
 0x6f7   : > { %v3228_v6 = vpop.f32.mrf.mxu0 }
 0x6f8   : > { %2871 = vst [vmem:[%s5490_s28 + $0x20] sm:$0xff] %v2809_v35  ;;  %v3229_v63 = vadd.f32 %v3228_v6, %v3227_v49 }
 0x6fa   : > { %v2814_v42 = vadd.f32 %v3229_v63, %v5485_v7 }
 0x6fb   : > { %v3230_v0 = vpop.f32.mrf.mxu0 }
 0x6fc   : > { %2872 = vst [vmem:[%s5490_s28 + $0x28] sm:$0xff] %v2814_v42 }
 0x6fd   : > { %v3231_v57 = vpop.f32.mrf.mxu0 }
 0x6fe   : > { %v3232_v10 = vadd.f32 %v3231_v57, %v3230_v0 }
 0x700   : > { %v2819_v37 = vadd.f32 %v3232_v10, %v5485_v7 }
 0x702   : > { %2873 = vst [vmem:[%s5490_s28 + $0x30] sm:$0xff] %v2819_v37 }
 0x703   : > { %v3233_v31 = vpop.f32.mrf.mxu0 }
 0x705   : > { %v3234_v50 = vpop.f32.mrf.mxu0 }
 0x706   : > { %v3235_v12 = vadd.f32 %v3234_v50, %v3233_v31 }
 0x707   : > { %v3236_v62 = vpop.f32.mrf.mxu0 }
 0x708   : > { %v2824_v14 = vadd.f32 %v3235_v12, %v5485_v7 }
 0x709   : > { %v3237_v11 = vpop.f32.mrf.mxu0 }
 0x70a   : > { %2874 = vst [vmem:[%s5490_s28 + $0x38] sm:$0xff] %v2824_v14  ;;  %v3238_v47 = vadd.f32 %v3237_v11, %v3236_v62 }
 0x70c   : > { %v2829_v13 = vadd.f32 %v3238_v47, %v5485_v7  ;;  %v3239_v23 = vpop.f32.mrf.mxu0 }
 0x70e   : > { %2875 = vst [vmem:[%s5490_s28 + $0x40] sm:$0xff] %v2829_v13  ;;  %v3240_v39 = vpop.f32.mrf.mxu0 }
 0x70f   : > { %v3241_v58 = vadd.f32 %v3240_v39, %v3239_v23 }
 0x711   : > { %v2834_v29 = vadd.f32 %v3241_v58, %v5485_v7 }
 0x713   : > { %v3242_v61 = vpop.f32.mrf.mxu0  ;;  %2876 = vst [vmem:[%s5490_s28 + $0x48] sm:$0xff] %v2834_v29 }
 0x715   : > { %v3243_v60 = vpop.f32.mrf.mxu0 }
 0x716   : > { %v3244_v5 = vadd.f32 %v3243_v60, %v3242_v61 }
 0x717   : > { %v3245_v51 = vpop.f32.mrf.mxu0 }
 0x718   : > { %v2839_v53 = vadd.f32 %v3244_v5, %v5485_v7 }
 0x719   : > { %v3246_v36 = vpop.f32.mrf.mxu0 }
 0x71a   : > { %2877 = vst [vmem:[%s5490_s28 + $0x50] sm:$0xff] %v2839_v53  ;;  %v3247_v22 = vadd.f32 %v3246_v36, %v3245_v51 }
 0x71b   : > { %v3248_v16 = vpop.f32.mrf.mxu0 }
 0x71c   : > { %v2844_v43 = vadd.f32 %v3247_v22, %v5485_v7 }
 0x71d   : > { %v3249_v25 = vpop.f32.mrf.mxu0 }
 0x71e   : > { %2878 = vst [vmem:[%s5490_s28 + $0x58] sm:$0xff] %v2844_v43  ;;  %v3250_v45 = vadd.f32 %v3249_v25, %v3248_v16 }
 0x71f   : > { %v3251_v18 = vpop.f32.mrf.mxu0 }
 0x720   : > { %v2849_v24 = vadd.f32 %v3250_v45, %v5485_v7 }
 0x721   : > { %v3252_v28 = vpop.f32.mrf.mxu0 }
 0x722   : > { %2879 = vst [vmem:[%s5490_s28 + $0x60] sm:$0xff] %v2849_v24  ;;  %v3253_v27 = vadd.f32 %v3252_v28, %v3251_v18 }
 0x723   : > { %v3254_v34 = vpop.f32.mrf.mxu0 }
 0x724   : > { %v2854_v38 = vadd.f32 %v3253_v27, %v5485_v7 }
 0x725   : > { %v3255_v3 = vpop.f32.mrf.mxu0 }
 0x726   : > { %2880 = vst [vmem:[%s5490_s28 + $0x68] sm:$0xff] %v2854_v38  ;;  %v3256_v15 = vadd.f32 %v3255_v3, %v3254_v34 }
 0x727   : > { %v3257_v17 = vpop.f32.mrf.mxu0 }
 0x728   : > { %v2859_v56 = vadd.f32 %v3256_v15, %v5485_v7 }
 0x729   : > { %v3258_v59 = vpop.f32.mrf.mxu0 }
 0x72a   : > { %2881 = vst [vmem:[%s5490_s28 + $0x70] sm:$0xff] %v2859_v56  ;;  %v3259_v44 = vadd.f32 %v3258_v59, %v3257_v17 }
 0x72c   : > { %v2864_v2 = vadd.f32 %v3259_v44, %v5485_v7 }
 0x72e   : > { %2882 = vst [vmem:[%s5490_s28 + $0x78] sm:$0xff] %v2864_v2 }
 0x72f   : > { %4047 = shalt.err (!%p4044_p3)
}
 0x730   : > { %s4048_s27 = scalar_lea.hbm %s5526_s1, 2048  ;;  %s4052_s28 = scalar_lea.hbm %s5644_s18, 4096 }
 0x731   : > { %p4049_p4 = scmp.ne.s32.totalorder %s5526_s1, %s4048_s27  ;;  %p4053_p2 = scmp.lt.s32.totalorder %s5526_s1, %s5644_s18 }
 0x732   : > { %p4054_p7 = scmp.lt.s32.totalorder %s4052_s28, %s4048_s27 }
 0x733   : > { %p4050_p12 = pnand %p4049_p4, %p5645_p11 }
 0x734   : > { %p4055_p8 = por %p4054_p7, %p4053_p2 }
 0x735   : > { %p4051_p6 = pneg %p4050_p12 }
 0x737   : > { %p4056_p10 = pnand %p4055_p8, %p4051_p6 }
 0x739   : > { %4059 = shalt.err (!%p4056_p10)
}
 0x73a   : > { %s4124_s10 = smov 128   ;;  %s4125_s3 = smov 8  }
 0x73b   : > { %3506 = dma.vmem_to_hbm [thread:$0]  (%p5645_p11), %s5528_s14, 2048, %s5526_s1, %s2884_s21, %s4124_s10, %s4124_s10, %s4125_s3  }
 0x73c PF: > { %s2912_s19 = sand.u32 1, %s4098_s29   ;;  %p5646_p0 = scmp.ne.s32.totalorder %s5624_s23, 0 }
 0x73d   : > { %p5647_p13 = scmp.ge.s32.totalorder %s4110_s16, 2  ;;  %s2913_s5 = scalar_lea.sflag [#allocation4], %s2912_s19 }
 0x73f   : > { %p3529_p5 = pnand %p5647_p13, %p5646_p0 }
 0x741   : > { %p3530_p9 = pneg %p3529_p5 }
 0x743   : > { %4093 = dma.done.wait (%p3530_p9), %s2913_s5, 2048  }
 0x744   : > { %4095 = vsyncadd (%p3530_p9), %s2913_s5, 4294965248  ;;  %s5648_s20 = sld [smem:[#allocation19_spill]]  ;;  %p30_p1 = scmp.ge.s32.totalorder %s4308_s26, 4  }
 0x745   : > { %s5649_s29 = smov %s4102_s30  ;;  %s5650_s30 = smov %s4106_s15 }
 0x746   : > { %s5652_s16 = smov %s4308_s26  ;;  %32 = sbr.rel (!%p30_p1) target bundleno = 16 (0x10), region = 143 }
 0x74a   : > { %s5651_s15 = smov %s5648_s20 }
 0x74b   :  { %2918 = vsyncpa [#allocation3], 1 }
 0x74c   :  { %2920 = vsyncpa [#allocation3 + $0x1], 1 }
 0x74d   :  { %2921 = vsyncpa [#allocation6], 1 }
 0x74e   :  { %2922 = vsyncpa [#allocation9], 1 }
 0x74f   :  { %2923 = vsyncpa [#allocation12], 1 }
 0x750   :  { %2924 = vsyncpa [#allocation4], 1 }
 0x751   :  { %2926 = vsyncpa [#allocation4 + $0x1], 1 }

</bundles_post_ra>
